<compile_context>
chip_gen: v7x
topology: tpu7x:2x2x1
jax: 0.10.0
libtpu: 0.0.40
codegen_flags: <defaults>
</compile_context>

<pallas_src>
import functools
import math

import numpy as np

import jax
import jax.numpy as jnp
from jax.experimental import pallas as pl
from jax.experimental.pallas import tpu as pltpu


# --------------------------------------------------------------------------- #
# Tiling helpers
# --------------------------------------------------------------------------- #

def _row_tiling(M):
    """Pick (row_tile, padded_rows).  Prefers large tiles and >= 2 grid steps
    (so a "parallel" row grid can shard across v7x's 2 TensorCores); rows are
    padded up to a multiple of the tile (multiple of 8 -> legal sublane block)."""
    for tm in (512, 256, 128):
        if M >= 2 * tm:
            return tm, pl.cdiv(M, tm) * tm
    Mp = pl.cdiv(M, 8) * 8
    if Mp >= 128:
        tm = pl.cdiv(Mp, 16) * 8          # ~half the rows, 8-aligned -> 2 grid steps
        return tm, pl.cdiv(Mp, tm) * tm
    return Mp, Mp                          # tiny problem: single tile


def _pad_rows(x, Mp, value=0.0):
    M = x.shape[0]
    if Mp == M:
        return x
    return jnp.pad(x, ((0, Mp - M), (0, 0)), constant_values=value)


def _mosaic_params():
    return pltpu.CompilerParams(dimension_semantics=("parallel",))


def _softmax_group_constants(off_dim, attn_dim, group, qn):
    """Constants driving the in-kernel per-head softmax.

    amask: (1, qn) f32, 1.0 on attention-logit lanes.
    gmat : (qn, qn) f32, 1.0 where two lanes belong to the same head's softmax group
           (so  e @ gmat  gives every attention lane its own group's sum)."""
    lane = np.arange(qn)
    in_attn = (lane >= off_dim) & (lane < off_dim + attn_dim)
    gid = np.where(in_attn, (lane - off_dim) // group, -1)
    same = (gid[:, None] == gid[None, :]) & in_attn[:, None] & in_attn[None, :]
    return jnp.asarray(same.astype(np.float32)), jnp.asarray(in_attn.astype(np.float32)[None, :])


# --------------------------------------------------------------------------- #
# Pallas kernels
# --------------------------------------------------------------------------- #

def _attn_in_proj_kernel(src_ref, pos_ref, maskf_ref, wv_ref, bv_ref,
                         wq_ref, bq_ref, gmat_ref, amask_ref,
                         val_ref, qcat_ref):
    """Fused: value projection (+ mask fill) and the concatenated
    [sampling-offset | attention-weight | pad] projection with per-head softmax."""
    src = src_ref[...]
    q = src + pos_ref[...]

    # value projection; padding-mask zero-fill fused into the epilogue
    v = jnp.dot(src.astype(jnp.bfloat16), wv_ref[...],
                preferred_element_type=jnp.float32) + bv_ref[...]
    val_ref[...] = (v * (1.0 - maskf_ref[...])).astype(val_ref.dtype)

    # lane-dense (128-wide) fused offset + attention-weight projection
    acc = jnp.dot(q.astype(jnp.bfloat16), wq_ref[...],
                  preferred_element_type=jnp.float32) + bq_ref[...]

    # per-head softmax over the attention-logit lanes, fully vectorized:
    #  - max-shift with the row max over the whole attention block (exact softmax
    #    up to fp rounding; clipped so no group's exponentials can underflow to 0),
    #  - per-group sums via one small constant matmul (MXU).
    amask = amask_ref[...]                                    # (1, QN)
    m = jnp.max(acc + (amask - 1.0) * 1e30, axis=-1, keepdims=True)
    e = jnp.exp(jnp.clip(acc - m, -80.0, 80.0)) * amask       # zero outside attn lanes
    s = jnp.dot(e, gmat_ref[...], preferred_element_type=jnp.float32)
    sm = e / (s + (1.0 - amask))                              # denom >= exp(-80) on attn lanes
    qcat_ref[...] = (acc * (1.0 - amask) + sm).astype(qcat_ref.dtype)


def _out_proj_ln_kernel(a_ref, r_ref, w_ref, b_ref, g_ref, bt_ref, o_ref, *, eps):
    """attn output projection + residual + LayerNorm1."""
    y = jnp.dot(a_ref[...].astype(jnp.bfloat16), w_ref[...],
                preferred_element_type=jnp.float32) + b_ref[...]
    x = r_ref[...] + y
    mu = jnp.mean(x, axis=-1, keepdims=True)
    var = jnp.mean((x - mu) ** 2, axis=-1, keepdims=True)
    o_ref[...] = ((x - mu) * jax.lax.rsqrt(var + eps) * g_ref[...]
                  + bt_ref[...]).astype(o_ref.dtype)


def _ffn_ln_kernel(x_ref, w1_ref, b1_ref, w2_ref, b2_ref, g_ref, bt_ref, o_ref, *, eps):
    """Fused FFN (relu(x@W1+b1)@W2+b2) + residual + LayerNorm2; the hidden never leaves VMEM."""
    x = x_ref[...]
    h = jnp.dot(x.astype(jnp.bfloat16), w1_ref[...],
                preferred_element_type=jnp.float32) + b1_ref[...]
    h = jnp.maximum(h, 0.0)
    y = jnp.dot(h.astype(jnp.bfloat16), w2_ref[...],
                preferred_element_type=jnp.float32) + b2_ref[...]
    z = x + y
    mu = jnp.mean(z, axis=-1, keepdims=True)
    var = jnp.mean((z - mu) ** 2, axis=-1, keepdims=True)
    o_ref[...] = ((z - mu) * jax.lax.rsqrt(var + eps) * g_ref[...]
                  + bt_ref[...]).astype(o_ref.dtype)


def _ffn_ln_final_kernel(x_ref, w1_ref, b1_ref, w2_ref, b2_ref, g_ref, bt_ref,
                         gf_ref, bf_ref, o_ref, *, eps):
    """Same as _ffn_ln_kernel but additionally applies the final encoder LayerNorm
    (last layer only) so the activations are not re-read from HBM just for a norm."""
    x = x_ref[...]
    h = jnp.dot(x.astype(jnp.bfloat16), w1_ref[...],
                preferred_element_type=jnp.float32) + b1_ref[...]
    h = jnp.maximum(h, 0.0)
    y = jnp.dot(h.astype(jnp.bfloat16), w2_ref[...],
                preferred_element_type=jnp.float32) + b2_ref[...]
    z = x + y
    mu = jnp.mean(z, axis=-1, keepdims=True)
    var = jnp.mean((z - mu) ** 2, axis=-1, keepdims=True)
    z = (z - mu) * jax.lax.rsqrt(var + eps) * g_ref[...] + bt_ref[...]
    mu2 = jnp.mean(z, axis=-1, keepdims=True)
    var2 = jnp.mean((z - mu2) ** 2, axis=-1, keepdims=True)
    o_ref[...] = ((z - mu2) * jax.lax.rsqrt(var2 + eps) * gf_ref[...]
                  + bf_ref[...]).astype(o_ref.dtype)


# --------------------------------------------------------------------------- #
# pallas_call wrappers
# --------------------------------------------------------------------------- #
# Weight blocks use a constant index_map, so Pallas fetches them once and keeps them
# resident in VMEM across the row grid.  At production sizes, cap tm / tile FFN1's N
# (or raise vmem_limit_bytes) so the double-buffered tiles fit v7x's 64 MiB VMEM.

def _row_spec(tm, n):
    return pl.BlockSpec((tm, n), lambda i: (i, 0))


def _full_spec(a):
    return pl.BlockSpec(a.shape, lambda i: (0, 0))


def attn_input_proj(src_p, pos_p, maskf_p, gmat, amask, p, tm):
    Mp, D = src_p.shape
    QN = p["qcat_w"].shape[1]
    return pl.pallas_call(
        _attn_in_proj_kernel,
        out_shape=(jax.ShapeDtypeStruct((Mp, D), jnp.float32),
                   jax.ShapeDtypeStruct((Mp, QN), jnp.float32)),
        grid=(Mp // tm,),
        in_specs=[_row_spec(tm, D), _row_spec(tm, D), _row_spec(tm, 1),
                  _full_spec(p["value_w"]), _full_spec(p["value_b"]),
                  _full_spec(p["qcat_w"]), _full_spec(p["qcat_b"]),
                  _full_spec(gmat), _full_spec(amask)],
        out_specs=[_row_spec(tm, D), _row_spec(tm, QN)],
        compiler_params=_mosaic_params(),
    )(src_p, pos_p, maskf_p, p["value_w"], p["value_b"],
      p["qcat_w"], p["qcat_b"], gmat, amask)


def out_proj_ln(attn_out_p, res_p, p, tm, eps=1e-5):
    Mp, D = res_p.shape
    return pl.pallas_call(
        functools.partial(_out_proj_ln_kernel, eps=eps),
        out_shape=jax.ShapeDtypeStruct((Mp, D), jnp.float32),
        grid=(Mp // tm,),
        in_specs=[_row_spec(tm, D), _row_spec(tm, D),
                  _full_spec(p["out_w"]), _full_spec(p["out_b"]),
                  _full_spec(p["ln1_g"]), _full_spec(p["ln1_b"])],
        out_specs=_row_spec(tm, D),
        compiler_params=_mosaic_params(),
    )(attn_out_p, res_p, p["out_w"], p["out_b"], p["ln1_g"], p["ln1_b"])


def ffn_ln(x_p, p, tm, eps=1e-5, final_gb=None):
    """FFN + residual + LN2; if final_gb=(gamma, beta) also applies the encoder's
    final LayerNorm in the same kernel (last layer only)."""
    Mp, D = x_p.shape
    base_specs = [_row_spec(tm, D), _full_spec(p["ffn1_w"]), _full_spec(p["ffn1_b"]),
                  _full_spec(p["ffn2_w"]), _full_spec(p["ffn2_b"]),
                  _full_spec(p["ln2_g"]), _full_spec(p["ln2_b"])]
    base_args = (x_p, p["ffn1_w"], p["ffn1_b"], p["ffn2_w"], p["ffn2_b"],
                 p["ln2_g"], p["ln2_b"])
    if final_gb is None:
        kernel = functools.partial(_ffn_ln_kernel, eps=eps)
        in_specs, args = base_specs, base_args
    else:
        gf, bf = final_gb
        kernel = functools.partial(_ffn_ln_final_kernel, eps=eps)
        in_specs = base_specs + [_full_spec(gf), _full_spec(bf)]
        args = base_args + (gf, bf)
    return pl.pallas_call(
        kernel,
        out_shape=jax.ShapeDtypeStruct((Mp, D), jnp.float32),
        grid=(Mp // tm,),
        in_specs=in_specs,
        out_specs=_row_spec(tm, D),
        compiler_params=_mosaic_params(),
    )(*args)


# --------------------------------------------------------------------------- #
# JAX glue: reference points + deformable bilinear sampling (fused weighting)
# --------------------------------------------------------------------------- #

def reference_point(shapes, valid_ratio):
    """Exact port of DeformableTransformerEncoder.reference_point -> (B, S, L, 2)."""
    refs = []
    for lvl, (H, W) in enumerate(shapes):
        y, x = jnp.meshgrid(jnp.linspace(0.5, H - 0.5, H),
                            jnp.linspace(0.5, W - 0.5, W), indexing="ij")
        y = y.reshape(-1)[None] / (valid_ratio[:, None, lvl, 1] * H)
        x = x.reshape(-1)[None] / (valid_ratio[:, None, lvl, 0] * W)
        refs.append(jnp.stack((x, y), -1))
    points = jnp.concatenate(refs, axis=1)
    points = points[:, :, None] * valid_ratio[:, None]
    return points


def ms_deform_attn(value, shapes, level_start, loc, attn):
    """Multi-scale deformable attention core (grid_sample, align_corners=False, zero pad)
    with the bilinear / in-bounds / attention weights fused into the corner gathers so the
    (B, Lq, H, L, P, Dh) tensor is never materialized.
    value:(B,S,H,Dh), loc:(B,Lq,H,L,P,2) in [0,1], attn:(B,Lq,H,L,P) -> (B,Lq,H,Dh)."""
    # TODO(synk): the data-dependent gather itself stays in plain JAX; a full Pallas
    # gather kernel (per-level value maps resident in VMEM, query-chunked to bound the
    # gathered temporaries) is the remaining structural win at production sizes.
    B, S, H, Dh = value.shape
    Lq = loc.shape[1]
    P = loc.shape[4]
    acc = jnp.zeros((B, H, Lq, Dh), jnp.float32)
    bi = jnp.arange(B)[:, None, None]
    hi = jnp.arange(H)[None, :, None]
    for lvl, (Hl, Wl) in enumerate(shapes):
        start = level_start[lvl]
        v = jnp.transpose(value[:, start:start + Hl * Wl], (0, 2, 1, 3))   # (B,H,Hl*Wl,Dh)
        lx = loc[:, :, :, lvl, :, 0] * Wl - 0.5                            # (B,Lq,H,P)
        ly = loc[:, :, :, lvl, :, 1] * Hl - 0.5
        aw = attn[:, :, :, lvl, :]                                         # (B,Lq,H,P)
        x0 = jnp.floor(lx)
        y0 = jnp.floor(ly)
        wx1 = lx - x0
        wx0 = 1.0 - wx1
        wy1 = ly - y0
        wy0 = 1.0 - wy1

        def corner(xi, yi, w):
            inb = ((xi >= 0) & (xi <= Wl - 1) & (yi >= 0) & (yi <= Hl - 1)).astype(jnp.float32)
            xc = jnp.clip(xi, 0, Wl - 1).astype(jnp.int32)
            yc = jnp.clip(yi, 0, Hl - 1).astype(jnp.int32)
            idx = yc * Wl + xc                                             # (B,Lq,H,P)
            idx = jnp.transpose(idx, (0, 2, 1, 3)).reshape(B, H, Lq * P)
            g = v[bi, hi, idx].reshape(B, H, Lq, P, Dh)                    # full-Dh slices
            wt = jnp.transpose(w * inb * aw, (0, 2, 1, 3))                 # (B,H,Lq,P)
            return jnp.einsum("bhqpd,bhqp->bhqd", g, wt)

        acc = acc + corner(x0, y0, wx0 * wy0)
        acc = acc + corner(x0 + 1.0, y0, wx1 * wy0)
        acc = acc + corner(x0, y0 + 1.0, wx0 * wy1)
        acc = acc + corner(x0 + 1.0, y0 + 1.0, wx1 * wy1)
    return jnp.transpose(acc, (0, 2, 1, 3))                                # (B,Lq,H,Dh)


# --------------------------------------------------------------------------- #
# Encoder layer / full encoder
# --------------------------------------------------------------------------- #

def _encoder_layer(p, out_p, pos_p, maskf_p, gmat, amask, reference,
                   shapes, level_start, B, S, n_heads, n_levels, n_points, tm,
                   final_gb=None):
    Mp, D = out_p.shape
    Dh = D // n_heads
    M = B * S
    off_dim = n_heads * n_levels * n_points * 2
    attn_dim = n_heads * n_levels * n_points

    value_f, qcat = attn_input_proj(out_p, pos_p, maskf_p, gmat, amask, p, tm)
    value = value_f[:M].reshape(B, S, n_heads, Dh)
    offsets = qcat[:M, :off_dim].reshape(B, S, n_heads, n_levels, n_points, 2)
    attn = qcat[:M, off_dim:off_dim + attn_dim].reshape(B, S, n_heads, n_levels, n_points)

    shapes_arr = jnp.asarray(shapes, jnp.float32)                              # (L,2)=(H,W)
    offset_normalizer = jnp.stack([shapes_arr[:, 1], shapes_arr[:, 0]], -1)    # (W,H)
    sampling_loc = (reference[:, :, None, :, None, :]
                    + offsets / offset_normalizer[None, None, None, :, None, :])

    attn_out = ms_deform_attn(value, shapes, level_start, sampling_loc, attn)  # (B,S,H,Dh)
    attn_out_p = _pad_rows(attn_out.reshape(M, D), Mp)

    src1_p = out_proj_ln(attn_out_p, out_p, p, tm)              # out proj + residual + LN1
    src2_p = ffn_ln(src1_p, p, tm, final_gb=final_gb)           # FFN + residual + LN2 (+final LN)
    return src2_p


@functools.partial(jax.jit, static_argnames=("shapes", "level_start",
                                             "n_heads", "n_levels", "n_points"))
def _encoder_forward(layers, norm_g, norm_b, src, pos, mask, valid_ratio, *,
                     shapes, level_start, n_heads, n_levels, n_points):
    B, S, D = src.shape
    M = B * S
    tm, Mp = _row_tiling(M)

    out_p = _pad_rows(src.reshape(M, D), Mp)
    pos_p = _pad_rows(pos.reshape(M, D), Mp)
    maskf_p = _pad_rows(mask.astype(jnp.float32).reshape(M, 1), Mp, value=1.0)

    off_dim = n_heads * n_levels * n_points * 2
    attn_dim = n_heads * n_levels * n_points
    qn = layers[0]["qcat_w"].shape[1]
    gmat, amask = _softmax_group_constants(off_dim, attn_dim, n_levels * n_points, qn)

    reference = reference_point(shapes, valid_ratio)        # (B, S, L, 2)

    n_layers = len(layers)
    for li, p in enumerate(layers):
        final_gb = (norm_g, norm_b) if li == n_layers - 1 else None
        out_p = _encoder_layer(p, out_p, pos_p, maskf_p, gmat, amask, reference,
                               shapes, level_start, B, S,
                               n_heads, n_levels, n_points, tm, final_gb=final_gb)

    return out_p[:M].reshape(B, S, D)


# --------------------------------------------------------------------------- #
# Parameter init / module
# --------------------------------------------------------------------------- #

def _init_linear(key, fan_in, fan_out, scale=None):
    kw, kb = jax.random.split(key)
    s = scale if scale is not None else 1.0 / math.sqrt(fan_in)
    w = jax.random.normal(kw, (fan_in, fan_out), jnp.float32) * s
    b = jax.random.normal(kb, (fan_out,), jnp.float32) * 0.01
    return w, b


def init_encoder_layer(key, dim, ffn_dim, n_heads, n_levels, n_points):
    keys = jax.random.split(key, 6)
    off_dim = n_heads * n_levels * n_points * 2
    attn_dim = n_heads * n_levels * n_points
    qn = pl.cdiv(off_dim + attn_dim, 128) * 128             # pad fused projection to 128 lanes

    value_w, value_b = _init_linear(keys[0], dim, dim)
    # small offset init keeps sampling near the reference point
    off_w, off_b = _init_linear(keys[1], dim, off_dim, scale=0.02)
    attn_w, attn_b = _init_linear(keys[2], dim, attn_dim)
    out_w, out_b = _init_linear(keys[3], dim, dim)
    ffn1_w, ffn1_b = _init_linear(keys[4], dim, ffn_dim)
    ffn2_w, ffn2_b = _init_linear(keys[5], ffn_dim, dim)

    qcat_w = jnp.zeros((dim, qn), jnp.float32)
    qcat_w = qcat_w.at[:, :off_dim].set(off_w).at[:, off_dim:off_dim + attn_dim].set(attn_w)
    qcat_b = jnp.zeros((qn,), jnp.float32)
    qcat_b = qcat_b.at[:off_dim].set(off_b).at[off_dim:off_dim + attn_dim].set(attn_b)

    bf16 = jnp.bfloat16
    return {
        "value_w": value_w.astype(bf16), "value_b": value_b.reshape(1, -1),
        "qcat_w": qcat_w.astype(bf16),   "qcat_b": qcat_b.reshape(1, -1),
        "out_w": out_w.astype(bf16),     "out_b": out_b.reshape(1, -1),
        "ffn1_w": ffn1_w.astype(bf16),   "ffn1_b": ffn1_b.reshape(1, -1),
        "ffn2_w": ffn2_w.astype(bf16),   "ffn2_b": ffn2_b.reshape(1, -1),
        "ln1_g": jnp.ones((1, dim), jnp.float32), "ln1_b": jnp.zeros((1, dim), jnp.float32),
        "ln2_g": jnp.ones((1, dim), jnp.float32), "ln2_b": jnp.zeros((1, dim), jnp.float32),
    }


class DeformableTransformerEncoder:
    """JAX/Pallas port of the PyTorch DeformableTransformerEncoder."""

    def __init__(self, dim, ffn_dim, n_heads, n_levels, n_points, n_layers, key):
        self.dim = dim
        self.n_heads = n_heads
        self.n_levels = n_levels
        self.n_points = n_points
        layer = init_encoder_layer(key, dim, ffn_dim, n_heads, n_levels, n_points)
        # repeat() deep-copies ONE encoder_layer -> every layer starts with identical weights
        # (shallow copies here share arrays; fine for inference).
        self.layers = [dict(layer) for _ in range(n_layers)]
        self.norm_g = jnp.ones((1, dim), jnp.float32)
        self.norm_b = jnp.zeros((1, dim), jnp.float32)

    def __call__(self, src, pos, shapes, level_start, mask, valid_ratio):
        return _encoder_forward(
            self.layers, self.norm_g, self.norm_b, src, pos, mask, valid_ratio,
            shapes=tuple(tuple(int(v) for v in s) for s in shapes),
            level_start=tuple(int(v) for v in level_start),
            n_heads=self.n_heads, n_levels=self.n_levels, n_points=self.n_points)


# --------------------------------------------------------------------------- #
# Demo
# --------------------------------------------------------------------------- #

if __name__ == "__main__":
    key = jax.random.PRNGKey(0)
    k_param, k_src, k_pos, k_vr = jax.random.split(key, 4)

    B, D, FFN = 2, 32, 64
    H_HEADS, L_LEVELS, P_POINTS, N_LAYERS = 4, 2, 4, 2
    shapes = ((8, 8), (4, 4))                        # multi-scale feature map sizes
    level_start = (0, shapes[0][0] * shapes[0][1])   # (0, 64)
    S = sum(h * w for h, w in shapes)                # 80

    src = jax.random.normal(k_src, (B, S, D), jnp.float32)
    pos = jax.random.normal(k_pos, (B, S, D), jnp.float32)
    mask = jnp.zeros((B, S), dtype=bool)
    valid_ratio = 0.8 + 0.2 * jax.random.uniform(k_vr, (B, L_LEVELS, 2), jnp.float32)

    encoder = DeformableTransformerEncoder(D, FFN, H_HEADS, L_LEVELS, P_POINTS, N_LAYERS, k_param)
    out = encoder(src, pos, shapes, level_start, mask, valid_ratio)
    out = jax.block_until_ready(out)

    assert out.shape == (B, S, D), out.shape
    assert bool(jnp.all(jnp.isfinite(out)))
    print("KERNEL_OK")
</pallas_src>

<mosaic_0001>
module attributes {stable_mosaic.version = 11 : i64} {
  func.func @_attn_in_proj_kernel(%arg0: i32, %arg1: memref<80x32xf32, #tpu.memory_space<vmem>>, %arg2: memref<80x32xf32, #tpu.memory_space<vmem>>, %arg3: memref<80x1xf32, #tpu.memory_space<vmem>>, %arg4: memref<32x32xbf16, #tpu.memory_space<vmem>>, %arg5: memref<1x32xf32, #tpu.memory_space<vmem>>, %arg6: memref<32x128xbf16, #tpu.memory_space<vmem>>, %arg7: memref<1x128xf32, #tpu.memory_space<vmem>>, %arg8: memref<128x128xf32, #tpu.memory_space<vmem>>, %arg9: memref<1x128xf32, #tpu.memory_space<vmem>>, %arg10: memref<80x32xf32, #tpu.memory_space<vmem>>, %arg11: memref<80x128xf32, #tpu.memory_space<vmem>>) attributes {dimension_semantics = [#tpu.dimension_semantics<parallel>], iteration_bounds = array<i64: 2>, scalar_prefetch = 0 : i64, scratch_operands = 0 : i64, tpu.core_type = #tpu.core_type<tc>, window_params = [{transform_indices = @transform_0, window_bounds = array<i64: 80, 32>}, {transform_indices = @transform_1, window_bounds = array<i64: 80, 32>}, {transform_indices = @transform_2, window_bounds = array<i64: 80, 1>}, {pipeline_mode = #tpu.pipeline_mode<synchronous>, transform_indices = @transform_3, window_bounds = array<i64: 32, 32>}, {pipeline_mode = #tpu.pipeline_mode<synchronous>, transform_indices = @transform_4, window_bounds = array<i64: 1, 32>}, {pipeline_mode = #tpu.pipeline_mode<synchronous>, transform_indices = @transform_5, window_bounds = array<i64: 32, 128>}, {pipeline_mode = #tpu.pipeline_mode<synchronous>, transform_indices = @transform_6, window_bounds = array<i64: 1, 128>}, {pipeline_mode = #tpu.pipeline_mode<synchronous>, transform_indices = @transform_7, window_bounds = array<i64: 128, 128>}, {pipeline_mode = #tpu.pipeline_mode<synchronous>, transform_indices = @transform_8, window_bounds = array<i64: 1, 128>}, {transform_indices = @transform_9, window_bounds = array<i64: 80, 32>}, {transform_indices = @transform_10, window_bounds = array<i64: 80, 128>}]} {
    %c0 = arith.constant 0 : index
    %c0_0 = arith.constant 0 : index
    %0 = vector.load %arg1[%c0, %c0_0] : memref<80x32xf32, #tpu.memory_space<vmem>>, vector<80x32xf32>
    %c0_1 = arith.constant 0 : index
    %c0_2 = arith.constant 0 : index
    %1 = vector.load %arg2[%c0_1, %c0_2] : memref<80x32xf32, #tpu.memory_space<vmem>>, vector<80x32xf32>
    %2 = arith.addf %0, %1 : vector<80x32xf32>
    %3 = arith.truncf %0 : vector<80x32xf32> to vector<80x32xbf16>
    %c0_3 = arith.constant 0 : index
    %c0_4 = arith.constant 0 : index
    %4 = vector.load %arg4[%c0_3, %c0_4] : memref<32x32xbf16, #tpu.memory_space<vmem>>, vector<32x32xbf16>
    %cst = arith.constant dense<0.000000e+00> : vector<80x32xf32>
    %5 = tpu.matmul %3, %4, %cst {dimension_numbers = #tpu.dot_dimension_numbers<[1], [0], [0], [1], [0, 0, 1, 1], [], []>} : vector<80x32xbf16>, vector<32x32xbf16>, vector<80x32xf32> -> vector<80x32xf32>
    %c0_5 = arith.constant 0 : index
    %c0_6 = arith.constant 0 : index
    %6 = vector.load %arg5[%c0_5, %c0_6] : memref<1x32xf32, #tpu.memory_space<vmem>>, vector<1x32xf32>
    %7 = vector.broadcast %6 : vector<1x32xf32> to vector<80x32xf32>
    %8 = arith.addf %5, %7 : vector<80x32xf32>
    %c0_7 = arith.constant 0 : index
    %c0_8 = arith.constant 0 : index
    %9 = vector.load %arg3[%c0_7, %c0_8] : memref<80x1xf32, #tpu.memory_space<vmem>>, vector<80x1xf32>
    %cst_9 = arith.constant 1.000000e+00 : f32
    %10 = vector.broadcast %cst_9 : f32 to vector<80x1xf32>
    %11 = arith.subf %10, %9 : vector<80x1xf32>
    %12 = vector.broadcast %11 : vector<80x1xf32> to vector<80x32xf32>
    %13 = arith.mulf %8, %12 : vector<80x32xf32>
    %c0_10 = arith.constant 0 : index
    %c0_11 = arith.constant 0 : index
    %14 = vector.load %arg10[%c0_10, %c0_11] : memref<80x32xf32, #tpu.memory_space<vmem>>, vector<80x32xf32>
    tpu.vector_store %arg10[%c0_10, %c0_11], %13 {strides = array<i32>} : memref<80x32xf32, #tpu.memory_space<vmem>>, vector<80x32xf32>,
    %15 = arith.truncf %2 : vector<80x32xf32> to vector<80x32xbf16>
    %c0_12 = arith.constant 0 : index
    %c0_13 = arith.constant 0 : index
    %16 = vector.load %arg6[%c0_12, %c0_13] : memref<32x128xbf16, #tpu.memory_space<vmem>>, vector<32x128xbf16>
    %cst_14 = arith.constant dense<0.000000e+00> : vector<80x128xf32>
    %17 = tpu.matmul %15, %16, %cst_14 {dimension_numbers = #tpu.dot_dimension_numbers<[1], [0], [0], [1], [0, 0, 1, 1], [], []>} : vector<80x32xbf16>, vector<32x128xbf16>, vector<80x128xf32> -> vector<80x128xf32>
    %c0_15 = arith.constant 0 : index
    %c0_16 = arith.constant 0 : index
    %18 = vector.load %arg7[%c0_15, %c0_16] : memref<1x128xf32, #tpu.memory_space<vmem>>, vector<1x128xf32>
    %19 = vector.broadcast %18 : vector<1x128xf32> to vector<80x128xf32>
    %20 = arith.addf %17, %19 : vector<80x128xf32>
    %c0_17 = arith.constant 0 : index
    %c0_18 = arith.constant 0 : index
    %21 = vector.load %arg9[%c0_17, %c0_18] : memref<1x128xf32, #tpu.memory_space<vmem>>, vector<1x128xf32>
    %cst_19 = arith.constant 1.000000e+00 : f32
    %22 = vector.broadcast %cst_19 : f32 to vector<1x128xf32>
    %23 = arith.subf %21, %22 : vector<1x128xf32>
    %cst_20 = arith.constant 1.000000e+30 : f32
    %24 = vector.broadcast %cst_20 : f32 to vector<1x128xf32>
    %25 = arith.mulf %23, %24 : vector<1x128xf32>
    %26 = vector.broadcast %25 : vector<1x128xf32> to vector<80x128xf32>
    %27 = arith.addf %20, %26 : vector<80x128xf32>
    %cst_21 = arith.constant dense<0xFF800000> : vector<80xf32>
    %28 = vector.multi_reduction <maximumf>, %27, %cst_21 [1] : vector<80x128xf32> to vector<80xf32>
    %29 = vector.shape_cast %28 : vector<80xf32> to vector<80x1xf32>
    %30 = vector.broadcast %29 : vector<80x1xf32> to vector<80x128xf32>
    %31 = arith.subf %20, %30 : vector<80x128xf32>
    %cst_22 = arith.constant -8.000000e+01 : f32
    %cst_23 = arith.constant 8.000000e+01 : f32
    %32 = vector.broadcast %cst_22 : f32 to vector<80x128xf32>
    %33 = arith.maximumf %32, %31 : vector<80x128xf32>
    %34 = vector.broadcast %cst_23 : f32 to vector<80x128xf32>
    %35 = arith.minimumf %34, %33 : vector<80x128xf32>
    %36 = math.exp %35 : vector<80x128xf32>
    %37 = vector.broadcast %21 : vector<1x128xf32> to vector<80x128xf32>
    %38 = arith.mulf %36, %37 : vector<80x128xf32>
    %c0_24 = arith.constant 0 : index
    %c0_25 = arith.constant 0 : index
    %39 = vector.load %arg8[%c0_24, %c0_25] : memref<128x128xf32, #tpu.memory_space<vmem>>, vector<128x128xf32>
    %cst_26 = arith.constant dense<0.000000e+00> : vector<80x128xf32>
    %40 = tpu.matmul %38, %39, %cst_26 {dimension_numbers = #tpu.dot_dimension_numbers<[1], [0], [0], [1], [0, 0, 1, 1], [], []>} : vector<80x128xf32>, vector<128x128xf32>, vector<80x128xf32> -> vector<80x128xf32>
    %cst_27 = arith.constant 1.000000e+00 : f32
    %41 = vector.broadcast %cst_27 : f32 to vector<1x128xf32>
    %42 = arith.subf %41, %21 : vector<1x128xf32>
    %43 = vector.broadcast %42 : vector<1x128xf32> to vector<80x128xf32>
    %44 = arith.addf %40, %43 : vector<80x128xf32>
    %45 = arith.divf %38, %44 : vector<80x128xf32>
    %cst_28 = arith.constant 1.000000e+00 : f32
    %46 = vector.broadcast %cst_28 : f32 to vector<1x128xf32>
    %47 = arith.subf %46, %21 : vector<1x128xf32>
    %48 = vector.broadcast %47 : vector<1x128xf32> to vector<80x128xf32>
    %49 = arith.mulf %20, %48 : vector<80x128xf32>
    %50 = arith.addf %49, %45 : vector<80x128xf32>
    %c0_29 = arith.constant 0 : index
    %c0_30 = arith.constant 0 : index
    %51 = vector.load %arg11[%c0_29, %c0_30] : memref<80x128xf32, #tpu.memory_space<vmem>>, vector<80x128xf32>
    tpu.vector_store %arg11[%c0_29, %c0_30], %50 {strides = array<i32>} : memref<80x128xf32, #tpu.memory_space<vmem>>, vector<80x128xf32>,
    return
  }
  func.func @transform_0(%arg0: i32) -> (i32, i32) {
    %c0_i32 = arith.constant 0 : i32
    %c0_i32_0 = arith.constant 0 : i32
    return %arg0, %c0_i32 : i32, i32
  }
  func.func @transform_1(%arg0: i32) -> (i32, i32) {
    %c0_i32 = arith.constant 0 : i32
    %c0_i32_0 = arith.constant 0 : i32
    return %arg0, %c0_i32 : i32, i32
  }
  func.func @transform_2(%arg0: i32) -> (i32, i32) {
    %c0_i32 = arith.constant 0 : i32
    %c0_i32_0 = arith.constant 0 : i32
    return %arg0, %c0_i32 : i32, i32
  }
  func.func @transform_3(%arg0: i32) -> (i32, i32) {
    %c0_i32 = arith.constant 0 : i32
    %c0_i32_0 = arith.constant 0 : i32
    %c0_i32_1 = arith.constant 0 : i32
    return %c0_i32, %c0_i32_0 : i32, i32
  }
  func.func @transform_4(%arg0: i32) -> (i32, i32) {
    %c0_i32 = arith.constant 0 : i32
    %c0_i32_0 = arith.constant 0 : i32
    %c0_i32_1 = arith.constant 0 : i32
    return %c0_i32, %c0_i32_0 : i32, i32
  }
  func.func @transform_5(%arg0: i32) -> (i32, i32) {
    %c0_i32 = arith.constant 0 : i32
    %c0_i32_0 = arith.constant 0 : i32
    %c0_i32_1 = arith.constant 0 : i32
    return %c0_i32, %c0_i32_0 : i32, i32
  }
  func.func @transform_6(%arg0: i32) -> (i32, i32) {
    %c0_i32 = arith.constant 0 : i32
    %c0_i32_0 = arith.constant 0 : i32
    %c0_i32_1 = arith.constant 0 : i32
    return %c0_i32, %c0_i32_0 : i32, i32
  }
  func.func @transform_7(%arg0: i32) -> (i32, i32) {
    %c0_i32 = arith.constant 0 : i32
    %c0_i32_0 = arith.constant 0 : i32
    %c0_i32_1 = arith.constant 0 : i32
    return %c0_i32, %c0_i32_0 : i32, i32
  }
  func.func @transform_8(%arg0: i32) -> (i32, i32) {
    %c0_i32 = arith.constant 0 : i32
    %c0_i32_0 = arith.constant 0 : i32
    %c0_i32_1 = arith.constant 0 : i32
    return %c0_i32, %c0_i32_0 : i32, i32
  }
  func.func @transform_9(%arg0: i32) -> (i32, i32) {
    %c0_i32 = arith.constant 0 : i32
    %c0_i32_0 = arith.constant 0 : i32
    return %arg0, %c0_i32 : i32, i32
  }
  func.func @transform_10(%arg0: i32) -> (i32, i32) {
    %c0_i32 = arith.constant 0 : i32
    %c0_i32_0 = arith.constant 0 : i32
    return %arg0, %c0_i32 : i32, i32
  }
}

module attributes {stable_mosaic.version = 11 : i64} {
  func.func @_out_proj_ln_kernel(%arg0: i32, %arg1: memref<80x32xf32, #tpu.memory_space<vmem>>, %arg2: memref<80x32xf32, #tpu.memory_space<vmem>>, %arg3: memref<32x32xbf16, #tpu.memory_space<vmem>>, %arg4: memref<1x32xf32, #tpu.memory_space<vmem>>, %arg5: memref<1x32xf32, #tpu.memory_space<vmem>>, %arg6: memref<1x32xf32, #tpu.memory_space<vmem>>, %arg7: memref<80x32xf32, #tpu.memory_space<vmem>>) attributes {dimension_semantics = [#tpu.dimension_semantics<parallel>], iteration_bounds = array<i64: 2>, scalar_prefetch = 0 : i64, scratch_operands = 0 : i64, tpu.core_type = #tpu.core_type<tc>, window_params = [{transform_indices = @transform_0, window_bounds = array<i64: 80, 32>}, {transform_indices = @transform_1, window_bounds = array<i64: 80, 32>}, {pipeline_mode = #tpu.pipeline_mode<synchronous>, transform_indices = @transform_2, window_bounds = array<i64: 32, 32>}, {pipeline_mode = #tpu.pipeline_mode<synchronous>, transform_indices = @transform_3, window_bounds = array<i64: 1, 32>}, {pipeline_mode = #tpu.pipeline_mode<synchronous>, transform_indices = @transform_4, window_bounds = array<i64: 1, 32>}, {pipeline_mode = #tpu.pipeline_mode<synchronous>, transform_indices = @transform_5, window_bounds = array<i64: 1, 32>}, {transform_indices = @transform_6, window_bounds = array<i64: 80, 32>}]} {
    %c0 = arith.constant 0 : index
    %c0_0 = arith.constant 0 : index
    %0 = vector.load %arg1[%c0, %c0_0] : memref<80x32xf32, #tpu.memory_space<vmem>>, vector<80x32xf32>
    %1 = arith.truncf %0 : vector<80x32xf32> to vector<80x32xbf16>
    %c0_1 = arith.constant 0 : index
    %c0_2 = arith.constant 0 : index
    %2 = vector.load %arg3[%c0_1, %c0_2] : memref<32x32xbf16, #tpu.memory_space<vmem>>, vector<32x32xbf16>
    %cst = arith.constant dense<0.000000e+00> : vector<80x32xf32>
    %3 = tpu.matmul %1, %2, %cst {dimension_numbers = #tpu.dot_dimension_numbers<[1], [0], [0], [1], [0, 0, 1, 1], [], []>} : vector<80x32xbf16>, vector<32x32xbf16>, vector<80x32xf32> -> vector<80x32xf32>
    %c0_3 = arith.constant 0 : index
    %c0_4 = arith.constant 0 : index
    %4 = vector.load %arg4[%c0_3, %c0_4] : memref<1x32xf32, #tpu.memory_space<vmem>>, vector<1x32xf32>
    %5 = vector.broadcast %4 : vector<1x32xf32> to vector<80x32xf32>
    %6 = arith.addf %3, %5 : vector<80x32xf32>
    %c0_5 = arith.constant 0 : index
    %c0_6 = arith.constant 0 : index
    %7 = vector.load %arg2[%c0_5, %c0_6] : memref<80x32xf32, #tpu.memory_space<vmem>>, vector<80x32xf32>
    %8 = arith.addf %7, %6 : vector<80x32xf32>
    %cst_7 = arith.constant dense<0.000000e+00> : vector<80xf32>
    %9 = vector.multi_reduction <add>, %8, %cst_7 [1] : vector<80x32xf32> to vector<80xf32>
    %10 = vector.shape_cast %9 : vector<80xf32> to vector<80x1xf32>
    %cst_8 = arith.constant 3.200000e+01 : f32
    %11 = vector.broadcast %cst_8 : f32 to vector<80x1xf32>
    %12 = arith.divf %10, %11 : vector<80x1xf32>
    %13 = vector.broadcast %12 : vector<80x1xf32> to vector<80x32xf32>
    %14 = arith.subf %8, %13 : vector<80x32xf32>
    %15 = arith.mulf %14, %14 : vector<80x32xf32>
    %cst_9 = arith.constant dense<0.000000e+00> : vector<80xf32>
    %16 = vector.multi_reduction <add>, %15, %cst_9 [1] : vector<80x32xf32> to vector<80xf32>
    %17 = vector.shape_cast %16 : vector<80xf32> to vector<80x1xf32>
    %cst_10 = arith.constant 3.200000e+01 : f32
    %18 = vector.broadcast %cst_10 : f32 to vector<80x1xf32>
    %19 = arith.divf %17, %18 : vector<80x1xf32>
    %20 = vector.broadcast %12 : vector<80x1xf32> to vector<80x32xf32>
    %21 = arith.subf %8, %20 : vector<80x32xf32>
    %cst_11 = arith.constant 9.99999974E-6 : f32
    %22 = vector.broadcast %cst_11 : f32 to vector<80x1xf32>
    %23 = arith.addf %19, %22 : vector<80x1xf32>
    %24 = math.rsqrt %23 : vector<80x1xf32>
    %25 = vector.broadcast %24 : vector<80x1xf32> to vector<80x32xf32>
    %26 = arith.mulf %21, %25 : vector<80x32xf32>
    %c0_12 = arith.constant 0 : index
    %c0_13 = arith.constant 0 : index
    %27 = vector.load %arg5[%c0_12, %c0_13] : memref<1x32xf32, #tpu.memory_space<vmem>>, vector<1x32xf32>
    %28 = vector.broadcast %27 : vector<1x32xf32> to vector<80x32xf32>
    %29 = arith.mulf %26, %28 : vector<80x32xf32>
    %c0_14 = arith.constant 0 : index
    %c0_15 = arith.constant 0 : index
    %30 = vector.load %arg6[%c0_14, %c0_15] : memref<1x32xf32, #tpu.memory_space<vmem>>, vector<1x32xf32>
    %31 = vector.broadcast %30 : vector<1x32xf32> to vector<80x32xf32>
    %32 = arith.addf %29, %31 : vector<80x32xf32>
    %c0_16 = arith.constant 0 : index
    %c0_17 = arith.constant 0 : index
    %33 = vector.load %arg7[%c0_16, %c0_17] : memref<80x32xf32, #tpu.memory_space<vmem>>, vector<80x32xf32>
    tpu.vector_store %arg7[%c0_16, %c0_17], %32 {strides = array<i32>} : memref<80x32xf32, #tpu.memory_space<vmem>>, vector<80x32xf32>,
    return
  }
  func.func @transform_0(%arg0: i32) -> (i32, i32) {
    %c0_i32 = arith.constant 0 : i32
    %c0_i32_0 = arith.constant 0 : i32
    return %arg0, %c0_i32 : i32, i32
  }
  func.func @transform_1(%arg0: i32) -> (i32, i32) {
    %c0_i32 = arith.constant 0 : i32
    %c0_i32_0 = arith.constant 0 : i32
    return %arg0, %c0_i32 : i32, i32
  }
  func.func @transform_2(%arg0: i32) -> (i32, i32) {
    %c0_i32 = arith.constant 0 : i32
    %c0_i32_0 = arith.constant 0 : i32
    %c0_i32_1 = arith.constant 0 : i32
    return %c0_i32, %c0_i32_0 : i32, i32
  }
  func.func @transform_3(%arg0: i32) -> (i32, i32) {
    %c0_i32 = arith.constant 0 : i32
    %c0_i32_0 = arith.constant 0 : i32
    %c0_i32_1 = arith.constant 0 : i32
    return %c0_i32, %c0_i32_0 : i32, i32
  }
  func.func @transform_4(%arg0: i32) -> (i32, i32) {
    %c0_i32 = arith.constant 0 : i32
    %c0_i32_0 = arith.constant 0 : i32
    %c0_i32_1 = arith.constant 0 : i32
    return %c0_i32, %c0_i32_0 : i32, i32
  }
  func.func @transform_5(%arg0: i32) -> (i32, i32) {
    %c0_i32 = arith.constant 0 : i32
    %c0_i32_0 = arith.constant 0 : i32
    %c0_i32_1 = arith.constant 0 : i32
    return %c0_i32, %c0_i32_0 : i32, i32
  }
  func.func @transform_6(%arg0: i32) -> (i32, i32) {
    %c0_i32 = arith.constant 0 : i32
    %c0_i32_0 = arith.constant 0 : i32
    return %arg0, %c0_i32 : i32, i32
  }
}

module attributes {stable_mosaic.version = 11 : i64} {
  func.func @_ffn_ln_kernel(%arg0: i32, %arg1: memref<80x32xf32, #tpu.memory_space<vmem>>, %arg2: memref<32x64xbf16, #tpu.memory_space<vmem>>, %arg3: memref<1x64xf32, #tpu.memory_space<vmem>>, %arg4: memref<64x32xbf16, #tpu.memory_space<vmem>>, %arg5: memref<1x32xf32, #tpu.memory_space<vmem>>, %arg6: memref<1x32xf32, #tpu.memory_space<vmem>>, %arg7: memref<1x32xf32, #tpu.memory_space<vmem>>, %arg8: memref<80x32xf32, #tpu.memory_space<vmem>>) attributes {dimension_semantics = [#tpu.dimension_semantics<parallel>], iteration_bounds = array<i64: 2>, scalar_prefetch = 0 : i64, scratch_operands = 0 : i64, tpu.core_type = #tpu.core_type<tc>, window_params = [{transform_indices = @transform_0, window_bounds = array<i64: 80, 32>}, {pipeline_mode = #tpu.pipeline_mode<synchronous>, transform_indices = @transform_1, window_bounds = array<i64: 32, 64>}, {pipeline_mode = #tpu.pipeline_mode<synchronous>, transform_indices = @transform_2, window_bounds = array<i64: 1, 64>}, {pipeline_mode = #tpu.pipeline_mode<synchronous>, transform_indices = @transform_3, window_bounds = array<i64: 64, 32>}, {pipeline_mode = #tpu.pipeline_mode<synchronous>, transform_indices = @transform_4, window_bounds = array<i64: 1, 32>}, {pipeline_mode = #tpu.pipeline_mode<synchronous>, transform_indices = @transform_5, window_bounds = array<i64: 1, 32>}, {pipeline_mode = #tpu.pipeline_mode<synchronous>, transform_indices = @transform_6, window_bounds = array<i64: 1, 32>}, {transform_indices = @transform_7, window_bounds = array<i64: 80, 32>}]} {
    %c0 = arith.constant 0 : index
    %c0_0 = arith.constant 0 : index
    %0 = vector.load %arg1[%c0, %c0_0] : memref<80x32xf32, #tpu.memory_space<vmem>>, vector<80x32xf32>
    %1 = arith.truncf %0 : vector<80x32xf32> to vector<80x32xbf16>
    %c0_1 = arith.constant 0 : index
    %c0_2 = arith.constant 0 : index
    %2 = vector.load %arg2[%c0_1, %c0_2] : memref<32x64xbf16, #tpu.memory_space<vmem>>, vector<32x64xbf16>
    %cst = arith.constant dense<0.000000e+00> : vector<80x64xf32>
    %3 = tpu.matmul %1, %2, %cst {dimension_numbers = #tpu.dot_dimension_numbers<[1], [0], [0], [1], [0, 0, 1, 1], [], []>} : vector<80x32xbf16>, vector<32x64xbf16>, vector<80x64xf32> -> vector<80x64xf32>
    %c0_3 = arith.constant 0 : index
    %c0_4 = arith.constant 0 : index
    %4 = vector.load %arg3[%c0_3, %c0_4] : memref<1x64xf32, #tpu.memory_space<vmem>>, vector<1x64xf32>
    %5 = vector.broadcast %4 : vector<1x64xf32> to vector<80x64xf32>
    %6 = arith.addf %3, %5 : vector<80x64xf32>
    %cst_5 = arith.constant 0.000000e+00 : f32
    %7 = vector.broadcast %cst_5 : f32 to vector<80x64xf32>
    %8 = arith.maximumf %6, %7 : vector<80x64xf32>
    %9 = arith.truncf %8 : vector<80x64xf32> to vector<80x64xbf16>
    %c0_6 = arith.constant 0 : index
    %c0_7 = arith.constant 0 : index
    %10 = vector.load %arg4[%c0_6, %c0_7] : memref<64x32xbf16, #tpu.memory_space<vmem>>, vector<64x32xbf16>
    %cst_8 = arith.constant dense<0.000000e+00> : vector<80x32xf32>
    %11 = tpu.matmul %9, %10, %cst_8 {dimension_numbers = #tpu.dot_dimension_numbers<[1], [0], [0], [1], [0, 0, 1, 1], [], []>} : vector<80x64xbf16>, vector<64x32xbf16>, vector<80x32xf32> -> vector<80x32xf32>
    %c0_9 = arith.constant 0 : index
    %c0_10 = arith.constant 0 : index
    %12 = vector.load %arg5[%c0_9, %c0_10] : memref<1x32xf32, #tpu.memory_space<vmem>>, vector<1x32xf32>
    %13 = vector.broadcast %12 : vector<1x32xf32> to vector<80x32xf32>
    %14 = arith.addf %11, %13 : vector<80x32xf32>
    %15 = arith.addf %0, %14 : vector<80x32xf32>
    %cst_11 = arith.constant dense<0.000000e+00> : vector<80xf32>
    %16 = vector.multi_reduction <add>, %15, %cst_11 [1] : vector<80x32xf32> to vector<80xf32>
    %17 = vector.shape_cast %16 : vector<80xf32> to vector<80x1xf32>
    %cst_12 = arith.constant 3.200000e+01 : f32
    %18 = vector.broadcast %cst_12 : f32 to vector<80x1xf32>
    %19 = arith.divf %17, %18 : vector<80x1xf32>
    %20 = vector.broadcast %19 : vector<80x1xf32> to vector<80x32xf32>
    %21 = arith.subf %15, %20 : vector<80x32xf32>
    %22 = arith.mulf %21, %21 : vector<80x32xf32>
    %cst_13 = arith.constant dense<0.000000e+00> : vector<80xf32>
    %23 = vector.multi_reduction <add>, %22, %cst_13 [1] : vector<80x32xf32> to vector<80xf32>
    %24 = vector.shape_cast %23 : vector<80xf32> to vector<80x1xf32>
    %cst_14 = arith.constant 3.200000e+01 : f32
    %25 = vector.broadcast %cst_14 : f32 to vector<80x1xf32>
    %26 = arith.divf %24, %25 : vector<80x1xf32>
    %27 = vector.broadcast %19 : vector<80x1xf32> to vector<80x32xf32>
    %28 = arith.subf %15, %27 : vector<80x32xf32>
    %cst_15 = arith.constant 9.99999974E-6 : f32
    %29 = vector.broadcast %cst_15 : f32 to vector<80x1xf32>
    %30 = arith.addf %26, %29 : vector<80x1xf32>
    %31 = math.rsqrt %30 : vector<80x1xf32>
    %32 = vector.broadcast %31 : vector<80x1xf32> to vector<80x32xf32>
    %33 = arith.mulf %28, %32 : vector<80x32xf32>
    %c0_16 = arith.constant 0 : index
    %c0_17 = arith.constant 0 : index
    %34 = vector.load %arg6[%c0_16, %c0_17] : memref<1x32xf32, #tpu.memory_space<vmem>>, vector<1x32xf32>
    %35 = vector.broadcast %34 : vector<1x32xf32> to vector<80x32xf32>
    %36 = arith.mulf %33, %35 : vector<80x32xf32>
    %c0_18 = arith.constant 0 : index
    %c0_19 = arith.constant 0 : index
    %37 = vector.load %arg7[%c0_18, %c0_19] : memref<1x32xf32, #tpu.memory_space<vmem>>, vector<1x32xf32>
    %38 = vector.broadcast %37 : vector<1x32xf32> to vector<80x32xf32>
    %39 = arith.addf %36, %38 : vector<80x32xf32>
    %c0_20 = arith.constant 0 : index
    %c0_21 = arith.constant 0 : index
    %40 = vector.load %arg8[%c0_20, %c0_21] : memref<80x32xf32, #tpu.memory_space<vmem>>, vector<80x32xf32>
    tpu.vector_store %arg8[%c0_20, %c0_21], %39 {strides = array<i32>} : memref<80x32xf32, #tpu.memory_space<vmem>>, vector<80x32xf32>,
    return
  }
  func.func @transform_0(%arg0: i32) -> (i32, i32) {
    %c0_i32 = arith.constant 0 : i32
    %c0_i32_0 = arith.constant 0 : i32
    return %arg0, %c0_i32 : i32, i32
  }
  func.func @transform_1(%arg0: i32) -> (i32, i32) {
    %c0_i32 = arith.constant 0 : i32
    %c0_i32_0 = arith.constant 0 : i32
    %c0_i32_1 = arith.constant 0 : i32
    return %c0_i32, %c0_i32_0 : i32, i32
  }
  func.func @transform_2(%arg0: i32) -> (i32, i32) {
    %c0_i32 = arith.constant 0 : i32
    %c0_i32_0 = arith.constant 0 : i32
    %c0_i32_1 = arith.constant 0 : i32
    return %c0_i32, %c0_i32_0 : i32, i32
  }
  func.func @transform_3(%arg0: i32) -> (i32, i32) {
    %c0_i32 = arith.constant 0 : i32
    %c0_i32_0 = arith.constant 0 : i32
    %c0_i32_1 = arith.constant 0 : i32
    return %c0_i32, %c0_i32_0 : i32, i32
  }
  func.func @transform_4(%arg0: i32) -> (i32, i32) {
    %c0_i32 = arith.constant 0 : i32
    %c0_i32_0 = arith.constant 0 : i32
    %c0_i32_1 = arith.constant 0 : i32
    return %c0_i32, %c0_i32_0 : i32, i32
  }
  func.func @transform_5(%arg0: i32) -> (i32, i32) {
    %c0_i32 = arith.constant 0 : i32
    %c0_i32_0 = arith.constant 0 : i32
    %c0_i32_1 = arith.constant 0 : i32
    return %c0_i32, %c0_i32_0 : i32, i32
  }
  func.func @transform_6(%arg0: i32) -> (i32, i32) {
    %c0_i32 = arith.constant 0 : i32
    %c0_i32_0 = arith.constant 0 : i32
    %c0_i32_1 = arith.constant 0 : i32
    return %c0_i32, %c0_i32_0 : i32, i32
  }
  func.func @transform_7(%arg0: i32) -> (i32, i32) {
    %c0_i32 = arith.constant 0 : i32
    %c0_i32_0 = arith.constant 0 : i32
    return %arg0, %c0_i32 : i32, i32
  }
}

module attributes {stable_mosaic.version = 11 : i64} {
  func.func @_attn_in_proj_kernel(%arg0: i32, %arg1: memref<80x32xf32, #tpu.memory_space<vmem>>, %arg2: memref<80x32xf32, #tpu.memory_space<vmem>>, %arg3: memref<80x1xf32, #tpu.memory_space<vmem>>, %arg4: memref<32x32xbf16, #tpu.memory_space<vmem>>, %arg5: memref<1x32xf32, #tpu.memory_space<vmem>>, %arg6: memref<32x128xbf16, #tpu.memory_space<vmem>>, %arg7: memref<1x128xf32, #tpu.memory_space<vmem>>, %arg8: memref<128x128xf32, #tpu.memory_space<vmem>>, %arg9: memref<1x128xf32, #tpu.memory_space<vmem>>, %arg10: memref<80x32xf32, #tpu.memory_space<vmem>>, %arg11: memref<80x128xf32, #tpu.memory_space<vmem>>) attributes {dimension_semantics = [#tpu.dimension_semantics<parallel>], iteration_bounds = array<i64: 2>, scalar_prefetch = 0 : i64, scratch_operands = 0 : i64, tpu.core_type = #tpu.core_type<tc>, window_params = [{transform_indices = @transform_0, window_bounds = array<i64: 80, 32>}, {transform_indices = @transform_1, window_bounds = array<i64: 80, 32>}, {transform_indices = @transform_2, window_bounds = array<i64: 80, 1>}, {pipeline_mode = #tpu.pipeline_mode<synchronous>, transform_indices = @transform_3, window_bounds = array<i64: 32, 32>}, {pipeline_mode = #tpu.pipeline_mode<synchronous>, transform_indices = @transform_4, window_bounds = array<i64: 1, 32>}, {pipeline_mode = #tpu.pipeline_mode<synchronous>, transform_indices = @transform_5, window_bounds = array<i64: 32, 128>}, {pipeline_mode = #tpu.pipeline_mode<synchronous>, transform_indices = @transform_6, window_bounds = array<i64: 1, 128>}, {pipeline_mode = #tpu.pipeline_mode<synchronous>, transform_indices = @transform_7, window_bounds = array<i64: 128, 128>}, {pipeline_mode = #tpu.pipeline_mode<synchronous>, transform_indices = @transform_8, window_bounds = array<i64: 1, 128>}, {transform_indices = @transform_9, window_bounds = array<i64: 80, 32>}, {transform_indices = @transform_10, window_bounds = array<i64: 80, 128>}]} {
    %c0 = arith.constant 0 : index
    %c0_0 = arith.constant 0 : index
    %0 = vector.load %arg1[%c0, %c0_0] : memref<80x32xf32, #tpu.memory_space<vmem>>, vector<80x32xf32>
    %c0_1 = arith.constant 0 : index
    %c0_2 = arith.constant 0 : index
    %1 = vector.load %arg2[%c0_1, %c0_2] : memref<80x32xf32, #tpu.memory_space<vmem>>, vector<80x32xf32>
    %2 = arith.addf %0, %1 : vector<80x32xf32>
    %3 = arith.truncf %0 : vector<80x32xf32> to vector<80x32xbf16>
    %c0_3 = arith.constant 0 : index
    %c0_4 = arith.constant 0 : index
    %4 = vector.load %arg4[%c0_3, %c0_4] : memref<32x32xbf16, #tpu.memory_space<vmem>>, vector<32x32xbf16>
    %cst = arith.constant dense<0.000000e+00> : vector<80x32xf32>
    %5 = tpu.matmul %3, %4, %cst {dimension_numbers = #tpu.dot_dimension_numbers<[1], [0], [0], [1], [0, 0, 1, 1], [], []>} : vector<80x32xbf16>, vector<32x32xbf16>, vector<80x32xf32> -> vector<80x32xf32>
    %c0_5 = arith.constant 0 : index
    %c0_6 = arith.constant 0 : index
    %6 = vector.load %arg5[%c0_5, %c0_6] : memref<1x32xf32, #tpu.memory_space<vmem>>, vector<1x32xf32>
    %7 = vector.broadcast %6 : vector<1x32xf32> to vector<80x32xf32>
    %8 = arith.addf %5, %7 : vector<80x32xf32>
    %c0_7 = arith.constant 0 : index
    %c0_8 = arith.constant 0 : index
    %9 = vector.load %arg3[%c0_7, %c0_8] : memref<80x1xf32, #tpu.memory_space<vmem>>, vector<80x1xf32>
    %cst_9 = arith.constant 1.000000e+00 : f32
    %10 = vector.broadcast %cst_9 : f32 to vector<80x1xf32>
    %11 = arith.subf %10, %9 : vector<80x1xf32>
    %12 = vector.broadcast %11 : vector<80x1xf32> to vector<80x32xf32>
    %13 = arith.mulf %8, %12 : vector<80x32xf32>
    %c0_10 = arith.constant 0 : index
    %c0_11 = arith.constant 0 : index
    %14 = vector.load %arg10[%c0_10, %c0_11] : memref<80x32xf32, #tpu.memory_space<vmem>>, vector<80x32xf32>
    tpu.vector_store %arg10[%c0_10, %c0_11], %13 {strides = array<i32>} : memref<80x32xf32, #tpu.memory_space<vmem>>, vector<80x32xf32>,
    %15 = arith.truncf %2 : vector<80x32xf32> to vector<80x32xbf16>
    %c0_12 = arith.constant 0 : index
    %c0_13 = arith.constant 0 : index
    %16 = vector.load %arg6[%c0_12, %c0_13] : memref<32x128xbf16, #tpu.memory_space<vmem>>, vector<32x128xbf16>
    %cst_14 = arith.constant dense<0.000000e+00> : vector<80x128xf32>
    %17 = tpu.matmul %15, %16, %cst_14 {dimension_numbers = #tpu.dot_dimension_numbers<[1], [0], [0], [1], [0, 0, 1, 1], [], []>} : vector<80x32xbf16>, vector<32x128xbf16>, vector<80x128xf32> -> vector<80x128xf32>
    %c0_15 = arith.constant 0 : index
    %c0_16 = arith.constant 0 : index
    %18 = vector.load %arg7[%c0_15, %c0_16] : memref<1x128xf32, #tpu.memory_space<vmem>>, vector<1x128xf32>
    %19 = vector.broadcast %18 : vector<1x128xf32> to vector<80x128xf32>
    %20 = arith.addf %17, %19 : vector<80x128xf32>
    %c0_17 = arith.constant 0 : index
    %c0_18 = arith.constant 0 : index
    %21 = vector.load %arg9[%c0_17, %c0_18] : memref<1x128xf32, #tpu.memory_space<vmem>>, vector<1x128xf32>
    %cst_19 = arith.constant 1.000000e+00 : f32
    %22 = vector.broadcast %cst_19 : f32 to vector<1x128xf32>
    %23 = arith.subf %21, %22 : vector<1x128xf32>
    %cst_20 = arith.constant 1.000000e+30 : f32
    %24 = vector.broadcast %cst_20 : f32 to vector<1x128xf32>
    %25 = arith.mulf %23, %24 : vector<1x128xf32>
    %26 = vector.broadcast %25 : vector<1x128xf32> to vector<80x128xf32>
    %27 = arith.addf %20, %26 : vector<80x128xf32>
    %cst_21 = arith.constant dense<0xFF800000> : vector<80xf32>
    %28 = vector.multi_reduction <maximumf>, %27, %cst_21 [1] : vector<80x128xf32> to vector<80xf32>
    %29 = vector.shape_cast %28 : vector<80xf32> to vector<80x1xf32>
    %30 = vector.broadcast %29 : vector<80x1xf32> to vector<80x128xf32>
    %31 = arith.subf %20, %30 : vector<80x128xf32>
    %cst_22 = arith.constant -8.000000e+01 : f32
    %cst_23 = arith.constant 8.000000e+01 : f32
    %32 = vector.broadcast %cst_22 : f32 to vector<80x128xf32>
    %33 = arith.maximumf %32, %31 : vector<80x128xf32>
    %34 = vector.broadcast %cst_23 : f32 to vector<80x128xf32>
    %35 = arith.minimumf %34, %33 : vector<80x128xf32>
    %36 = math.exp %35 : vector<80x128xf32>
    %37 = vector.broadcast %21 : vector<1x128xf32> to vector<80x128xf32>
    %38 = arith.mulf %36, %37 : vector<80x128xf32>
    %c0_24 = arith.constant 0 : index
    %c0_25 = arith.constant 0 : index
    %39 = vector.load %arg8[%c0_24, %c0_25] : memref<128x128xf32, #tpu.memory_space<vmem>>, vector<128x128xf32>
    %cst_26 = arith.constant dense<0.000000e+00> : vector<80x128xf32>
    %40 = tpu.matmul %38, %39, %cst_26 {dimension_numbers = #tpu.dot_dimension_numbers<[1], [0], [0], [1], [0, 0, 1, 1], [], []>} : vector<80x128xf32>, vector<128x128xf32>, vector<80x128xf32> -> vector<80x128xf32>
    %cst_27 = arith.constant 1.000000e+00 : f32
    %41 = vector.broadcast %cst_27 : f32 to vector<1x128xf32>
    %42 = arith.subf %41, %21 : vector<1x128xf32>
    %43 = vector.broadcast %42 : vector<1x128xf32> to vector<80x128xf32>
    %44 = arith.addf %40, %43 : vector<80x128xf32>
    %45 = arith.divf %38, %44 : vector<80x128xf32>
    %cst_28 = arith.constant 1.000000e+00 : f32
    %46 = vector.broadcast %cst_28 : f32 to vector<1x128xf32>
    %47 = arith.subf %46, %21 : vector<1x128xf32>
    %48 = vector.broadcast %47 : vector<1x128xf32> to vector<80x128xf32>
    %49 = arith.mulf %20, %48 : vector<80x128xf32>
    %50 = arith.addf %49, %45 : vector<80x128xf32>
    %c0_29 = arith.constant 0 : index
    %c0_30 = arith.constant 0 : index
    %51 = vector.load %arg11[%c0_29, %c0_30] : memref<80x128xf32, #tpu.memory_space<vmem>>, vector<80x128xf32>
    tpu.vector_store %arg11[%c0_29, %c0_30], %50 {strides = array<i32>} : memref<80x128xf32, #tpu.memory_space<vmem>>, vector<80x128xf32>,
    return
  }
  func.func @transform_0(%arg0: i32) -> (i32, i32) {
    %c0_i32 = arith.constant 0 : i32
    %c0_i32_0 = arith.constant 0 : i32
    return %arg0, %c0_i32 : i32, i32
  }
  func.func @transform_1(%arg0: i32) -> (i32, i32) {
    %c0_i32 = arith.constant 0 : i32
    %c0_i32_0 = arith.constant 0 : i32
    return %arg0, %c0_i32 : i32, i32
  }
  func.func @transform_2(%arg0: i32) -> (i32, i32) {
    %c0_i32 = arith.constant 0 : i32
    %c0_i32_0 = arith.constant 0 : i32
    return %arg0, %c0_i32 : i32, i32
  }
  func.func @transform_3(%arg0: i32) -> (i32, i32) {
    %c0_i32 = arith.constant 0 : i32
    %c0_i32_0 = arith.constant 0 : i32
    %c0_i32_1 = arith.constant 0 : i32
    return %c0_i32, %c0_i32_0 : i32, i32
  }
  func.func @transform_4(%arg0: i32) -> (i32, i32) {
    %c0_i32 = arith.constant 0 : i32
    %c0_i32_0 = arith.constant 0 : i32
    %c0_i32_1 = arith.constant 0 : i32
    return %c0_i32, %c0_i32_0 : i32, i32
  }
  func.func @transform_5(%arg0: i32) -> (i32, i32) {
    %c0_i32 = arith.constant 0 : i32
    %c0_i32_0 = arith.constant 0 : i32
    %c0_i32_1 = arith.constant 0 : i32
    return %c0_i32, %c0_i32_0 : i32, i32
  }
  func.func @transform_6(%arg0: i32) -> (i32, i32) {
    %c0_i32 = arith.constant 0 : i32
    %c0_i32_0 = arith.constant 0 : i32
    %c0_i32_1 = arith.constant 0 : i32
    return %c0_i32, %c0_i32_0 : i32, i32
  }
  func.func @transform_7(%arg0: i32) -> (i32, i32) {
    %c0_i32 = arith.constant 0 : i32
    %c0_i32_0 = arith.constant 0 : i32
    %c0_i32_1 = arith.constant 0 : i32
    return %c0_i32, %c0_i32_0 : i32, i32
  }
  func.func @transform_8(%arg0: i32) -> (i32, i32) {
    %c0_i32 = arith.constant 0 : i32
    %c0_i32_0 = arith.constant 0 : i32
    %c0_i32_1 = arith.constant 0 : i32
    return %c0_i32, %c0_i32_0 : i32, i32
  }
  func.func @transform_9(%arg0: i32) -> (i32, i32) {
    %c0_i32 = arith.constant 0 : i32
    %c0_i32_0 = arith.constant 0 : i32
    return %arg0, %c0_i32 : i32, i32
  }
  func.func @transform_10(%arg0: i32) -> (i32, i32) {
    %c0_i32 = arith.constant 0 : i32
    %c0_i32_0 = arith.constant 0 : i32
    return %arg0, %c0_i32 : i32, i32
  }
}

module attributes {stable_mosaic.version = 11 : i64} {
  func.func @_ffn_ln_final_kernel(%arg0: i32, %arg1: memref<80x32xf32, #tpu.memory_space<vmem>>, %arg2: memref<32x64xbf16, #tpu.memory_space<vmem>>, %arg3: memref<1x64xf32, #tpu.memory_space<vmem>>, %arg4: memref<64x32xbf16, #tpu.memory_space<vmem>>, %arg5: memref<1x32xf32, #tpu.memory_space<vmem>>, %arg6: memref<1x32xf32, #tpu.memory_space<vmem>>, %arg7: memref<1x32xf32, #tpu.memory_space<vmem>>, %arg8: memref<1x32xf32, #tpu.memory_space<vmem>>, %arg9: memref<1x32xf32, #tpu.memory_space<vmem>>, %arg10: memref<80x32xf32, #tpu.memory_space<vmem>>) attributes {dimension_semantics = [#tpu.dimension_semantics<parallel>], iteration_bounds = array<i64: 2>, scalar_prefetch = 0 : i64, scratch_operands = 0 : i64, tpu.core_type = #tpu.core_type<tc>, window_params = [{transform_indices = @transform_0, window_bounds = array<i64: 80, 32>}, {pipeline_mode = #tpu.pipeline_mode<synchronous>, transform_indices = @transform_1, window_bounds = array<i64: 32, 64>}, {pipeline_mode = #tpu.pipeline_mode<synchronous>, transform_indices = @transform_2, window_bounds = array<i64: 1, 64>}, {pipeline_mode = #tpu.pipeline_mode<synchronous>, transform_indices = @transform_3, window_bounds = array<i64: 64, 32>}, {pipeline_mode = #tpu.pipeline_mode<synchronous>, transform_indices = @transform_4, window_bounds = array<i64: 1, 32>}, {pipeline_mode = #tpu.pipeline_mode<synchronous>, transform_indices = @transform_5, window_bounds = array<i64: 1, 32>}, {pipeline_mode = #tpu.pipeline_mode<synchronous>, transform_indices = @transform_6, window_bounds = array<i64: 1, 32>}, {pipeline_mode = #tpu.pipeline_mode<synchronous>, transform_indices = @transform_7, window_bounds = array<i64: 1, 32>}, {pipeline_mode = #tpu.pipeline_mode<synchronous>, transform_indices = @transform_8, window_bounds = array<i64: 1, 32>}, {transform_indices = @transform_9, window_bounds = array<i64: 80, 32>}]} {
    %c0 = arith.constant 0 : index
    %c0_0 = arith.constant 0 : index
    %0 = vector.load %arg1[%c0, %c0_0] : memref<80x32xf32, #tpu.memory_space<vmem>>, vector<80x32xf32>
    %1 = arith.truncf %0 : vector<80x32xf32> to vector<80x32xbf16>
    %c0_1 = arith.constant 0 : index
    %c0_2 = arith.constant 0 : index
    %2 = vector.load %arg2[%c0_1, %c0_2] : memref<32x64xbf16, #tpu.memory_space<vmem>>, vector<32x64xbf16>
    %cst = arith.constant dense<0.000000e+00> : vector<80x64xf32>
    %3 = tpu.matmul %1, %2, %cst {dimension_numbers = #tpu.dot_dimension_numbers<[1], [0], [0], [1], [0, 0, 1, 1], [], []>} : vector<80x32xbf16>, vector<32x64xbf16>, vector<80x64xf32> -> vector<80x64xf32>
    %c0_3 = arith.constant 0 : index
    %c0_4 = arith.constant 0 : index
    %4 = vector.load %arg3[%c0_3, %c0_4] : memref<1x64xf32, #tpu.memory_space<vmem>>, vector<1x64xf32>
    %5 = vector.broadcast %4 : vector<1x64xf32> to vector<80x64xf32>
    %6 = arith.addf %3, %5 : vector<80x64xf32>
    %cst_5 = arith.constant 0.000000e+00 : f32
    %7 = vector.broadcast %cst_5 : f32 to vector<80x64xf32>
    %8 = arith.maximumf %6, %7 : vector<80x64xf32>
    %9 = arith.truncf %8 : vector<80x64xf32> to vector<80x64xbf16>
    %c0_6 = arith.constant 0 : index
    %c0_7 = arith.constant 0 : index
    %10 = vector.load %arg4[%c0_6, %c0_7] : memref<64x32xbf16, #tpu.memory_space<vmem>>, vector<64x32xbf16>
    %cst_8 = arith.constant dense<0.000000e+00> : vector<80x32xf32>
    %11 = tpu.matmul %9, %10, %cst_8 {dimension_numbers = #tpu.dot_dimension_numbers<[1], [0], [0], [1], [0, 0, 1, 1], [], []>} : vector<80x64xbf16>, vector<64x32xbf16>, vector<80x32xf32> -> vector<80x32xf32>
    %c0_9 = arith.constant 0 : index
    %c0_10 = arith.constant 0 : index
    %12 = vector.load %arg5[%c0_9, %c0_10] : memref<1x32xf32, #tpu.memory_space<vmem>>, vector<1x32xf32>
    %13 = vector.broadcast %12 : vector<1x32xf32> to vector<80x32xf32>
    %14 = arith.addf %11, %13 : vector<80x32xf32>
    %15 = arith.addf %0, %14 : vector<80x32xf32>
    %cst_11 = arith.constant dense<0.000000e+00> : vector<80xf32>
    %16 = vector.multi_reduction <add>, %15, %cst_11 [1] : vector<80x32xf32> to vector<80xf32>
    %17 = vector.shape_cast %16 : vector<80xf32> to vector<80x1xf32>
    %cst_12 = arith.constant 3.200000e+01 : f32
    %18 = vector.broadcast %cst_12 : f32 to vector<80x1xf32>
    %19 = arith.divf %17, %18 : vector<80x1xf32>
    %20 = vector.broadcast %19 : vector<80x1xf32> to vector<80x32xf32>
    %21 = arith.subf %15, %20 : vector<80x32xf32>
    %22 = arith.mulf %21, %21 : vector<80x32xf32>
    %cst_13 = arith.constant dense<0.000000e+00> : vector<80xf32>
    %23 = vector.multi_reduction <add>, %22, %cst_13 [1] : vector<80x32xf32> to vector<80xf32>
    %24 = vector.shape_cast %23 : vector<80xf32> to vector<80x1xf32>
    %cst_14 = arith.constant 3.200000e+01 : f32
    %25 = vector.broadcast %cst_14 : f32 to vector<80x1xf32>
    %26 = arith.divf %24, %25 : vector<80x1xf32>
    %27 = vector.broadcast %19 : vector<80x1xf32> to vector<80x32xf32>
    %28 = arith.subf %15, %27 : vector<80x32xf32>
    %cst_15 = arith.constant 9.99999974E-6 : f32
    %29 = vector.broadcast %cst_15 : f32 to vector<80x1xf32>
    %30 = arith.addf %26, %29 : vector<80x1xf32>
    %31 = math.rsqrt %30 : vector<80x1xf32>
    %32 = vector.broadcast %31 : vector<80x1xf32> to vector<80x32xf32>
    %33 = arith.mulf %28, %32 : vector<80x32xf32>
    %c0_16 = arith.constant 0 : index
    %c0_17 = arith.constant 0 : index
    %34 = vector.load %arg6[%c0_16, %c0_17] : memref<1x32xf32, #tpu.memory_space<vmem>>, vector<1x32xf32>
    %35 = vector.broadcast %34 : vector<1x32xf32> to vector<80x32xf32>
    %36 = arith.mulf %33, %35 : vector<80x32xf32>
    %c0_18 = arith.constant 0 : index
    %c0_19 = arith.constant 0 : index
    %37 = vector.load %arg7[%c0_18, %c0_19] : memref<1x32xf32, #tpu.memory_space<vmem>>, vector<1x32xf32>
    %38 = vector.broadcast %37 : vector<1x32xf32> to vector<80x32xf32>
    %39 = arith.addf %36, %38 : vector<80x32xf32>
    %cst_20 = arith.constant dense<0.000000e+00> : vector<80xf32>
    %40 = vector.multi_reduction <add>, %39, %cst_20 [1] : vector<80x32xf32> to vector<80xf32>
    %41 = vector.shape_cast %40 : vector<80xf32> to vector<80x1xf32>
    %cst_21 = arith.constant 3.200000e+01 : f32
    %42 = vector.broadcast %cst_21 : f32 to vector<80x1xf32>
    %43 = arith.divf %41, %42 : vector<80x1xf32>
    %44 = vector.broadcast %43 : vector<80x1xf32> to vector<80x32xf32>
    %45 = arith.subf %39, %44 : vector<80x32xf32>
    %46 = arith.mulf %45, %45 : vector<80x32xf32>
    %cst_22 = arith.constant dense<0.000000e+00> : vector<80xf32>
    %47 = vector.multi_reduction <add>, %46, %cst_22 [1] : vector<80x32xf32> to vector<80xf32>
    %48 = vector.shape_cast %47 : vector<80xf32> to vector<80x1xf32>
    %cst_23 = arith.constant 3.200000e+01 : f32
    %49 = vector.broadcast %cst_23 : f32 to vector<80x1xf32>
    %50 = arith.divf %48, %49 : vector<80x1xf32>
    %51 = vector.broadcast %43 : vector<80x1xf32> to vector<80x32xf32>
    %52 = arith.subf %39, %51 : vector<80x32xf32>
    %cst_24 = arith.constant 9.99999974E-6 : f32
    %53 = vector.broadcast %cst_24 : f32 to vector<80x1xf32>
    %54 = arith.addf %50, %53 : vector<80x1xf32>
    %55 = math.rsqrt %54 : vector<80x1xf32>
    %56 = vector.broadcast %55 : vector<80x1xf32> to vector<80x32xf32>
    %57 = arith.mulf %52, %56 : vector<80x32xf32>
    %c0_25 = arith.constant 0 : index
    %c0_26 = arith.constant 0 : index
    %58 = vector.load %arg8[%c0_25, %c0_26] : memref<1x32xf32, #tpu.memory_space<vmem>>, vector<1x32xf32>
    %59 = vector.broadcast %58 : vector<1x32xf32> to vector<80x32xf32>
    %60 = arith.mulf %57, %59 : vector<80x32xf32>
    %c0_27 = arith.constant 0 : index
    %c0_28 = arith.constant 0 : index
    %61 = vector.load %arg9[%c0_27, %c0_28] : memref<1x32xf32, #tpu.memory_space<vmem>>, vector<1x32xf32>
    %62 = vector.broadcast %61 : vector<1x32xf32> to vector<80x32xf32>
    %63 = arith.addf %60, %62 : vector<80x32xf32>
    %c0_29 = arith.constant 0 : index
    %c0_30 = arith.constant 0 : index
    %64 = vector.load %arg10[%c0_29, %c0_30] : memref<80x32xf32, #tpu.memory_space<vmem>>, vector<80x32xf32>
    tpu.vector_store %arg10[%c0_29, %c0_30], %63 {strides = array<i32>} : memref<80x32xf32, #tpu.memory_space<vmem>>, vector<80x32xf32>,
    return
  }
  func.func @transform_0(%arg0: i32) -> (i32, i32) {
    %c0_i32 = arith.constant 0 : i32
    %c0_i32_0 = arith.constant 0 : i32
    return %arg0, %c0_i32 : i32, i32
  }
  func.func @transform_1(%arg0: i32) -> (i32, i32) {
    %c0_i32 = arith.constant 0 : i32
    %c0_i32_0 = arith.constant 0 : i32
    %c0_i32_1 = arith.constant 0 : i32
    return %c0_i32, %c0_i32_0 : i32, i32
  }
  func.func @transform_2(%arg0: i32) -> (i32, i32) {
    %c0_i32 = arith.constant 0 : i32
    %c0_i32_0 = arith.constant 0 : i32
    %c0_i32_1 = arith.constant 0 : i32
    return %c0_i32, %c0_i32_0 : i32, i32
  }
  func.func @transform_3(%arg0: i32) -> (i32, i32) {
    %c0_i32 = arith.constant 0 : i32
    %c0_i32_0 = arith.constant 0 : i32
    %c0_i32_1 = arith.constant 0 : i32
    return %c0_i32, %c0_i32_0 : i32, i32
  }
  func.func @transform_4(%arg0: i32) -> (i32, i32) {
    %c0_i32 = arith.constant 0 : i32
    %c0_i32_0 = arith.constant 0 : i32
    %c0_i32_1 = arith.constant 0 : i32
    return %c0_i32, %c0_i32_0 : i32, i32
  }
  func.func @transform_5(%arg0: i32) -> (i32, i32) {
    %c0_i32 = arith.constant 0 : i32
    %c0_i32_0 = arith.constant 0 : i32
    %c0_i32_1 = arith.constant 0 : i32
    return %c0_i32, %c0_i32_0 : i32, i32
  }
  func.func @transform_6(%arg0: i32) -> (i32, i32) {
    %c0_i32 = arith.constant 0 : i32
    %c0_i32_0 = arith.constant 0 : i32
    %c0_i32_1 = arith.constant 0 : i32
    return %c0_i32, %c0_i32_0 : i32, i32
  }
  func.func @transform_7(%arg0: i32) -> (i32, i32) {
    %c0_i32 = arith.constant 0 : i32
    %c0_i32_0 = arith.constant 0 : i32
    %c0_i32_1 = arith.constant 0 : i32
    return %c0_i32, %c0_i32_0 : i32, i32
  }
  func.func @transform_8(%arg0: i32) -> (i32, i32) {
    %c0_i32 = arith.constant 0 : i32
    %c0_i32_0 = arith.constant 0 : i32
    %c0_i32_1 = arith.constant 0 : i32
    return %c0_i32, %c0_i32_0 : i32, i32
  }
  func.func @transform_9(%arg0: i32) -> (i32, i32) {
    %c0_i32 = arith.constant 0 : i32
    %c0_i32_0 = arith.constant 0 : i32
    return %arg0, %c0_i32 : i32, i32
  }
}

</mosaic_0001>

<bundles_post_ra>
// kernel: _encoder_forward.6
= control target key start
LH: loop header
LB: loop body
LE: loop exit
PB: predicated region body
PF: predicated region fallthrough
CT: control target
= control target key end

     0   :  { %16 = vsyncpa [#allocation3], 0  ;;  %s2425_s0 = inlined_call_operand.vmem [shape: f32[160,32], index: 0, kind: input, shape index: {}]   ;;  %s2426_s1 = inlined_call_operand.vmem [shape: f32[160,32], index: 1, kind: input, shape index: {}]   ;;  %s2427_s2 = inlined_call_operand.vmem [shape: f32[160,1], index: 2, kind: input, shape index: {}]   ;;  %s2428_s3 = inlined_call_operand.hbm [shape: bf16[32,32], index: 3, kind: input, shape index: {}]   ;;  %s2429_s4 = inlined_call_operand.hbm [shape: f32[1,32], index: 4, kind: input, shape index: {}]   ;;  %s2430_s5 = inlined_call_operand.hbm [shape: bf16[32,128], index: 5, kind: input, shape index: {}]   ;;  %s2431_s6 = inlined_call_operand.hbm [shape: f32[1,128], index: 6, kind: input, shape index: {}]   ;;  %s2432_s7 = inlined_call_operand.hbm [shape: f32[128,128], index: 7, kind: input, shape index: {}]   ;;  %s2433_s8 = inlined_call_operand.hbm [shape: f32[1,128], index: 8, kind: input, shape index: {}]   ;;  %s2434_s9 = inlined_call_operand.vmem [shape: f32[160,32], index: 9, kind: output, shape index: {0}]   ;;  %s2435_s10 = inlined_call_operand.vmem [shape: f32[160,128], index: 10, kind: output, shape index: {1}]  }
   0x1   :  { %17 = vsyncpa [#allocation5], 0 }
   0x2   :  { %18 = vsyncpa [#allocation8], 0 }
   0x3   :  { %19 = vsyncpa [#allocation11], 0  ;;  %s1928_s13 = smov 0  }
   0x4 LB: > { %s1860_s14 = smov [#allocation4]   ;;  %s1324_s16 = sadd.s32 4294967295, %s1858_s13   ;;  %s1858_s13 = sphi %s1928_s13, %s25_s13  }
   0x5   : > { %s312_s15 = sshll.u32 %s1860_s14, 4  ;;  %p1326_p0 = scmp.ge.s32.totalorder %s1858_s13, 1  ;;  %s1942_s15 = int_to_ptr.vmem [resolvable:$true] %s312_s15 }
   0x6   : > { %p286_p1 = scmp.lt.s32.totalorder %s1858_s13, 3  ;;  %p1938_p2 = scmp.eq.s32.totalorder %s1324_s16, 0 }
   0x7   : > { %s1861_s19 = smov [#allocation7]   ;;  %s1862_s21 = smov [#allocation2]  }
   0x8   : > { %s2439_s17 = scalar_select %p1938_p2, 1, 0 }
   0x9   : > { %p1944_p3 = pnand %p1326_p0, %p286_p1  ;;  %s336_s20 = sshll.u32 %s1861_s19, 4  ;;  %s1950_s20 = int_to_ptr.vmem [resolvable:$true] %s336_s20 }
   0xa   : > { %s298_s22 = sshll.u32 %s1862_s21, 4  ;;  %s1863_s24 = smov [#allocation6]   ;;  %s1958_s22 = int_to_ptr.vmem [resolvable:$true] %s298_s22 }
   0xb   : > { %s2440_s18 = scalar_select %p1944_p3, 1, 0 }
   0xc   : > { %p1570_p4 = pneg %p1944_p3  ;;  %s1960_s25 = sshll.u32 %s1863_s24, 4  ;;  %s323_s25 = int_to_ptr.vmem [resolvable:$true] %s1960_s25 }
   0xd   : > { %s1668_s28 = scalar_lea.hbm %s2429_s4, 16 }
   0xe   : > { %p1954_p5 = pnand %p1938_p2, %p1570_p4  ;;  %p1669_p6 = scmp.ne.s32.totalorder %s2429_s4, %s1668_s28 }
   0xf   : > { %p1675_p10 = scmp.lt.u32.totalorder %s1668_s28, %s2429_s4 }
  0x10   : > { %p1970_p7 = pneg %p1954_p5 }
  0x12   : > { %p1671_p8 = pnand %p1970_p7, %p1669_p6 }
  0x14   : > { %p1672_p9 = pneg %p1671_p8 }
  0x16   : > { %p1677_p11 = pnand %p1675_p10, %p1672_p9 }
  0x18   : > { %1680 = shalt.err (!%p1677_p11)
}
  0x19   : > { %s1681_s19 = scalar_lea.vmem %s1942_s15, 16  ;;  %s1688_s21 = scalar_lea.vmem %s1942_s15, 32 }
  0x1a   : > { %p1682_p12 = scmp.ne.s32.totalorder %s1942_s15, %s1681_s19  ;;  %p1689_p1 = scmp.lt.s32.totalorder %s1942_s15, %s1942_s15 }
  0x1b   : > { %p1690_p4 = scmp.lt.s32.totalorder %s1688_s21, %s1681_s19 }
  0x1c   : > { %p1684_p13 = pnand %p1682_p12, %p1970_p7 }
  0x1d   : > { %p1691_p6 = por %p1690_p4, %p1689_p1 }
  0x1e   : > { %p1685_p0 = pneg %p1684_p13 }
  0x20   : > { %p1692_p8 = pnand %p1691_p6, %p1685_p0 }
  0x22   : > { %1695 = shalt.err (!%p1692_p8)
}
  0x23   : > { %1576 = dma.hbm_to_vmem [thread:$0]  (!%p1954_p5), %s2429_s4, 16, %s1942_s15, [#allocation5]  }
  0x24   : > { %s1696_s29 = scalar_lea.hbm %s2431_s6, 16 }
  0x25   : > { %p1697_p9 = scmp.ne.s32.totalorder %s2431_s6, %s1696_s29  ;;  %p1703_p12 = scmp.lt.u32.totalorder %s1696_s29, %s2431_s6 }
  0x27   : > { %p1699_p10 = pnand %p1697_p9, %p1970_p7 }
  0x29   : > { %p1700_p11 = pneg %p1699_p10 }
  0x2b   : > { %p1705_p13 = pnand %p1703_p12, %p1700_p11 }
  0x2d   : > { %1708 = shalt.err (!%p1705_p13)
}
  0x2e   : > { %s1709_s15 = scalar_lea.vmem %s1950_s20, 16  ;;  %s1716_s21 = scalar_lea.vmem %s1950_s20, 32 }
  0x2f   : > { %p1710_p0 = scmp.ne.s32.totalorder %s1950_s20, %s1709_s15  ;;  %p1717_p6 = scmp.lt.s32.totalorder %s1950_s20, %s1950_s20 }
  0x30   : > { %p1718_p8 = scmp.lt.s32.totalorder %s1716_s21, %s1709_s15 }
  0x31   : > { %p1712_p1 = pnand %p1710_p0, %p1970_p7 }
  0x32   : > { %p1719_p9 = por %p1718_p8, %p1717_p6 }
  0x33   : > { %p1713_p4 = pneg %p1712_p1 }
  0x35   : > { %p1720_p10 = pnand %p1719_p9, %p1713_p4 }
  0x37   : > { %1723 = shalt.err (!%p1720_p10)
}
  0x38   : > { %1582 = dma.hbm_to_vmem [thread:$0]  (!%p1954_p5), %s2431_s6, 16, %s1950_s20, [#allocation8]  }
  0x39   : > { %s1724_s29 = scalar_lea.hbm %s2428_s3, 256 }
  0x3a   : > { %p1725_p11 = scmp.ne.s32.totalorder %s2428_s3, %s1724_s29  ;;  %p1731_p0 = scmp.lt.u32.totalorder %s1724_s29, %s2428_s3 }
  0x3c   : > { %p1727_p12 = pnand %p1725_p11, %p1970_p7 }
  0x3e   : > { %p1728_p13 = pneg %p1727_p12 }
  0x40   : > { %p1733_p1 = pnand %p1731_p0, %p1728_p13 }
  0x42   : > { %1736 = shalt.err (!%p1733_p1)
}
  0x43   : > { %s1737_s20 = scalar_lea.vmem %s1958_s22, 256  ;;  %p1745_p9 = scmp.lt.s32.totalorder %s1958_s22, %s1958_s22 }
  0x44   : > { %p1738_p4 = scmp.ne.s32.totalorder %s1958_s22, %s1737_s20  ;;  %p1746_p10 = scmp.lt.s32.totalorder %s1737_s20, %s1737_s20 }
  0x46   : > { %p1740_p6 = pnand %p1738_p4, %p1970_p7  ;;  %p1747_p11 = por %p1746_p10, %p1745_p9 }
  0x48   : > { %p1741_p8 = pneg %p1740_p6 }
  0x4a   : > { %p1748_p12 = pnand %p1747_p11, %p1741_p8 }
  0x4c   : > { %1751 = shalt.err (!%p1748_p12)
}
  0x4d   : > { %s1864_s15 = smov 64   ;;  %s1865_s21 = smov 4  }
  0x4e   : > { %1573 = dma.hbm_to_vmem [thread:$0]  (!%p1954_p5), %s2428_s3, 256, %s1958_s22, [#allocation3], %s1864_s15, %s1864_s15, %s1865_s21  }
  0x4f   : > { %s1752_s29 = scalar_lea.hbm %s2430_s5, 256 }
  0x50   : > { %p1753_p13 = scmp.ne.s32.totalorder %s2430_s5, %s1752_s29  ;;  %p1759_p4 = scmp.lt.u32.totalorder %s1752_s29, %s2430_s5 }
  0x52   : > { %p1755_p0 = pnand %p1753_p13, %p1970_p7 }
  0x54   : > { %p1756_p1 = pneg %p1755_p0 }
  0x56   : > { %p1761_p6 = pnand %p1759_p4, %p1756_p1 }
  0x58   : > { %1764 = shalt.err (!%p1761_p6)
}
  0x59   : > { %s1765_s20 = scalar_lea.vmem %s323_s25, 256  ;;  %p1773_p11 = scmp.lt.s32.totalorder %s323_s25, %s323_s25 }
  0x5a   : > { %p1766_p8 = scmp.ne.s32.totalorder %s323_s25, %s1765_s20  ;;  %p1774_p12 = scmp.lt.s32.totalorder %s1765_s20, %s1765_s20 }
  0x5c   : > { %p1768_p9 = pnand %p1766_p8, %p1970_p7  ;;  %p1775_p2 = por %p1774_p12, %p1773_p11 }
  0x5e   : > { %p1769_p10 = pneg %p1768_p9 }
  0x60   : > { %p1776_p3 = pnand %p1775_p2, %p1769_p10 }
  0x62   : > { %1779 = shalt.err (!%p1776_p3)
}
  0x63   : > { %1579 = dma.hbm_to_vmem [thread:$0]  (!%p1954_p5), %s2430_s5, 256, %s323_s25, [#allocation5], %s1864_s15, %s1864_s15, %s1865_s21  }
  0x64   : > { %s1866_s26 = smov [#allocation9]   ;;  %s1780_s30 = scalar_lea.hbm %s2432_s7, 2048 }
  0x65   : > { %s346_s27 = sshll.u32 %s1866_s26, 4  ;;  %p1781_p13 = scmp.ne.s32.totalorder %s2432_s7, %s1780_s30  ;;  %s347_s27 = int_to_ptr.vmem [resolvable:$true] %s346_s27 }
  0x66   : > { %p1787_p0 = scmp.lt.u32.totalorder %s1780_s30, %s2432_s7 }
  0x67   : > { %p1783_p2 = pnand %p1781_p13, %p1970_p7 }
  0x69   : > { %p1784_p3 = pneg %p1783_p2 }
  0x6b   : > { %p1789_p1 = pnand %p1787_p0, %p1784_p3 }
  0x6d   : > { %1792 = shalt.err (!%p1789_p1)
}
  0x6e   : > { %s1793_s25 = scalar_lea.vmem %s347_s27, 2048  ;;  %p1801_p9 = scmp.lt.s32.totalorder %s347_s27, %s347_s27 }
  0x6f   : > { %p1794_p4 = scmp.ne.s32.totalorder %s347_s27, %s1793_s25  ;;  %p1802_p10 = scmp.lt.s32.totalorder %s1793_s25, %s1793_s25 }
  0x71   : > { %p1796_p6 = pnand %p1794_p4, %p1970_p7  ;;  %p1803_p11 = por %p1802_p10, %p1801_p9 }
  0x73   : > { %p1797_p8 = pneg %p1796_p6 }
  0x75   : > { %p1804_p12 = pnand %p1803_p11, %p1797_p8 }
  0x77   : > { %1807 = shalt.err (!%p1804_p12)
}
  0x78   : > { %s1867_s15 = smov 128   ;;  %s1868_s21 = smov 8  }
  0x79   : > { %1585 = dma.hbm_to_vmem [thread:$0]  (!%p1954_p5), %s2432_s7, 2048, %s347_s27, [#allocation8], %s1867_s15, %s1867_s15, %s1868_s21  }
  0x7a   : > { %s1869_s26 = smov [#allocation10]   ;;  %s1808_s12 = scalar_lea.hbm %s2433_s8, 16 }
  0x7b   : > { %s360_s28 = sshll.u32 %s1869_s26, 4  ;;  %p1809_p13 = scmp.ne.s32.totalorder %s2433_s8, %s1808_s12  ;;  %s361_s28 = int_to_ptr.vmem [resolvable:$true] %s360_s28 }
  0x7c   : > { %p1815_p0 = scmp.lt.u32.totalorder %s1808_s12, %s2433_s8 }
  0x7d   : > { %p1811_p2 = pnand %p1809_p13, %p1970_p7 }
  0x7f   : > { %p1812_p3 = pneg %p1811_p2 }
  0x81   : > { %p1817_p1 = pnand %p1815_p0, %p1812_p3 }
  0x83   : > { %1820 = shalt.err (!%p1817_p1)
}
  0x84   : > { %s1821_s27 = scalar_lea.vmem %s361_s28, 16  ;;  %s1828_s15 = scalar_lea.vmem %s361_s28, 32 }
  0x85   : > { %p1822_p4 = scmp.ne.s32.totalorder %s361_s28, %s1821_s27  ;;  %p1829_p9 = scmp.lt.s32.totalorder %s361_s28, %s361_s28 }
  0x86   : > { %p1830_p10 = scmp.lt.s32.totalorder %s1828_s15, %s1821_s27 }
  0x87   : > { %p1824_p6 = pnand %p1822_p4, %p1970_p7 }
  0x88   : > { %p1831_p11 = por %p1830_p10, %p1829_p9 }
  0x89   : > { %p1825_p8 = pneg %p1824_p6 }
  0x8b   : > { %p1832_p12 = pnand %p1831_p11, %p1825_p8 }
  0x8d   : > { %1835 = shalt.err (!%p1832_p12)
}
  0x8e   : > { %1588 = dma.hbm_to_vmem [thread:$0]  (!%p1954_p5), %s2433_s8, 16, %s361_s28, [#allocation11]  }
  0x8f   : > { %p2443_p13 = scmp.ne.s32.totalorder %s2440_s18, 0 }
  0x90   : > { %p2444_p2 = scmp.ne.s32.totalorder (!%p2443_p13), %s2439_s17, 0 }
  0x91   : > { %400 = sbr.rel (%p2443_p13) target bundleno = 819 (0x333), region = 56 }
  0x98   : > { %1841 = dma.done.wait (%p2444_p2), [#allocation3], 256  }
  0x99   : > { %1843 = vsyncadd (%p2444_p2), [#allocation3], 4294967040 }
  0x9a   : > { %1845 = dma.done.wait (%p2444_p2), [#allocation5], 272  }
  0x9b   : > { %1847 = vsyncadd (%p2444_p2), [#allocation5], 4294967024 }
  0x9c   : > { %1849 = dma.done.wait (%p2444_p2), [#allocation8], 2064  }
  0x9d   : > { %1851 = vsyncadd (%p2444_p2), [#allocation8], 4294965232 }
  0x9e   : > { %1853 = dma.done.wait (%p2444_p2), [#allocation11], 16  }
  0x9f   : > { %1855 = vsyncadd (%p2444_p2), [#allocation11], 4294967280  ;;  %s473_s18 = smul.u32 10, %s1324_s16  ;;  %v1870_v0 = vmov 0.0   ;;  %vm1871_vm0 = vmmov 0   ;;  %v1624_v1 = vld [vmem:[#allocation2] sm:$0xff]   ;;  %v861_v53 = vlaneseq }
  0xa0   : > { %1542 = vmatprep.subr.bf16.mxu1 %v1870_v0  ;;  %1435 = vmatprep.mubr.msk.bf16.mxu1 %vm1871_vm0, %v1870_v0  ;;  %v1625_v2 = vld [vmem:[#allocation2 + $0x8] sm:$0xff]   ;;  %v1626_v6 = vld [vmem:[#allocation6] sm:$0xff]   ;;  %vm562_vm1 = vcmask 261120   ;;  %v1627_v13 = vld [vmem:[#allocation6 + $0x8] sm:$0xff]   ;;  %v1872_v41 = vmov 0  }
  0xa1   : > { %p474_p5 = scmp.lt.s32.totalorder %s473_s18, 19  ;;  %1415 = vmatprep.subr.bf16.mxu0 %v1870_v0  ;;  %1419 = vmatprep.mubr.msk.bf16.mxu0 %vm1871_vm0, %v1870_v0  ;;  %v962_v43 = vld [vmem:[#allocation9] sm:$0xff]  ;;  %v963_v44 = vld [vmem:[#allocation9 + $0x8] sm:$0xff]  ;;  %v964_v45 = vld [vmem:[#allocation9 + $0x10] sm:$0xff]  ;;  %v862_v55 = vshrl.u32 %v861_v53, 7 }
  0xa2   : > { %1544 = vmatpush3.bf16.msra.mxu1 %v1624_v1  ;;  %1416 = vmatpush3.bf16.msra.mxu0 %v1624_v1  ;;  %v1510_v46 = vpack.c.bf16 %v963_v44, %v962_v43  ;;  %v965_v47 = vld [vmem:[#allocation9 + $0x18] sm:$0xff]  ;;  %v966_v49 = vld [vmem:[#allocation9 + $0x20] sm:$0xff]  ;;  %v967_v50 = vld [vmem:[#allocation9 + $0x28] sm:$0xff] }
  0xa3   : > { %s2446_s18 = smov (!%p474_p5, %s473_s18), 19  ;;  %1543 = vmatprep.subr.bf16.mxu1 %v1870_v0  ;;  %1417 = vmatprep.subr.bf16.mxu0 %v1870_v0  ;;  %v1514_v48 = vpack.c.bf16 %v965_v47, %v964_v45  ;;  %v1518_v51 = vpack.c.bf16 %v967_v50, %v966_v49  ;;  %v2192_v54 = vld [vmem:[#allocation10] sm:$0x1]  ;;  %v2199_v61 = vsub.s32 0, %v862_v55  ;;  %v2201_v63 = vld [vmem:[#allocation7] ss:$0 sm:$0xff] }
  0xa4   : > { %s2120_s23 = sshll.u32 %s2446_s18, 3  ;;  %1623 = vset.pattern.permute.xlu1 %v1872_v41  ;;  %1622 = vset.pattern.permute.xlu0 %v1872_v41  ;;  %v1362_v56 = vadd.f32 -1.0, %v2192_v54  ;;  %v972_v44 = vld [vmem:[#allocation9 + $0x50] sm:$0xff]  ;;  %v973_v45 = vld [vmem:[#allocation9 + $0x58] sm:$0xff]  ;;  %v975_v47 = vld [vmem:[#allocation9 + $0x68] sm:$0xff] }
  0xa5   : > { %s2126_s11 = scalar_lea.vmem %s2425_s0, %s2120_s23  ;;  %s2135_s28 = scalar_lea.vmem %s2426_s1, %s2120_s23 }
  0xa6   : > { %v512_v3 = vld [vmem:[%s2126_s11 + $0x40] sm:$0xff]  ;;  %v513_v4 = vld [vmem:[%s2126_s11 + $0x48] sm:$0xff]  ;;  %1545 = vmatpush3.bf16.msra.mxu1 %v1625_v2  ;;  %1418 = vmatpush3.bf16.msra.mxu0 %v1625_v2  ;;  %v506_v15 = vld [vmem:[%s2126_s11 + $0x10] sm:$0xff]  ;;  %v859_v62 = vmul.f32 1e+30, %v1362_v56  ;;  %s489_s12 = scalar_lea.vmem %s2427_s2, %s2120_s23  ;;  %s2315_s20 = scalar_lea.vmem %s2434_s9, %s2120_s23 }
  0xa7   : > { %v538_v5 = vpack.c.bf16 %v513_v4, %v512_v3  ;;  %v504_v7 = vld [vmem:[%s2126_s11] sm:$0xff]  ;;  %v505_v8 = vld [vmem:[%s2126_s11 + $0x8] sm:$0xff]  ;;  %1439 = vmatprep.subr.bf16.mxu1 %v1870_v0  ;;  %v507_v16 = vld [vmem:[%s2126_s11 + $0x18] sm:$0xff]  ;;  %1511 = vmatprep.subr.bf16.mxu0 %v1510_v46  ;;  %s2379_s15 = scalar_lea.vmem %s2435_s10, %s2120_s23 }
  0xa8   : > { %v514_v9 = vld [vmem:[%s2135_s28] sm:$0xff]  ;;  %v515_v10 = vld [vmem:[%s2135_s28 + $0x8] sm:$0xff]  ;;  %v516_v17 = vld [vmem:[%s2135_s28 + $0x10] sm:$0xff]  ;;  %v534_v42 = vpack.c.bf16 %v505_v8, %v504_v7  ;;  %v535_v52 = vpack.c.bf16 %v507_v16, %v506_v15  ;;  %v2204_v1 = vrot.slane %v859_v62, %v2199_v61 }
  0xa9   : > { %1436 = vmatmul.mubr.msk.bf16.vlgmr.msra.gmra.mrb[0].mxu1 %vm562_vm1, %v538_v5  ;;  %v524_v11 = vadd.f32 %v514_v9, %v504_v7  ;;  %v525_v12 = vadd.f32 %v515_v10, %v505_v8  ;;  %v517_v18 = vld [vmem:[%s2135_s28 + $0x18] sm:$0xff]  ;;  %v526_v19 = vadd.f32 %v516_v17, %v506_v15  ;;  %v2155_v22 = vld [vmem:[%s2126_s11 + $0x20] sm:$0xff]  ;;  %v2158_v23 = vld [vmem:[%s2126_s11 + $0x28] sm:$0xff] }
  0xaa   : > { %1440 = vmatpush3.bf16.msra.mxu1 %v1626_v6  ;;  %1443 = vmatprep.mubr.msk.bf16.mxu1 %vm1871_vm0, %v1870_v0  ;;  %v527_v20 = vadd.f32 %v517_v18, %v507_v16  ;;  %v518_v24 = vld [vmem:[%s2135_s28 + $0x20] sm:$0xff]  ;;  %v519_v25 = vld [vmem:[%s2135_s28 + $0x28] sm:$0xff]  ;;  %v2168_v29 = vld [vmem:[%s2126_s11 + $0x30] sm:$0xff] }
  0xab   : > { %1441 = vmatprep.subr.bf16.mxu1 %v1870_v0  ;;  %v741_v14 = vpack.c.bf16 %v525_v12, %v524_v11  ;;  %v528_v26 = vadd.f32 %v518_v24, %v2155_v22  ;;  %v529_v27 = vadd.f32 %v519_v25, %v2158_v23  ;;  %v2171_v30 = vld [vmem:[%s2126_s11 + $0x38] sm:$0xff]  ;;  %v520_v31 = vld [vmem:[%s2135_s28 + $0x30] sm:$0xff]  ;;  %v522_v36 = vld [vmem:[%s2135_s28 + $0x40] sm:$0xff]  ;;  %1420 = vmatmul.mubr.msk.bf16.vlgmr.msra.gmra.mrb[0].mxu0 %vm562_vm1, %v534_v42 }
  0xac   : > { %v742_v21 = vpack.c.bf16 %v527_v20, %v526_v19  ;;  %v521_v32 = vld [vmem:[%s2135_s28 + $0x38] sm:$0xff]  ;;  %v530_v33 = vadd.f32 %v520_v31, %v2168_v29  ;;  %v523_v37 = vld [vmem:[%s2135_s28 + $0x48] sm:$0xff]  ;;  %v532_v38 = vadd.f32 %v522_v36, %v512_v3  ;;  %1423 = vmatprep.mubr.msk.bf16.mxu0 %vm1871_vm0, %v1870_v0  ;;  %1513 = vmatpush3.bf16.msra.mxu0 %v1510_v46 }
  0xad   : > { %v743_v28 = vpack.c.bf16 %v529_v27, %v528_v26  ;;  %v531_v34 = vadd.f32 %v521_v32, %v2171_v30  ;;  %v533_v39 = vadd.f32 %v523_v37, %v513_v4  ;;  %1515 = vmatprep.subr.bf16.mxu0 %v1514_v48  ;;  %v968_v27 = vld [vmem:[#allocation9 + $0x30] sm:$0xff]  ;;  %v536_v36 = vpack.c.bf16 %v2158_v23, %v2155_v22  ;;  %v974_v46 = vld [vmem:[#allocation9 + $0x60] sm:$0xff] }
  0xae   : > { %1442 = vmatpush3.bf16.msra.mxu1 %v1627_v13  ;;  %v1530_v22 = vpack.c.bf16 %v973_v45, %v972_v44  ;;  %v537_v49 = vpack.c.bf16 %v2171_v30, %v2168_v29  ;;  %v1534_v50 = vpack.c.bf16 %v975_v47, %v974_v46  ;;  %v977_v29 = vld [vmem:[#allocation9 + $0x78] sm:$0xff]  ;;  %v652_v62 = vld [vmem:[%s489_s12 + $0x8] sm:$0xff]  ;;  %v2274_v45 = vrot.slane %v2192_v54, %v2199_v61 }
  0xaf   : > { %v744_v35 = vpack.c.bf16 %v531_v34, %v530_v33  ;;  %v745_v40 = vpack.c.bf16 %v533_v39, %v532_v38  ;;  %v970_v33 = vld [vmem:[#allocation9 + $0x40] sm:$0xff]  ;;  %v971_v34 = vld [vmem:[#allocation9 + $0x48] sm:$0xff] }
  0xb0   : > { %1517 = vmatpush3.bf16.msra.mxu0 %v1514_v48  ;;  %v1526_v37 = vpack.c.bf16 %v971_v34, %v970_v33 }
  0xb1   : > { %1444 = vmatmul.mubr.msk.bf16.vlgmr.msra.gmra.mrb[4].mxu1 %vm562_vm1, %v741_v14  ;;  %1519 = vmatprep.subr.bf16.mxu0 %v1518_v51 }
  0xb2   : > { %1447 = vmatprep.mubr.msk.bf16.mxu1 %vm1871_vm0, %v1870_v0 }
  0xb3   : > { %1424 = vmatmul.mubr.msk.bf16.gmra.mrb[4].mxu0 %vm562_vm1, %v535_v52 }
  0xb4   : > { %1427 = vmatprep.mubr.msk.bf16.mxu0 %vm1871_vm0, %v1870_v0  ;;  %1521 = vmatpush3.bf16.msra.mxu0 %v1518_v51 }
  0xb9   : > { %1448 = vmatmul.mubr.msk.bf16.gmra.mrb[8].mxu1 %vm562_vm1, %v742_v21 }
  0xba   : > { %1451 = vmatprep.mubr.msk.bf16.mxu1 %vm1871_vm0, %v1870_v0 }
  0xbb   : > { %1428 = vmatmul.mubr.msk.bf16.gmra.mrb[8].mxu0 %vm562_vm1, %v536_v36 }
  0xbc   : > { %1431 = vmatprep.mubr.msk.bf16.mxu0 %vm1871_vm0, %v1870_v0 }
  0xc1   : > { %1452 = vmatmul.mubr.msk.bf16.gmra.mrb[12].mxu1 %vm562_vm1, %v743_v28  ;;  %v969_v28 = vld [vmem:[#allocation9 + $0x38] sm:$0xff] }
  0xc2   : > { %1455 = vmatprep.mubr.msk.bf16.mxu1 %vm1871_vm0, %v1870_v0  ;;  %v1522_v31 = vpack.c.bf16 %v969_v28, %v968_v27 }
  0xc3   : > { %1432 = vmatmul.mubr.msk.bf16.gmra.mrb[12].mxu0 %vm562_vm1, %v537_v49 }
  0xc4   : > { %1523 = vmatprep.subr.bf16.mxu0 %v1522_v31 }
  0xc5   : > { %1525 = vmatpush3.bf16.msra.mxu0 %v1522_v31 }
  0xc6   : > { %1527 = vmatprep.subr.bf16.mxu0 %v1526_v37 }
  0xc9   : > { %1456 = vmatmul.mubr.msk.bf16.gmra.mrb[16].mxu1 %vm562_vm1, %v744_v35  ;;  %1529 = vmatpush3.bf16.msra.mxu0 %v1526_v37 }
  0xca   : > { %1459 = vmatprep.mubr.msk.bf16.mxu1 %vm1871_vm0, %v1870_v0  ;;  %1531 = vmatprep.subr.bf16.mxu0 %v1530_v22 }
  0xcd   : > { %1533 = vmatpush3.bf16.msra.mxu0 %v1530_v22 }
  0xce   : > { %1535 = vmatprep.subr.bf16.mxu0 %v1534_v50 }
  0xd1   : > { %1460 = vmatmul.mubr.msk.bf16.gmra.mrb[20].mxu1 %vm562_vm1, %v745_v40  ;;  %1537 = vmatpush3.bf16.msra.mxu0 %v1534_v50 }
 0x17c   : > { %v2195_v57 = vpop.f32.mrb[0].mxu1 }
 0x17d   : > { %v1437_v58 = vpop.f32.mrb[1].mxu1 }
 0x17e   : > { %v2197_v59 = vpop.f32.mrb[2].mxu1  ;;  %v976_v58 = vld [vmem:[#allocation9 + $0x70] sm:$0xff] }
 0x17f   : > { %v1438_v60 = vpop.f32.mrb[3].mxu1  ;;  %v1538_v30 = vpack.c.bf16 %v977_v29, %v976_v58 }
 0x181   : > { %1539 = vmatprep.subr.bf16.mxu0 %v1538_v30 }
 0x182   : > { %1541 = vmatpush3.bf16.msra.mxu0 %v1538_v30 }
 0x184   : > { %v818_v2 = vpop.f32.mrb[4].mxu1 }
 0x185   : > { %v2207_v3 = vadd.f32 %v2201_v63, %v818_v2  ;;  %v1445_v4 = vpop.f32.mrb[5].mxu1  ;;  %v651_v2 = vld [vmem:[%s489_s12] sm:$0xff] }
 0x186   : > { %v821_v5 = vpop.f32.mrb[6].mxu1  ;;  %v653_v4 = vld [vmem:[%s489_s12 + $0x10] sm:$0xff] }
 0x187   : > { %v2210_v6 = vadd.f32 %v2201_v63, %v821_v5  ;;  %v1446_v7 = vpop.f32.mrb[7].mxu1  ;;  %v866_v8 = vadd.f32 %v2204_v1, %v2207_v3  ;;  %v661_v5 = vsub.f32 1.0, %v651_v2 }
 0x188   : > { %v663_v7 = vsub.f32 1.0, %v653_v4 }
 0x189   : > { %876 = vmax.xlane.f32.xlu0 %v866_v8  ;;  %v867_v9 = vadd.f32 %v2204_v1, %v2210_v6  ;;  %v660_v8 = vld [vmem:[%s489_s12 + $0x48] sm:$0xff] }
 0x18c   : > { %v826_v10 = vpop.f32.mrb[8].mxu1 }
 0x18d   : > { %v2217_v11 = vadd.f32 %v2201_v63, %v826_v10  ;;  %878 = vmax.xlane.f32.xlu0 %v867_v9  ;;  %v1449_v12 = vpop.f32.mrb[9].mxu1  ;;  %v654_v9 = vld [vmem:[%s489_s12 + $0x18] sm:$0xff]  ;;  %v670_v10 = vsub.f32 1.0, %v660_v8 }
 0x18e   : > { %v829_v13 = vpop.f32.mrb[10].mxu1  ;;  %v655_v12 = vld [vmem:[%s489_s12 + $0x20] sm:$0xff] }
 0x18f   : > { %v2220_v14 = vadd.f32 %v2201_v63, %v829_v13  ;;  %v1450_v15 = vpop.f32.mrb[11].mxu1  ;;  %v868_v16 = vadd.f32 %v2204_v1, %v2217_v11  ;;  %v665_v13 = vsub.f32 1.0, %v655_v12 }
 0x190   : > { %v656_v15 = vld [vmem:[%s489_s12 + $0x28] sm:$0xff] }
 0x191   : > { %880 = vmax.xlane.f32.xlu1 %v868_v16  ;;  %v869_v17 = vadd.f32 %v2204_v1, %v2220_v14  ;;  %v666_v16 = vsub.f32 1.0, %v656_v15 }
 0x194   : > { %v834_v18 = vpop.f32.mrb[12].mxu1 }
 0x195   : > { %v2227_v19 = vadd.f32 %v2201_v63, %v834_v18  ;;  %882 = vmax.xlane.f32.xlu1 %v869_v17  ;;  %v1453_v20 = vpop.f32.mrb[13].mxu1  ;;  %v657_v17 = vld [vmem:[%s489_s12 + $0x30] sm:$0xff] }
 0x196   : > { %v837_v21 = vpop.f32.mrb[14].mxu1  ;;  %v667_v18 = vsub.f32 1.0, %v657_v17  ;;  %v658_v20 = vld [vmem:[%s489_s12 + $0x38] sm:$0xff] }
 0x197   : > { %v2230_v24 = vadd.f32 %v2201_v63, %v837_v21  ;;  %v1454_v25 = vpop.f32.mrb[15].mxu1  ;;  %v870_v26 = vadd.f32 %v2204_v1, %v2227_v19  ;;  %v668_v21 = vsub.f32 1.0, %v658_v20 }
 0x198   : > { %v659_v25 = vld [vmem:[%s489_s12 + $0x40] sm:$0xff] }
 0x199   : > { %884 = vmax.xlane.f32.xlu0 %v870_v26  ;;  %v871_v32 = vadd.f32 %v2204_v1, %v2230_v24  ;;  %v669_v26 = vsub.f32 1.0, %v659_v25 }
 0x19b   : > { %886 = vmax.xlane.f32.xlu1 %v871_v32 }
 0x19c   : > { %v842_v35 = vpop.f32.mrb[16].mxu1 }
 0x19d   : > { %v2239_v38 = vadd.f32 %v2201_v63, %v842_v35  ;;  %v1457_v39 = vpop.f32.mrb[17].mxu1 }
 0x19e   : > { %v845_v40 = vpop.f32.mrb[18].mxu1 }
 0x19f   : > { %v2243_v41 = vadd.f32 %v2201_v63, %v845_v40  ;;  %v1458_v42 = vpop.f32.mrb[19].mxu1  ;;  %v872_v43 = vadd.f32 %v2204_v1, %v2239_v38 }
 0x1a1   : > { %888 = vmax.xlane.f32.xlu0 %v872_v43  ;;  %v873_v23 = vadd.f32 %v2204_v1, %v2243_v41 }
 0x1a3   : > { %890 = vmax.xlane.f32.xlu1 %v873_v23 }
 0x1a4   : > { %v850_v48 = vpop.f32.mrb[20].mxu1 }
 0x1a5   : > { %v2254_v51 = vadd.f32 %v2201_v63, %v850_v48  ;;  %v1461_v52 = vpop.f32.mrb[21].mxu1 }
 0x1a6   : > { %v853_v0 = vpop.f32.mrb[22].mxu1 }
 0x1a7   : > { %v2258_v53 = vadd.f32 %v2201_v63, %v853_v0  ;;  %v1462_v55 = vpop.f32.mrb[23].mxu1  ;;  %v874_v56 = vadd.f32 %v2204_v1, %v2254_v51  ;;  %v662_v63 = vsub.f32 1.0, %v652_v62 }
 0x1a9   : > { %892 = vmax.xlane.f32.xlu0 %v874_v56  ;;  %v875_v60 = vadd.f32 %v2204_v1, %v2258_v53  ;;  %v664_v1 = vsub.f32 1.0, %v654_v9 }
 0x1ab   : > { %894 = vmax.xlane.f32.xlu1 %v875_v60  ;;  %v612_v60 = vpop.f32.mrb[0].mxu0 }
 0x1bc   : > { %678 = vperm.xlu1 %1623, %v662_v63   ;;  %v1421_v63 = vpop.f32.mrb[1].mxu0 }
 0x1bf   : > { %673 = vperm.xlu0 %1622, %v661_v5   ;;  %v615_v5 = vpop.f32.mrb[2].mxu0 }
 0x1c0   : > { %683 = vperm.xlu1 %1623, %v663_v7   ;;  %v1422_v9 = vpop.f32.mrb[3].mxu0 }
 0x1c3   : > { %718 = vperm.xlu0 %1622, %v670_v10  }
 0x1c4   : > { %688 = vperm.xlu1 %1623, %v664_v1  }
 0x1c8   : > { %693 = vperm.xlu1 %1623, %v665_v13  }
 0x1cc   : > { %698 = vperm.xlu1 %1623, %v666_v16  }
 0x1d0   : > { %703 = vperm.xlu1 %1623, %v667_v18   ;;  %v620_v18 = vpop.f32.mrb[4].mxu0 }
 0x1d4   : > { %708 = vperm.xlu1 %1623, %v668_v21   ;;  %v1425_v21 = vpop.f32.mrb[5].mxu0 }
 0x1d8   : > { %713 = vperm.xlu1 %1623, %v669_v26  }
 0x216   : > { %v877_v27 = vpop.xlane.xlu0 %876 }
 0x217   : > { %v896_v28 = vsub.f32 %v2207_v3, %v877_v27  ;;  %v623_v27 = vpop.f32.mrb[6].mxu0 }
 0x219   : > { %v1363_v31 = vclamps-f32 %v896_v28, 80.0  ;;  %v2297_v28 = vld [vmem:[#allocation4] ss:$0 sm:$0xff] }
 0x21a   : > { %v879_v32 = vpop.xlane.xlu0 %878 }
 0x21b   : > { %v926_v33 = vmul.f32 1.442695, %v1363_v31  ;;  %v897_v34 = vsub.f32 %v2210_v6, %v879_v32 }
 0x21d   : > { %1628 = vpow2.f32 %v926_v33  ;;  %v1364_v35 = vclamps-f32 %v897_v34, 80.0  ;;  %v1426_v33 = vpop.f32.mrb[7].mxu0 }
 0x21e   : > { %v881_v36 = vpop.xlane.xlu1 %880 }
 0x21f   : > { %v928_v37 = vmul.f32 1.442695, %v1364_v35  ;;  %v898_v39 = vsub.f32 %v2217_v11, %v881_v36 }
 0x221   : > { %1630 = vpow2.f32 %v928_v37  ;;  %v1365_v40 = vclamps-f32 %v898_v39, 80.0  ;;  %v616_v37 = vadd.f32 %v2297_v28, %v615_v5 }
 0x222   : > { %v883_v42 = vpop.xlane.xlu1 %882 }
 0x223   : > { %v930_v43 = vmul.f32 1.442695, %v1365_v40  ;;  %v899_v44 = vsub.f32 %v2220_v14, %v883_v42 }
 0x225   : > { %1632 = vpow2.f32 %v930_v43  ;;  %v1366_v22 = vclamps-f32 %v899_v44, 80.0  ;;  %v613_v43 = vadd.f32 %v2297_v28, %v612_v60 }
 0x226   : > { %v885_v23 = vpop.xlane.xlu0 %884 }
 0x227   : > { %v1629_v46 = vpop.eup %1628  ;;  %v932_v47 = vmul.f32 1.442695, %v1366_v22  ;;  %v900_v48 = vsub.f32 %v2227_v19, %v885_v23 }
 0x228   : > { %v887_v49 = vpop.xlane.xlu1 %886  ;;  %v2278_v50 = vmul.f32 %v1629_v46, %v2274_v45  ;;  %v621_v46 = vadd.f32 %v2297_v28, %v620_v18 }
 0x229   : > { %1634 = vpow2.f32 %v932_v47  ;;  %v1367_v52 = vclamps-f32 %v900_v48, 80.0  ;;  %v901_v0 = vsub.f32 %v2230_v24, %v887_v49 }
 0x22a   : > { %1495 = vmatprep.mubr.f32.mxu0 %v2278_v50 }
 0x22b   : > { %v1631_v55 = vpop.eup %1630  ;;  %v934_v56 = vmul.f32 1.442695, %v1367_v52  ;;  %v1368_v58 = vclamps-f32 %v901_v0, 80.0 }
 0x22c   : > { %v2283_v29 = vmul.f32 %v1631_v55, %v2274_v45 }
 0x22d   : > { %1636 = vpow2.f32 %v934_v56  ;;  %v936_v30 = vmul.f32 1.442695, %v1368_v58  ;;  %v648_v56 = vadd.f32 %v2297_v28, %v2197_v59 }
 0x22e   : > { %1496 = vmatmul.mubr.f32.vlgmr.msra.gmra.mrb[16].mxu0 %v2283_v29  ;;  %v889_v62 = vpop.xlane.xlu0 %888 }
 0x22f   : > { %v1633_v2 = vpop.eup %1632  ;;  %1638 = vpow2.f32 %v936_v30  ;;  %v902_v4 = vsub.f32 %v2239_v38, %v889_v62  ;;  %v624_v30 = vadd.f32 %v2297_v28, %v623_v27 }
 0x230   : > { %v891_v7 = vpop.xlane.xlu1 %890  ;;  %v2288_v8 = vmul.f32 %v1633_v2, %v2274_v45 }
 0x231   : > { %v1369_v10 = vclamps-f32 %v902_v4, 80.0  ;;  %v903_v1 = vsub.f32 %v2243_v41, %v891_v7 }
 0x232   : > { %1498 = vmatprep.mubr.f32.mxu0 %v2288_v8 }
 0x233   : > { %v1635_v12 = vpop.eup %1634  ;;  %v938_v13 = vmul.f32 1.442695, %v1369_v10  ;;  %v1370_v15 = vclamps-f32 %v903_v1, 80.0 }
 0x234   : > { %v2293_v16 = vmul.f32 %v1635_v12, %v2274_v45 }
 0x235   : > { %1640 = vpow2.f32 %v938_v13  ;;  %v940_v17 = vmul.f32 1.442695, %v1370_v15  ;;  %v645_v15 = vadd.f32 %v2297_v28, %v2195_v57 }
 0x236   : > { %1499 = vmatmul.mubr.f32.gmra.mrb[18].mxu0 %v2293_v16  ;;  %v893_v20 = vpop.xlane.xlu0 %892 }
 0x237   : > { %v1637_v25 = vpop.eup %1636  ;;  %1642 = vpow2.f32 %v940_v17  ;;  %v904_v26 = vsub.f32 %v2254_v51, %v893_v20  ;;  %v628_v20 = vpop.f32.mrb[8].mxu0 }
 0x238   : > { %v895_v31 = vpop.xlane.xlu1 %894  ;;  %v2300_v32 = vmul.f32 %v1637_v25, %v2274_v45  ;;  %v629_v21 = vadd.f32 %v2297_v28, %v628_v20 }
 0x239   : > { %v1639_v34 = vpop.eup %1638  ;;  %v1371_v35 = vclamps-f32 %v904_v26, 80.0  ;;  %v905_v36 = vsub.f32 %v2258_v53, %v895_v31 }
 0x23a   : > { %1501 = vmatprep.mubr.f32.mxu0 %v2300_v32  ;;  %v2306_v39 = vmul.f32 %v1639_v34, %v2274_v45 }
 0x23b   : > { %v942_v40 = vmul.f32 1.442695, %v1371_v35  ;;  %v1372_v42 = vclamps-f32 %v905_v36, 80.0 }
 0x23c   : > { %1502 = vmatmul.mubr.f32.gmra.mrb[20].mxu0 %v2306_v39  ;;  %v679_v44 = vpop.permute.xlu1 %678 }
 0x23d   : > { %1644 = vpow2.f32 %v942_v40  ;;  %v944_v22 = vmul.f32 1.442695, %v1372_v42  ;;  %v722_v23 = vmul.f32 %v679_v44, %v616_v37  ;;  %v978_v44 = vsub.f32 1.0, %v2192_v54 }
 0x23e   : > { %v674_v47 = vpop.permute.xlu0 %673 }
 0x23f   : > { %v1641_v48 = vpop.eup %1640  ;;  %1646 = vpow2.f32 %v944_v22  ;;  %v721_v49 = vmul.f32 %v674_v47, %v613_v43  ;;  %732 = vst.msk [vmem:[%s2315_s20 + $0x8] sm:$0xff] %vm562_vm1, %v722_v23  ;;  %v2364_v22 = vrot.slane %v978_v44, %v2199_v61 }
 0x240   : > { %v684_v52 = vpop.permute.xlu1 %683  ;;  %v2320_v0 = vmul.f32 %v1641_v48, %v2274_v45 }
 0x241   : > { %v1643_v55 = vpop.eup %1642  ;;  %731 = vst.msk [vmem:[%s2315_s20] sm:$0xff] %vm562_vm1, %v721_v49  ;;  %v723_v58 = vmul.f32 %v684_v52, %v621_v46  ;;  %v1129_v44 = vmul.f32 %v2364_v22, %v2258_v53 }
 0x242   : > { %1504 = vmatprep.mubr.f32.mxu0 %v2320_v0  ;;  %v719_v60 = vpop.permute.xlu0 %718  ;;  %v2329_v62 = vmul.f32 %v1643_v55, %v2274_v45 }
 0x243   : > { %v730_v63 = vmul.f32 %v719_v60, %v648_v56  ;;  %733 = vst.msk [vmem:[%s2315_s20 + $0x10] sm:$0xff] %vm562_vm1, %v723_v58  ;;  %v1121_v56 = vmul.f32 %v2364_v22, %v2210_v6  ;;  %v1120_v60 = vmul.f32 %v2364_v22, %v2207_v3 }
 0x244   : > { %1505 = vmatmul.mubr.f32.gmra.mrb[22].mxu0 %v2329_v62  ;;  %v689_v2 = vpop.permute.xlu1 %688 }
 0x245   : > { %740 = vst.msk [vmem:[%s2315_s20 + $0x48] sm:$0xff] %vm562_vm1, %v730_v63  ;;  %v724_v59 = vmul.f32 %v689_v2, %v624_v30 }
 0x247   : > { %v1645_v4 = vpop.eup %1644  ;;  %734 = vst.msk [vmem:[%s2315_s20 + $0x18] sm:$0xff] %vm562_vm1, %v724_v59 }
 0x248   : > { %v694_v5 = vpop.permute.xlu1 %693  ;;  %v2339_v7 = vmul.f32 %v1645_v4, %v2274_v45 }
 0x249   : > { %v1647_v9 = vpop.eup %1646  ;;  %v725_v26 = vmul.f32 %v694_v5, %v629_v21 }
 0x24a   : > { %1507 = vmatprep.mubr.f32.mxu0 %v2339_v7  ;;  %v2343_v10 = vmul.f32 %v1647_v9, %v2274_v45  ;;  %v1429_v45 = vpop.f32.mrb[9].mxu0  ;;  %v1123_v9 = vmul.f32 %v2364_v22, %v2220_v14 }
 0x24b   : > { %v631_v25 = vpop.f32.mrb[10].mxu0  ;;  %735 = vst.msk [vmem:[%s2315_s20 + $0x20] sm:$0xff] %vm562_vm1, %v725_v26  ;;  %v1124_v45 = vmul.f32 %v2364_v22, %v2227_v19  ;;  %v1127_v19 = vmul.f32 %v2364_v22, %v2243_v41 }
 0x24c   : > { %1508 = vmatmul.mubr.f32.gmra.mrb[24].mxu0 %v2343_v10  ;;  %v699_v1 = vpop.permute.xlu1 %698  ;;  %v632_v27 = vadd.f32 %v2297_v28, %v631_v25  ;;  %v1430_v31 = vpop.f32.mrb[11].mxu0 }
 0x24d   : > { %v636_v57 = vpop.f32.mrb[12].mxu0 }
 0x24e   : > { %v726_v33 = vmul.f32 %v699_v1, %v632_v27  ;;  %v637_v34 = vadd.f32 %v2297_v28, %v636_v57  ;;  %v1433_v35 = vpop.f32.mrb[13].mxu0 }
 0x24f   : > { %v639_v36 = vpop.f32.mrb[14].mxu0  ;;  %v1126_v35 = vmul.f32 %v2364_v22, %v2239_v38 }
 0x250   : > { %v704_v12 = vpop.permute.xlu1 %703  ;;  %736 = vst.msk [vmem:[%s2315_s20 + $0x28] sm:$0xff] %vm562_vm1, %v726_v33  ;;  %v640_v40 = vadd.f32 %v2297_v28, %v639_v36  ;;  %v1434_v42 = vpop.f32.mrb[15].mxu0 }
 0x251   : > { %v727_v37 = vmul.f32 %v704_v12, %v637_v34  ;;  %v1122_v12 = vmul.f32 %v2364_v22, %v2217_v11  ;;  %v1125_v11 = vmul.f32 %v2364_v22, %v2230_v24 }
 0x253   : > { %737 = vst.msk [vmem:[%s2315_s20 + $0x30] sm:$0xff] %vm562_vm1, %v727_v37 }
 0x254   : > { %v709_v13 = vpop.permute.xlu1 %708 }
 0x255   : > { %v728_v43 = vmul.f32 %v709_v13, %v640_v40 }
 0x257   : > { %738 = vst.msk [vmem:[%s2315_s20 + $0x38] sm:$0xff] %vm562_vm1, %v728_v43 }
 0x258   : > { %v714_v17 = vpop.permute.xlu1 %713 }
 0x259   : > { %v729_v18 = vmul.f32 %v714_v17, %v645_v15 }
 0x25b   : > { %739 = vst.msk [vmem:[%s2315_s20 + $0x40] sm:$0xff] %vm562_vm1, %v729_v18 }
 0x301   : > { %v1497_v23 = vpop.f32.mrb[16].mxu0 }
 0x302   : > { %v1057_v46 = vadd.f32 %v1497_v23, %v2364_v22  ;;  %v1051_v47 = vpop.f32.mrb[17].mxu0 }
 0x303   : > { %v1052_v48 = vadd.f32 %v1051_v47, %v2364_v22 }
 0x304   : > { %1648 = vrcp.f32 %v1057_v46 }
 0x305   : > { %1650 = vrcp.f32 %v1052_v48 }
 0x309   : > { %v1500_v28 = vpop.f32.mrb[18].mxu0 }
 0x30a   : > { %v1067_v49 = vadd.f32 %v1500_v28, %v2364_v22  ;;  %v1061_v52 = vpop.f32.mrb[19].mxu0 }
 0x30b   : > { %v1062_v55 = vadd.f32 %v1061_v52, %v2364_v22 }
 0x30c   : > { %1652 = vrcp.f32 %v1067_v49 }
 0x30d   : > { %1654 = vrcp.f32 %v1062_v55 }
 0x30e   : > { %v1649_v54 = vpop.eup %1648 }
 0x30f   : > { %v1651_v61 = vpop.eup %1650  ;;  %v1103_v58 = vmul.f32 %v1649_v54, %v2283_v29  ;;  %v1503_v30 = vpop.f32.mrb[20].mxu0 }
 0x310   : > { %v1101_v63 = vmul.f32 %v1651_v61, %v2278_v50  ;;  %v1077_v2 = vadd.f32 %v1503_v30, %v2364_v22  ;;  %v1071_v59 = vpop.f32.mrb[21].mxu0 }
 0x311   : > { %v1131_v4 = vadd.f32 %v1121_v56, %v1103_v58  ;;  %v1072_v6 = vadd.f32 %v1071_v59, %v2364_v22 }
 0x312   : > { %v1130_v29 = vadd.f32 %v1120_v60, %v1101_v63  ;;  %1656 = vrcp.f32 %v1077_v2 }
 0x313   : > { %1141 = vst [vmem:[%s2379_s15 + $0x8] sm:$0xff] %v1131_v4  ;;  %1658 = vrcp.f32 %v1072_v6 }
 0x314   : > { %1140 = vst [vmem:[%s2379_s15] sm:$0xff] %v1130_v29 }
 0x316   : > { %v1653_v3 = vpop.eup %1652 }
 0x317   : > { %v1655_v5 = vpop.eup %1654  ;;  %v1107_v50 = vmul.f32 %v1653_v3, %v2293_v16  ;;  %v1506_v1 = vpop.f32.mrb[22].mxu0 }
 0x318   : > { %v1105_v13 = vmul.f32 %v1655_v5, %v2288_v8  ;;  %v1087_v15 = vadd.f32 %v1506_v1, %v2364_v22  ;;  %v1081_v17 = vpop.f32.mrb[23].mxu0 }
 0x319   : > { %v1133_v18 = vadd.f32 %v1123_v9, %v1107_v50  ;;  %v1082_v20 = vadd.f32 %v1081_v17, %v2364_v22 }
 0x31a   : > { %v1132_v21 = vadd.f32 %v1122_v12, %v1105_v13  ;;  %1660 = vrcp.f32 %v1087_v15 }
 0x31b   : > { %1143 = vst [vmem:[%s2379_s15 + $0x18] sm:$0xff] %v1133_v18  ;;  %1662 = vrcp.f32 %v1082_v20 }
 0x31c   : > { %v1657_v14 = vpop.eup %1656  ;;  %1142 = vst [vmem:[%s2379_s15 + $0x10] sm:$0xff] %v1132_v21 }
 0x31d   : > { %v1659_v16 = vpop.eup %1658  ;;  %v1111_v8 = vmul.f32 %v1657_v14, %v2306_v39 }
 0x31e   : > { %v1109_v25 = vmul.f32 %v1659_v16, %v2300_v32 }
 0x31f   : > { %v1135_v26 = vadd.f32 %v1125_v11, %v1111_v8  ;;  %v1509_v27 = vpop.f32.mrb[24].mxu0 }
 0x320   : > { %v1134_v31 = vadd.f32 %v1124_v45, %v1109_v25  ;;  %v1097_v33 = vadd.f32 %v1509_v27, %v2364_v22  ;;  %v1091_v57 = vpop.f32.mrb[25].mxu0 }
 0x321   : > { %1145 = vst [vmem:[%s2379_s15 + $0x28] sm:$0xff] %v1135_v26  ;;  %v1092_v34 = vadd.f32 %v1091_v57, %v2364_v22 }
 0x322   : > { %1144 = vst [vmem:[%s2379_s15 + $0x20] sm:$0xff] %v1134_v31  ;;  %1664 = vrcp.f32 %v1097_v33 }
 0x323   : > { %1666 = vrcp.f32 %v1092_v34 }
 0x324   : > { %v1661_v24 = vpop.eup %1660 }
 0x325   : > { %v1663_v39 = vpop.eup %1662  ;;  %v1115_v32 = vmul.f32 %v1661_v24, %v2329_v62  ;;  %v1128_v62 = vmul.f32 %v2364_v22, %v2254_v51 }
 0x326   : > { %v1113_v36 = vmul.f32 %v1663_v39, %v2320_v0 }
 0x327   : > { %v1137_v37 = vadd.f32 %v1127_v19, %v1115_v32 }
 0x328   : > { %v1136_v40 = vadd.f32 %v1126_v35, %v1113_v36 }
 0x329   : > { %1147 = vst [vmem:[%s2379_s15 + $0x38] sm:$0xff] %v1137_v37 }
 0x32a   : > { %1146 = vst [vmem:[%s2379_s15 + $0x30] sm:$0xff] %v1136_v40 }
 0x32c   : > { %v1665_v42 = vpop.eup %1664 }
 0x32d   : > { %v1667_v43 = vpop.eup %1666  ;;  %v1119_v41 = vmul.f32 %v1665_v42, %v2343_v10 }
 0x32e   : > { %v1117_v23 = vmul.f32 %v1667_v43, %v2339_v7 }
 0x32f   : > { %v1139_v46 = vadd.f32 %v1129_v44, %v1119_v41 }
 0x330   : > { %v1138_v38 = vadd.f32 %v1128_v62, %v1117_v23 }
 0x331   : > { %1149 = vst [vmem:[%s2379_s15 + $0x48] sm:$0xff] %v1139_v46 }
 0x332   : > { %1148 = vst [vmem:[%s2379_s15 + $0x40] sm:$0xff] %v1138_v38 }
 0x333 PF: > { %s25_s13 = sadd.s32 1, %s1858_s13  }
 0x334   : > { %p22_p7 = scmp.ge.s32.totalorder %s25_s13, 4  }
 0x336   :  { %24 = sbr.rel (!%p22_p7) target bundleno = 4 (0x4), region = 129 }
 0x33d   :  { %1189 = vsyncpa [#allocation3], 1 }
 0x33e   :  { %1191 = vsyncpa [#allocation3 + $0x1], 1 }
 0x33f   :  { %1192 = vsyncpa [#allocation5], 1 }
 0x340   :  { %1193 = vsyncpa [#allocation8], 1 }
 0x341   :  { %1194 = vsyncpa [#allocation11], 1 }

// kernel: _encoder_forward.7
= control target key start
LH: loop header
LB: loop body
LE: loop exit
PB: predicated region body
PF: predicated region fallthrough
CT: control target
= control target key end

     0   :  { %s800_s21 = smov 0   ;;  %s986_s0 = inlined_call_operand.vmem [shape: f32[160,32], index: 0, kind: input, shape index: {}]   ;;  %s987_s1 = inlined_call_operand.vmem [shape: f32[160,32], index: 1, kind: input, shape index: {}]   ;;  %s988_s2 = inlined_call_operand.vmem [shape: bf16[32,32], index: 2, kind: input, shape index: {}]   ;;  %s989_s3 = inlined_call_operand.vmem [shape: f32[1,32], index: 3, kind: input, shape index: {}]   ;;  %s990_s4 = inlined_call_operand.vmem [shape: f32[1,32], index: 4, kind: input, shape index: {}]   ;;  %s991_s5 = inlined_call_operand.vmem [shape: f32[1,32], index: 5, kind: input, shape index: {}]   ;;  %s992_s6 = inlined_call_operand.vmem [shape: f32[160,32], index: 6, kind: output, shape index: {}]  }
   0x1 LB: > { %s668_s22 = sadd.s32 4294967295, %s761_s21   ;;  %p672_p0 = scmp.ge.s32.totalorder %s761_s21, 1  ;;  %s761_s21 = sphi %s800_s21, %s16_s21  }
   0x2   : > { %p224_p1 = scmp.lt.s32.totalorder %s761_s21, 3 }
   0x4   : > { %p225_p2 = pnand %p672_p0, %p224_p1 }
   0x5   : > { %v733_v0 = vld [vmem:[%s988_s2] sm:$0xff] (!%p225_p2)   ;;  %v763_v1 = vmov (!%p225_p2), 0.0   ;;  %v734_v2 = vld [vmem:[%s988_s2 + $0x8] sm:$0xff] (!%p225_p2)   ;;  %s259_s27 = smul.u32 (!%p225_p2), 10, %s668_s22  ;;  %vm764_vm0 = vmmov (!%p225_p2), 0   ;;  %vm316_vm1 = vcmask (!%p225_p2), 261120  }
   0x6   : > { %228 = sbr.rel (%p225_p2) target bundleno = 573 (0x23d), region = 44  ;;  %695 = vmatprep.subr.bf16.mxu0 (!%p225_p2), %v763_v1  ;;  %719 = vmatprep.subr.bf16.mxu1 (!%p225_p2), %v763_v1  ;;  %v676_v18 = vld [vmem:[%s989_s3] ss:$0 sm:$0xff] (!%p225_p2) }
   0x7   : > { %696 = vmatpush3.bf16.msra.mxu0 (!%p225_p2), %v733_v0  ;;  %721 = vmatpush3.bf16.msra.mxu1 (!%p225_p2), %v733_v0  ;;  %p260_p3 = scmp.lt.s32.totalorder (!%p225_p2), %s259_s27, 19 }
   0x8   : > { %697 = vmatprep.subr.bf16.mxu0 (!%p225_p2), %v763_v1  ;;  %720 = vmatprep.subr.bf16.mxu1 (!%p225_p2), %v763_v1 }
   0x9   : > { %699 = vmatprep.mubr.msk.bf16.mxu0 (!%p225_p2), %vm764_vm0, %v763_v1  ;;  %711 = vmatprep.mubr.msk.bf16.mxu1 (!%p225_p2), %vm764_vm0, %v763_v1 }
   0xb   : > { %698 = vmatpush3.bf16.msra.mxu0 (!%p225_p2), %v734_v2  ;;  %722 = vmatpush3.bf16.msra.mxu1 (!%p225_p2), %v734_v2 }
   0xd   : > { %s994_s27 = smov (!%p260_p3, %s259_s27), 19 }
   0xe   : > { %s816_s28 = sshll.u32 %s994_s27, 3 }
   0xf   : > { %s263_s7 = scalar_lea.vmem %s986_s0, %s816_s28  ;;  %s834_s10 = scalar_lea.vmem %s987_s1, %s816_s28 }
  0x10   : > { %v278_v3 = vld [vmem:[%s263_s7] sm:$0xff]  ;;  %v279_v4 = vld [vmem:[%s263_s7 + $0x8] sm:$0xff]  ;;  %v284_v5 = vld [vmem:[%s263_s7 + $0x30] sm:$0xff]  ;;  %s933_s19 = scalar_lea.vmem %s992_s6, %s816_s28 }
  0x11   : > { %v288_v6 = vpack.c.bf16 %v279_v4, %v278_v3  ;;  %v285_v7 = vld [vmem:[%s263_s7 + $0x38] sm:$0xff]  ;;  %v280_v9 = vld [vmem:[%s263_s7 + $0x10] sm:$0xff]  ;;  %v286_v11 = vld [vmem:[%s263_s7 + $0x40] sm:$0xff] }
  0x12   : > { %v291_v8 = vpack.c.bf16 %v285_v7, %v284_v5  ;;  %v281_v10 = vld [vmem:[%s263_s7 + $0x18] sm:$0xff]  ;;  %v287_v12 = vld [vmem:[%s263_s7 + $0x48] sm:$0xff]  ;;  %v282_v15 = vld [vmem:[%s263_s7 + $0x20] sm:$0xff] }
  0x13   : > { %700 = vmatmul.mubr.msk.bf16.vlgmr.msra.gmra.mrb[0].mxu0 %vm316_vm1, %v288_v6  ;;  %v289_v13 = vpack.c.bf16 %v281_v10, %v280_v9  ;;  %v292_v14 = vpack.c.bf16 %v287_v12, %v286_v11  ;;  %v283_v16 = vld [vmem:[%s263_s7 + $0x28] sm:$0xff]  ;;  %v405_v20 = vld [vmem:[%s834_s10] sm:$0xff]  ;;  %v411_v24 = vld [vmem:[%s834_s10 + $0x30] sm:$0xff] }
  0x14   : > { %712 = vmatmul.mubr.msk.bf16.vlgmr.msra.gmra.mrb[0].mxu1 %vm316_vm1, %v291_v8  ;;  %703 = vmatprep.mubr.msk.bf16.mxu0 %vm764_vm0, %v763_v1  ;;  %v290_v17 = vpack.c.bf16 %v283_v16, %v282_v15  ;;  %v412_v31 = vld [vmem:[%s834_s10 + $0x38] sm:$0xff]  ;;  %v406_v38 = vld [vmem:[%s834_s10 + $0x8] sm:$0xff]  ;;  %v407_v42 = vld [vmem:[%s834_s10 + $0x10] sm:$0xff] }
  0x15   : > { %715 = vmatprep.mubr.msk.bf16.mxu1 %vm764_vm0, %v763_v1  ;;  %v408_v48 = vld [vmem:[%s834_s10 + $0x18] sm:$0xff]  ;;  %v409_v60 = vld [vmem:[%s834_s10 + $0x20] sm:$0xff]  ;;  %v410_v3 = vld [vmem:[%s834_s10 + $0x28] sm:$0xff] }
  0x16   : > { %v413_v61 = vld [vmem:[%s834_s10 + $0x40] sm:$0xff]  ;;  %v414_v4 = vld [vmem:[%s834_s10 + $0x48] sm:$0xff] }
  0x1b   : > { %704 = vmatmul.mubr.msk.bf16.gmra.mrb[4].mxu0 %vm316_vm1, %v289_v13 }
  0x1c   : > { %707 = vmatprep.mubr.msk.bf16.mxu0 %vm764_vm0, %v763_v1  ;;  %716 = vmatmul.mubr.msk.bf16.gmra.mrb[4].mxu1 %vm316_vm1, %v292_v14 }
  0x23   : > { %708 = vmatmul.mubr.msk.bf16.gmra.mrb[8].mxu0 %vm316_vm1, %v290_v17 }
  0xe6   : > { %v366_v19 = vpop.f32.mrb[0].mxu0 }
  0xe7   : > { %v367_v21 = vadd.f32 %v676_v18, %v366_v19  ;;  %v390_v22 = vpop.f32.mrb[0].mxu1  ;;  %v701_v23 = vpop.f32.mrb[1].mxu0 }
  0xe8   : > { %v391_v25 = vadd.f32 %v676_v18, %v390_v22  ;;  %v713_v26 = vpop.f32.mrb[1].mxu1  ;;  %v369_v27 = vpop.f32.mrb[2].mxu0 }
  0xe9   : > { %v393_v28 = vpop.f32.mrb[2].mxu1  ;;  %v702_v29 = vpop.f32.mrb[3].mxu0  ;;  %v415_v30 = vadd.f32 %v405_v20, %v367_v21  ;;  %v370_v35 = vadd.f32 %v676_v18, %v369_v27 }
  0xea   : > { %v394_v32 = vadd.f32 %v676_v18, %v393_v28  ;;  %v714_v33 = vpop.f32.mrb[3].mxu1  ;;  %v842_v34 = vadd.f32 %v411_v24, %v391_v25 }
  0xeb   : > { %v425_v36 = vsel %vm316_vm1, %v415_v30, 0.0  ;;  %v416_v45 = vadd.f32 %v406_v38, %v370_v35 }
  0xec   : > { %426 = vadd.xlane.f32.xlu0 %v425_v36  ;;  %v845_v37 = vadd.f32 %v412_v31, %v394_v32  ;;  %v443_v39 = vsel %vm316_vm1, %v842_v34, 0.0 }
  0xed   : > { %v428_v55 = vsel %vm316_vm1, %v416_v45, 0.0 }
  0xee   : > { %v446_v40 = vsel %vm316_vm1, %v845_v37, 0.0  ;;  %v374_v41 = vpop.f32.mrb[4].mxu0 }
  0xef   : > { %447 = vadd.xlane.f32.xlu1 %v446_v40  ;;  %v375_v43 = vadd.f32 %v676_v18, %v374_v41  ;;  %v705_v44 = vpop.f32.mrb[5].mxu0  ;;  %v398_v46 = vpop.f32.mrb[4].mxu1 }
  0xf0   : > { %444 = vadd.xlane.f32.xlu0 %v443_v39  ;;  %v377_v47 = vpop.f32.mrb[6].mxu0  ;;  %v717_v49 = vpop.f32.mrb[5].mxu1  ;;  %v399_v58 = vadd.f32 %v676_v18, %v398_v46 }
  0xf1   : > { %v378_v50 = vadd.f32 %v676_v18, %v377_v47  ;;  %v706_v51 = vpop.f32.mrb[7].mxu0  ;;  %v417_v52 = vadd.f32 %v407_v42, %v375_v43  ;;  %v401_v53 = vpop.f32.mrb[6].mxu1 }
  0xf2   : > { %v718_v54 = vpop.f32.mrb[7].mxu1  ;;  %v402_v1 = vadd.f32 %v676_v18, %v401_v53  ;;  %v423_v8 = vadd.f32 %v413_v61, %v399_v58 }
  0xf3   : > { %v431_v56 = vsel %vm316_vm1, %v417_v52, 0.0  ;;  %v418_v57 = vadd.f32 %v408_v48, %v378_v50 }
  0xf4   : > { %429 = vadd.xlane.f32.xlu0 %v428_v55  ;;  %432 = vadd.xlane.f32.xlu1 %v431_v56  ;;  %v424_v11 = vadd.f32 %v414_v4, %v402_v1  ;;  %v449_v13 = vsel %vm316_vm1, %v423_v8, 0.0 }
  0xf5   : > { %v434_v0 = vsel %vm316_vm1, %v418_v57, 0.0 }
  0xf6   : > { %v382_v59 = vpop.f32.mrb[8].mxu0  ;;  %v452_v14 = vsel %vm316_vm1, %v424_v11, 0.0 }
  0xf7   : > { %v383_v62 = vadd.f32 %v676_v18, %v382_v59  ;;  %v709_v63 = vpop.f32.mrb[9].mxu0 }
  0xf8   : > { %435 = vadd.xlane.f32.xlu1 %v434_v0  ;;  %v385_v2 = vpop.f32.mrb[10].mxu0 }
  0xf9   : > { %v386_v5 = vadd.f32 %v676_v18, %v385_v2  ;;  %v710_v6 = vpop.f32.mrb[11].mxu0  ;;  %v419_v7 = vadd.f32 %v409_v60, %v383_v62 }
  0xfb   : > { %v437_v9 = vsel %vm316_vm1, %v419_v7, 0.0  ;;  %v420_v10 = vadd.f32 %v410_v3, %v386_v5 }
  0xfc   : > { %438 = vadd.xlane.f32.xlu0 %v437_v9 }
  0xfd   : > { %v440_v12 = vsel %vm316_vm1, %v420_v10, 0.0 }
  0xfe   : > { %441 = vadd.xlane.f32.xlu1 %v440_v12 }
 0x100   : > { %450 = vadd.xlane.f32.xlu0 %v449_v13 }
 0x102   : > { %453 = vadd.xlane.f32.xlu1 %v452_v14 }
 0x179   : > { %v427_v15 = vpop.xlane.xlu0 %426 }
 0x17a   : > { %v456_v16 = vmul.f32 0.03125, %v427_v15 }
 0x17c   : > { %v865_v17 = vsub.f32 %v415_v30, %v456_v16  ;;  %v448_v18 = vpop.xlane.xlu1 %447  ;;  %v920_v16 = vld [vmem:[%s990_s4] ss:$0 sm:$0xff] }
 0x17d   : > { %v445_v19 = vpop.xlane.xlu0 %444  ;;  %v463_v22 = vmul.f32 0.03125, %v448_v18 }
 0x17e   : > { %v462_v20 = vmul.f32 0.03125, %v445_v19  ;;  %v476_v21 = vmul.f32 %v865_v17, %v865_v17 }
 0x17f   : > { %v876_v30 = vsub.f32 %v845_v37, %v463_v22  ;;  %v926_v22 = vld [vmem:[%s991_s5] ss:$0 sm:$0xff] }
 0x180   : > { %v870_v23 = vsub.f32 %v842_v34, %v462_v20  ;;  %v486_v24 = vsel %vm316_vm1, %v476_v21, 0.0 }
 0x181   : > { %v430_v25 = vpop.xlane.xlu0 %429  ;;  %v433_v26 = vpop.xlane.xlu1 %432  ;;  %487 = vadd.xlane.f32.xlu0 %v486_v24  ;;  %v483_v41 = vmul.f32 %v876_v30, %v876_v30 }
 0x182   : > { %v457_v27 = vmul.f32 0.03125, %v430_v25  ;;  %v458_v28 = vmul.f32 0.03125, %v433_v26  ;;  %v482_v29 = vmul.f32 %v870_v23, %v870_v23 }
 0x183   : > { %v507_v48 = vsel %vm316_vm1, %v483_v41, 0.0 }
 0x184   : > { %v878_v31 = vsub.f32 %v416_v45, %v457_v27  ;;  %v880_v32 = vsub.f32 %v417_v52, %v458_v28  ;;  %v504_v33 = vsel %vm316_vm1, %v482_v29, 0.0 }
 0x185   : > { %v436_v34 = vpop.xlane.xlu1 %435  ;;  %505 = vadd.xlane.f32.xlu0 %v504_v33 }
 0x186   : > { %v459_v35 = vmul.f32 0.03125, %v436_v34  ;;  %v478_v36 = vmul.f32 %v880_v32, %v880_v32  ;;  %v477_v38 = vmul.f32 %v878_v31, %v878_v31 }
 0x188   : > { %v887_v39 = vsub.f32 %v418_v57, %v459_v35  ;;  %v492_v37 = vsel %vm316_vm1, %v478_v36, 0.0  ;;  %v489_v40 = vsel %vm316_vm1, %v477_v38, 0.0 }
 0x189   : > { %493 = vadd.xlane.f32.xlu0 %v492_v37  ;;  %v439_v42 = vpop.xlane.xlu0 %438  ;;  %490 = vadd.xlane.f32.xlu1 %v489_v40 }
 0x18a   : > { %v460_v43 = vmul.f32 0.03125, %v439_v42  ;;  %v479_v45 = vmul.f32 %v887_v39, %v887_v39 }
 0x18b   : > { %v442_v44 = vpop.xlane.xlu1 %441 }
 0x18c   : > { %v895_v46 = vsub.f32 %v419_v7, %v460_v43  ;;  %v461_v47 = vmul.f32 0.03125, %v442_v44  ;;  %v495_v54 = vsel %vm316_vm1, %v479_v45, 0.0 }
 0x18d   : > { %v451_v49 = vpop.xlane.xlu0 %450  ;;  %508 = vadd.xlane.f32.xlu1 %v507_v48 }
 0x18e   : > { %v898_v50 = vsub.f32 %v420_v10, %v461_v47  ;;  %v464_v51 = vmul.f32 0.03125, %v451_v49  ;;  %v480_v52 = vmul.f32 %v895_v46, %v895_v46 }
 0x18f   : > { %v454_v53 = vpop.xlane.xlu1 %453 }
 0x190   : > { %v903_v55 = vsub.f32 %v423_v8, %v464_v51  ;;  %v465_v56 = vmul.f32 0.03125, %v454_v53  ;;  %v498_v57 = vsel %vm316_vm1, %v480_v52, 0.0  ;;  %v481_v58 = vmul.f32 %v898_v50, %v898_v50 }
 0x191   : > { %499 = vadd.xlane.f32.xlu0 %v498_v57  ;;  %496 = vadd.xlane.f32.xlu1 %v495_v54 }
 0x192   : > { %v908_v59 = vsub.f32 %v424_v11, %v465_v56  ;;  %v484_v60 = vmul.f32 %v903_v55, %v903_v55  ;;  %v501_v62 = vsel %vm316_vm1, %v481_v58, 0.0 }
 0x194   : > { %v510_v61 = vsel %vm316_vm1, %v484_v60, 0.0  ;;  %v485_v63 = vmul.f32 %v908_v59, %v908_v59 }
 0x195   : > { %511 = vadd.xlane.f32.xlu0 %v510_v61  ;;  %502 = vadd.xlane.f32.xlu1 %v501_v62 }
 0x196   : > { %v513_v0 = vsel %vm316_vm1, %v485_v63, 0.0 }
 0x199   : > { %514 = vadd.xlane.f32.xlu1 %v513_v0 }
 0x20e   : > { %v488_v1 = vpop.xlane.xlu0 %487 }
 0x20f   : > { %v516_v2 = vmul.f32 0.03125, %v488_v1 }
 0x211   : > { %v526_v3 = vadd.f32 1e-05, %v516_v2 }
 0x212   : > { %v506_v4 = vpop.xlane.xlu0 %505 }
 0x213   : > { %735 = vrsqrt.f32 %v526_v3  ;;  %v522_v5 = vmul.f32 0.03125, %v506_v4 }
 0x215   : > { %v532_v6 = vadd.f32 1e-05, %v522_v5 }
 0x216   : > { %v494_v7 = vpop.xlane.xlu0 %493  ;;  %v491_v8 = vpop.xlane.xlu1 %490 }
 0x217   : > { %737 = vrsqrt.f32 %v532_v6  ;;  %v518_v9 = vmul.f32 0.03125, %v494_v7  ;;  %v517_v10 = vmul.f32 0.03125, %v491_v8 }
 0x219   : > { %v528_v11 = vadd.f32 1e-05, %v518_v9  ;;  %v527_v12 = vadd.f32 1e-05, %v517_v10 }
 0x21a   : > { %v509_v13 = vpop.xlane.xlu1 %508 }
 0x21b   : > { %739 = vrsqrt.f32 %v528_v11  ;;  %v523_v14 = vmul.f32 0.03125, %v509_v13 }
 0x21c   : > { %741 = vrsqrt.f32 %v527_v12 }
 0x21d   : > { %v736_v15 = vpop.eup %735  ;;  %v533_v18 = vadd.f32 1e-05, %v523_v14 }
 0x21e   : > { %v546_v19 = vmul.f32 %v736_v15, %v865_v17  ;;  %v500_v20 = vpop.xlane.xlu0 %499  ;;  %v497_v21 = vpop.xlane.xlu1 %496 }
 0x21f   : > { %743 = vrsqrt.f32 %v533_v18  ;;  %v520_v24 = vmul.f32 0.03125, %v500_v20  ;;  %v519_v25 = vmul.f32 0.03125, %v497_v21 }
 0x220   : > { %v563_v26 = vmul.f32 %v920_v16, %v546_v19 }
 0x221   : > { %v738_v27 = vpop.eup %737  ;;  %v530_v17 = vadd.f32 1e-05, %v520_v24  ;;  %v529_v28 = vadd.f32 1e-05, %v519_v25 }
 0x222   : > { %v580_v29 = vadd.f32 %v926_v22, %v563_v26  ;;  %v552_v33 = vmul.f32 %v738_v27, %v870_v23  ;;  %v512_v34 = vpop.xlane.xlu0 %511  ;;  %v503_v35 = vpop.xlane.xlu1 %502 }
 0x223   : > { %745 = vrsqrt.f32 %v530_v17  ;;  %v524_v36 = vmul.f32 0.03125, %v512_v34  ;;  %v521_v38 = vmul.f32 0.03125, %v503_v35 }
 0x224   : > { %590 = vst.msk [vmem:[%s933_s19] sm:$0xff] %vm316_vm1, %v580_v29  ;;  %v569_v37 = vmul.f32 %v920_v16, %v552_v33  ;;  %747 = vrsqrt.f32 %v529_v28 }
 0x225   : > { %v740_v40 = vpop.eup %739  ;;  %v534_v41 = vadd.f32 1e-05, %v524_v36  ;;  %v531_v42 = vadd.f32 1e-05, %v521_v38 }
 0x226   : > { %v742_v43 = vpop.eup %741  ;;  %v586_v44 = vadd.f32 %v926_v22, %v569_v37  ;;  %v548_v23 = vmul.f32 %v740_v40, %v880_v32  ;;  %v515_v45 = vpop.xlane.xlu1 %514 }
 0x227   : > { %v547_v47 = vmul.f32 %v742_v43, %v878_v31  ;;  %749 = vrsqrt.f32 %v534_v41  ;;  %v525_v48 = vmul.f32 0.03125, %v515_v45 }
 0x228   : > { %596 = vst.msk [vmem:[%s933_s19 + $0x30] sm:$0xff] %vm316_vm1, %v586_v44  ;;  %v565_v49 = vmul.f32 %v920_v16, %v548_v23  ;;  %751 = vrsqrt.f32 %v531_v42 }
 0x229   : > { %v744_v51 = vpop.eup %743  ;;  %v564_v52 = vmul.f32 %v920_v16, %v547_v47  ;;  %v535_v53 = vadd.f32 1e-05, %v525_v48 }
 0x22a   : > { %v582_v54 = vadd.f32 %v926_v22, %v565_v49  ;;  %v553_v32 = vmul.f32 %v744_v51, %v876_v30 }
 0x22b   : > { %v581_v56 = vadd.f32 %v926_v22, %v564_v52  ;;  %753 = vrsqrt.f32 %v535_v53 }
 0x22c   : > { %592 = vst.msk [vmem:[%s933_s19 + $0x10] sm:$0xff] %vm316_vm1, %v582_v54  ;;  %v570_v31 = vmul.f32 %v920_v16, %v553_v32 }
 0x22d   : > { %v746_v57 = vpop.eup %745  ;;  %591 = vst.msk [vmem:[%s933_s19 + $0x8] sm:$0xff] %vm316_vm1, %v581_v56 }
 0x22e   : > { %v748_v58 = vpop.eup %747  ;;  %v587_v60 = vadd.f32 %v926_v22, %v570_v31  ;;  %v550_v61 = vmul.f32 %v746_v57, %v895_v46 }
 0x22f   : > { %v549_v62 = vmul.f32 %v748_v58, %v887_v39 }
 0x230   : > { %597 = vst.msk [vmem:[%s933_s19 + $0x38] sm:$0xff] %vm316_vm1, %v587_v60  ;;  %v567_v30 = vmul.f32 %v920_v16, %v550_v61 }
 0x231   : > { %v750_v63 = vpop.eup %749  ;;  %v566_v0 = vmul.f32 %v920_v16, %v549_v62 }
 0x232   : > { %v752_v1 = vpop.eup %751  ;;  %v584_v2 = vadd.f32 %v926_v22, %v567_v30  ;;  %v554_v3 = vmul.f32 %v750_v63, %v903_v55 }
 0x233   : > { %v583_v4 = vadd.f32 %v926_v22, %v566_v0  ;;  %v551_v46 = vmul.f32 %v752_v1, %v898_v50 }
 0x234   : > { %594 = vst.msk [vmem:[%s933_s19 + $0x20] sm:$0xff] %vm316_vm1, %v584_v2  ;;  %v571_v39 = vmul.f32 %v920_v16, %v554_v3 }
 0x235   : > { %v754_v5 = vpop.eup %753  ;;  %593 = vst.msk [vmem:[%s933_s19 + $0x18] sm:$0xff] %vm316_vm1, %v583_v4  ;;  %v568_v6 = vmul.f32 %v920_v16, %v551_v46 }
 0x236   : > { %v588_v7 = vadd.f32 %v926_v22, %v571_v39  ;;  %v555_v8 = vmul.f32 %v754_v5, %v908_v59 }
 0x237   : > { %v585_v9 = vadd.f32 %v926_v22, %v568_v6 }
 0x238   : > { %598 = vst.msk [vmem:[%s933_s19 + $0x40] sm:$0xff] %vm316_vm1, %v588_v7  ;;  %v572_v55 = vmul.f32 %v920_v16, %v555_v8 }
 0x239   : > { %595 = vst.msk [vmem:[%s933_s19 + $0x28] sm:$0xff] %vm316_vm1, %v585_v9 }
 0x23a   : > { %v589_v50 = vadd.f32 %v926_v22, %v572_v55 }
 0x23c   : > { %599 = vst.msk [vmem:[%s933_s19 + $0x48] sm:$0xff] %vm316_vm1, %v589_v50 }
 0x23d PF: > { %s16_s21 = sadd.s32 1, %s761_s21  }
 0x23e   : > { %p13_p4 = scmp.ge.s32.totalorder %s16_s21, 4  }
 0x240   :  { %15 = sbr.rel (!%p13_p4) target bundleno = 1 (0x1), region = 77 }

// kernel: _encoder_forward.8
= control target key start
LH: loop header
LB: loop body
LE: loop exit
PB: predicated region body
PF: predicated region fallthrough
CT: control target
= control target key end

     0   :  { %s977_s24 = smov 0   ;;  %s1223_s0 = inlined_call_operand.vmem [shape: f32[160,32], index: 0, kind: input, shape index: {}]   ;;  %s1224_s1 = inlined_call_operand.vmem [shape: bf16[32,64], index: 1, kind: input, shape index: {}]   ;;  %s1225_s2 = inlined_call_operand.vmem [shape: f32[1,64], index: 2, kind: input, shape index: {}]   ;;  %s1226_s3 = inlined_call_operand.vmem [shape: bf16[64,32], index: 3, kind: input, shape index: {}]   ;;  %s1227_s4 = inlined_call_operand.vmem [shape: f32[1,32], index: 4, kind: input, shape index: {}]   ;;  %s1228_s5 = inlined_call_operand.vmem [shape: f32[1,32], index: 5, kind: input, shape index: {}]   ;;  %s1229_s6 = inlined_call_operand.vmem [shape: f32[1,32], index: 6, kind: input, shape index: {}]   ;;  %s1230_s7 = inlined_call_operand.vmem [shape: f32[160,32], index: 7, kind: output, shape index: {}]  }
   0x1 LB: > { %s794_s25 = sadd.s32 4294967295, %s933_s24   ;;  %p798_p0 = scmp.ge.s32.totalorder %s933_s24, 1  ;;  %s933_s24 = sphi %s977_s24, %s17_s24  }
   0x2   : > { %p238_p1 = scmp.lt.s32.totalorder %s933_s24, 3 }
   0x4   : > { %p239_p2 = pnand %p798_p0, %p238_p1 }
   0x5   : > { %v901_v0 = vld [vmem:[%s1224_s1] sm:$0xff] (!%p239_p2)   ;;  %v935_v1 = vmov (!%p239_p2), 0.0   ;;  %v902_v2 = vld [vmem:[%s1224_s1 + $0x8] sm:$0xff] (!%p239_p2)   ;;  %vm936_vm0 = vmmov (!%p239_p2), 0   ;;  %s270_s30 = smul.u32 (!%p239_p2), 10, %s794_s25  ;;  %vm321_vm1 = vcmask (!%p239_p2), 261120  }
   0x6   : > { %242 = sbr.rel (%p239_p2) target bundleno = 803 (0x323), region = 48  ;;  %839 = vmatprep.subr.bf16.mxu0 (!%p239_p2), %v935_v1  ;;  %863 = vmatprep.subr.bf16.mxu1 (!%p239_p2), %v935_v1  ;;  %v903_v3 = vld [vmem:[%s1226_s3] sm:$0xff] (!%p239_p2)   ;;  %v904_v4 = vld [vmem:[%s1226_s3 + $0x8] sm:$0xff] (!%p239_p2)   ;;  %v905_v20 = vld [vmem:[%s1226_s3 + $0x10] sm:$0xff] (!%p239_p2)   ;;  %vm464_vm2 = vcmask (!%p239_p2), 523264  }
   0x7   : > { %840 = vmatpush3.bf16.msra.mxu0 (!%p239_p2), %v901_v0  ;;  %843 = vmatprep.mubr.msk.bf16.mxu0 (!%p239_p2), %vm936_vm0, %v935_v1  ;;  %p271_p3 = scmp.lt.s32.totalorder (!%p239_p2), %s270_s30, 19  ;;  %v906_v21 = vld [vmem:[%s1226_s3 + $0x18] sm:$0xff] (!%p239_p2)   ;;  %v801_v22 = vld [vmem:[%s1225_s2] ss:$0 sm:$0xff] (!%p239_p2) }
   0x8   : > { %841 = vmatprep.subr.bf16.mxu0 (!%p239_p2), %v935_v1  ;;  %871 = vmatprep.mubr.msk.bf16.mxu1 (!%p239_p2), %vm936_vm0, %v935_v1 }
   0x9   : > { %864 = vmatpush3.bf16.msra.mxu1 (!%p239_p2), %v903_v3 }
   0xa   : > { %865 = vmatprep.subr.bf16.mxu1 (!%p239_p2), %v935_v1 }
   0xb   : > { %842 = vmatpush3.bf16.msra.mxu0 (!%p239_p2), %v902_v2 }
   0xd   : > { %s1232_s30 = smov (!%p271_p3, %s270_s30), 19  ;;  %866 = vmatpush3.bf16.msra.mxu1 %v904_v4 }
   0xe   : > { %s799_s12 = sshll.u32 %s1232_s30, 3  ;;  %867 = vmatprep.subr.bf16.mxu1 %v935_v1 }
   0xf   : > { %s274_s15 = scalar_lea.vmem %s1223_s0, %s799_s12  ;;  %s1170_s9 = scalar_lea.vmem %s1230_s7, %s799_s12 }
  0x10   : > { %v1013_v5 = vld [vmem:[%s274_s15] sm:$0xff]  ;;  %v1015_v6 = vld [vmem:[%s274_s15 + $0x8] sm:$0xff]  ;;  %v1023_v8 = vld [vmem:[%s274_s15 + $0x10] sm:$0xff] }
  0x11   : > { %v293_v7 = vpack.c.bf16 %v1015_v6, %v1013_v5  ;;  %v1025_v9 = vld [vmem:[%s274_s15 + $0x18] sm:$0xff]  ;;  %v1032_v11 = vld [vmem:[%s274_s15 + $0x20] sm:$0xff]  ;;  %v1034_v12 = vld [vmem:[%s274_s15 + $0x28] sm:$0xff]  ;;  %868 = vmatpush3.bf16.msra.mxu1 %v905_v20 }
  0x12   : > { %v294_v10 = vpack.c.bf16 %v1025_v9, %v1023_v8  ;;  %v295_v13 = vpack.c.bf16 %v1034_v12, %v1032_v11  ;;  %v1041_v14 = vld [vmem:[%s274_s15 + $0x30] sm:$0xff]  ;;  %v1043_v15 = vld [vmem:[%s274_s15 + $0x38] sm:$0xff]  ;;  %v1050_v17 = vld [vmem:[%s274_s15 + $0x40] sm:$0xff]  ;;  %869 = vmatprep.subr.bf16.mxu1 %v935_v1 }
  0x13   : > { %844 = vmatmul.mubr.msk.bf16.vlgmr.msra.gmra.mrb[0].mxu0 %vm321_vm1, %v293_v7  ;;  %v296_v16 = vpack.c.bf16 %v1043_v15, %v1041_v14  ;;  %v1052_v18 = vld [vmem:[%s274_s15 + $0x48] sm:$0xff]  ;;  %v809_v7 = vld [vmem:[%s1227_s4] ss:$0 sm:$0xff] }
  0x14   : > { %847 = vmatprep.mubr.msk.bf16.mxu0 %vm936_vm0, %v935_v1  ;;  %v297_v19 = vpack.c.bf16 %v1052_v18, %v1050_v17 }
  0x15   : > { %870 = vmatpush3.bf16.msra.mxu1 %v906_v21 }
  0x1b   : > { %848 = vmatmul.mubr.msk.bf16.gmra.mrb[4].mxu0 %vm321_vm1, %v294_v10 }
  0x1c   : > { %851 = vmatprep.mubr.msk.bf16.mxu0 %vm936_vm0, %v935_v1 }
  0x23   : > { %852 = vmatmul.mubr.msk.bf16.gmra.mrb[8].mxu0 %vm321_vm1, %v295_v13 }
  0x24   : > { %855 = vmatprep.mubr.msk.bf16.mxu0 %vm936_vm0, %v935_v1 }
  0x2b   : > { %856 = vmatmul.mubr.msk.bf16.gmra.mrb[12].mxu0 %vm321_vm1, %v296_v16 }
  0x2c   : > { %859 = vmatprep.mubr.msk.bf16.mxu0 %vm936_vm0, %v935_v1 }
  0x33   : > { %860 = vmatmul.mubr.msk.bf16.gmra.mrb[16].mxu0 %vm321_vm1, %v297_v19 }
  0xe6   : > { %v371_v23 = vpop.f32.mrb[0].mxu0 }
  0xe7   : > { %v372_v24 = vadd.f32 %v801_v22, %v371_v23  ;;  %v845_v25 = vpop.f32.mrb[1].mxu0 }
  0xe8   : > { %v374_v26 = vpop.f32.mrb[2].mxu0 }
  0xe9   : > { %v375_v27 = vadd.f32 %v801_v22, %v374_v26  ;;  %v846_v28 = vpop.f32.mrb[3].mxu0  ;;  %v410_v29 = vmax.f32 %v372_v24, 0.0 }
  0xeb   : > { %v411_v30 = vmax.f32 %v375_v27, 0.0 }
  0xed   : > { %v420_v31 = vpack.c.bf16 %v411_v30, %v410_v29 }
  0xee   : > { %v379_v32 = vpop.f32.mrb[4].mxu0 }
  0xef   : > { %v380_v33 = vadd.f32 %v801_v22, %v379_v32  ;;  %v849_v34 = vpop.f32.mrb[5].mxu0  ;;  %872 = vmatmul.mubr.msk.bf16.vlgmr.msra.gmra.mrb[0].mxu1 %vm464_vm2, %v420_v31 }
  0xf0   : > { %v382_v35 = vpop.f32.mrb[6].mxu0  ;;  %875 = vmatprep.mubr.msk.bf16.mxu1 %vm936_vm0, %v935_v1 }
  0xf1   : > { %v383_v36 = vadd.f32 %v801_v22, %v382_v35  ;;  %v850_v37 = vpop.f32.mrb[7].mxu0  ;;  %v412_v38 = vmax.f32 %v380_v33, 0.0 }
  0xf3   : > { %v413_v39 = vmax.f32 %v383_v36, 0.0 }
  0xf5   : > { %v421_v40 = vpack.c.bf16 %v413_v39, %v412_v38 }
  0xf6   : > { %v387_v41 = vpop.f32.mrb[8].mxu0 }
  0xf7   : > { %v388_v42 = vadd.f32 %v801_v22, %v387_v41  ;;  %v853_v43 = vpop.f32.mrb[9].mxu0  ;;  %876 = vmatmul.mubr.msk.bf16.gmra.mrb[4].mxu1 %vm464_vm2, %v421_v40 }
  0xf8   : > { %v390_v44 = vpop.f32.mrb[10].mxu0  ;;  %879 = vmatprep.mubr.msk.bf16.mxu1 %vm936_vm0, %v935_v1 }
  0xf9   : > { %v391_v45 = vadd.f32 %v801_v22, %v390_v44  ;;  %v854_v46 = vpop.f32.mrb[11].mxu0  ;;  %v414_v47 = vmax.f32 %v388_v42, 0.0 }
  0xfb   : > { %v415_v48 = vmax.f32 %v391_v45, 0.0 }
  0xfd   : > { %v422_v49 = vpack.c.bf16 %v415_v48, %v414_v47 }
  0xfe   : > { %v395_v50 = vpop.f32.mrb[12].mxu0 }
  0xff   : > { %v396_v51 = vadd.f32 %v801_v22, %v395_v50  ;;  %v857_v52 = vpop.f32.mrb[13].mxu0  ;;  %880 = vmatmul.mubr.msk.bf16.gmra.mrb[8].mxu1 %vm464_vm2, %v422_v49 }
 0x100   : > { %v398_v53 = vpop.f32.mrb[14].mxu0  ;;  %883 = vmatprep.mubr.msk.bf16.mxu1 %vm936_vm0, %v935_v1 }
 0x101   : > { %v399_v54 = vadd.f32 %v801_v22, %v398_v53  ;;  %v858_v55 = vpop.f32.mrb[15].mxu0  ;;  %v416_v56 = vmax.f32 %v396_v51, 0.0 }
 0x103   : > { %v417_v57 = vmax.f32 %v399_v54, 0.0 }
 0x105   : > { %v423_v58 = vpack.c.bf16 %v417_v57, %v416_v56 }
 0x106   : > { %v403_v59 = vpop.f32.mrb[16].mxu0 }
 0x107   : > { %v404_v60 = vadd.f32 %v801_v22, %v403_v59  ;;  %v861_v61 = vpop.f32.mrb[17].mxu0  ;;  %884 = vmatmul.mubr.msk.bf16.gmra.mrb[12].mxu1 %vm464_vm2, %v423_v58 }
 0x108   : > { %v406_v62 = vpop.f32.mrb[18].mxu0  ;;  %887 = vmatprep.mubr.msk.bf16.mxu1 %vm936_vm0, %v935_v1 }
 0x109   : > { %v407_v63 = vadd.f32 %v801_v22, %v406_v62  ;;  %v862_v0 = vpop.f32.mrb[19].mxu0  ;;  %v418_v2 = vmax.f32 %v404_v60, 0.0 }
 0x10b   : > { %v419_v3 = vmax.f32 %v407_v63, 0.0 }
 0x10d   : > { %v424_v4 = vpack.c.bf16 %v419_v3, %v418_v2 }
 0x10f   : > { %888 = vmatmul.mubr.msk.bf16.gmra.mrb[16].mxu1 %vm464_vm2, %v424_v4 }
 0x1c2   : > { %v514_v10 = vpop.f32.mrb[0].mxu1 }
 0x1c3   : > { %v515_v13 = vadd.f32 %v809_v7, %v514_v10  ;;  %v873_v16 = vpop.f32.mrb[1].mxu1 }
 0x1c4   : > { %v517_v19 = vpop.f32.mrb[2].mxu1 }
 0x1c5   : > { %v518_v20 = vadd.f32 %v809_v7, %v517_v19  ;;  %v874_v21 = vpop.f32.mrb[3].mxu1  ;;  %v553_v23 = vadd.f32 %v515_v13, %v1013_v5 }
 0x1c7   : > { %v563_v1 = vsel %vm321_vm1, %v553_v23, 0.0  ;;  %v554_v22 = vadd.f32 %v518_v20, %v1015_v6 }
 0x1c8   : > { %564 = vadd.xlane.f32.xlu0 %v563_v1 }
 0x1c9   : > { %v566_v27 = vsel %vm321_vm1, %v554_v22, 0.0 }
 0x1ca   : > { %v522_v24 = vpop.f32.mrb[4].mxu1 }
 0x1cb   : > { %v523_v25 = vadd.f32 %v809_v7, %v522_v24  ;;  %v877_v26 = vpop.f32.mrb[5].mxu1 }
 0x1cc   : > { %567 = vadd.xlane.f32.xlu0 %v566_v27  ;;  %v525_v28 = vpop.f32.mrb[6].mxu1 }
 0x1cd   : > { %v526_v29 = vadd.f32 %v809_v7, %v525_v28  ;;  %v878_v30 = vpop.f32.mrb[7].mxu1  ;;  %v555_v31 = vadd.f32 %v523_v25, %v1023_v8 }
 0x1cf   : > { %v569_v32 = vsel %vm321_vm1, %v555_v31, 0.0  ;;  %v556_v5 = vadd.f32 %v526_v29, %v1025_v9 }
 0x1d0   : > { %570 = vadd.xlane.f32.xlu1 %v569_v32 }
 0x1d1   : > { %v572_v35 = vsel %vm321_vm1, %v556_v5, 0.0 }
 0x1d2   : > { %v530_v33 = vpop.f32.mrb[8].mxu1 }
 0x1d3   : > { %v531_v34 = vadd.f32 %v809_v7, %v530_v33  ;;  %v881_v6 = vpop.f32.mrb[9].mxu1 }
 0x1d4   : > { %573 = vadd.xlane.f32.xlu1 %v572_v35  ;;  %v533_v36 = vpop.f32.mrb[10].mxu1 }
 0x1d5   : > { %v534_v37 = vadd.f32 %v809_v7, %v533_v36  ;;  %v882_v38 = vpop.f32.mrb[11].mxu1  ;;  %v557_v39 = vadd.f32 %v531_v34, %v1032_v11 }
 0x1d7   : > { %v575_v40 = vsel %vm321_vm1, %v557_v39, 0.0  ;;  %v558_v8 = vadd.f32 %v534_v37, %v1034_v12 }
 0x1d8   : > { %576 = vadd.xlane.f32.xlu0 %v575_v40 }
 0x1d9   : > { %v578_v41 = vsel %vm321_vm1, %v558_v8, 0.0 }
 0x1da   : > { %579 = vadd.xlane.f32.xlu1 %v578_v41  ;;  %v538_v9 = vpop.f32.mrb[12].mxu1 }
 0x1db   : > { %v539_v42 = vadd.f32 %v809_v7, %v538_v9  ;;  %v885_v43 = vpop.f32.mrb[13].mxu1 }
 0x1dc   : > { %v541_v44 = vpop.f32.mrb[14].mxu1 }
 0x1dd   : > { %v542_v45 = vadd.f32 %v809_v7, %v541_v44  ;;  %v886_v46 = vpop.f32.mrb[15].mxu1  ;;  %v559_v47 = vadd.f32 %v539_v42, %v1041_v14 }
 0x1df   : > { %v581_v48 = vsel %vm321_vm1, %v559_v47, 0.0  ;;  %v560_v11 = vadd.f32 %v542_v45, %v1043_v15 }
 0x1e0   : > { %582 = vadd.xlane.f32.xlu0 %v581_v48 }
 0x1e1   : > { %v584_v49 = vsel %vm321_vm1, %v560_v11, 0.0 }
 0x1e2   : > { %585 = vadd.xlane.f32.xlu1 %v584_v49  ;;  %v546_v12 = vpop.f32.mrb[16].mxu1 }
 0x1e3   : > { %v547_v50 = vadd.f32 %v809_v7, %v546_v12  ;;  %v889_v51 = vpop.f32.mrb[17].mxu1 }
 0x1e4   : > { %v549_v52 = vpop.f32.mrb[18].mxu1 }
 0x1e5   : > { %v550_v53 = vadd.f32 %v809_v7, %v549_v52  ;;  %v890_v54 = vpop.f32.mrb[19].mxu1  ;;  %v561_v55 = vadd.f32 %v547_v50, %v1050_v17 }
 0x1e7   : > { %v587_v56 = vsel %vm321_vm1, %v561_v55, 0.0  ;;  %v562_v14 = vadd.f32 %v550_v53, %v1052_v18 }
 0x1e8   : > { %588 = vadd.xlane.f32.xlu0 %v587_v56 }
 0x1e9   : > { %v590_v57 = vsel %vm321_vm1, %v562_v14, 0.0 }
 0x1ea   : > { %591 = vadd.xlane.f32.xlu1 %v590_v57 }
 0x255   : > { %v565_v15 = vpop.xlane.xlu0 %564 }
 0x256   : > { %v594_v58 = vmul.f32 0.03125, %v565_v15 }
 0x258   : > { %v1103_v59 = vsub.f32 %v553_v23, %v594_v58 }
 0x259   : > { %v568_v60 = vpop.xlane.xlu0 %567 }
 0x25a   : > { %v595_v61 = vmul.f32 0.03125, %v568_v60  ;;  %v614_v62 = vmul.f32 %v1103_v59, %v1103_v59  ;;  %v1162_v60 = vld [vmem:[%s1229_s6] ss:$0 sm:$0xff] }
 0x25c   : > { %v1107_v63 = vsub.f32 %v554_v22, %v595_v61  ;;  %v624_v17 = vsel %vm321_vm1, %v614_v62, 0.0 }
 0x25d   : > { %v571_v0 = vpop.xlane.xlu1 %570  ;;  %625 = vadd.xlane.f32.xlu0 %v624_v17 }
 0x25e   : > { %v596_v18 = vmul.f32 0.03125, %v571_v0  ;;  %v615_v2 = vmul.f32 %v1107_v63, %v1107_v63 }
 0x260   : > { %v1112_v3 = vsub.f32 %v555_v31, %v596_v18  ;;  %v627_v4 = vsel %vm321_vm1, %v615_v2, 0.0 }
 0x261   : > { %v574_v7 = vpop.xlane.xlu1 %573  ;;  %628 = vadd.xlane.f32.xlu1 %v627_v4 }
 0x262   : > { %v597_v10 = vmul.f32 0.03125, %v574_v7  ;;  %v616_v13 = vmul.f32 %v1112_v3, %v1112_v3 }
 0x264   : > { %v1117_v16 = vsub.f32 %v556_v5, %v597_v10  ;;  %v630_v19 = vsel %vm321_vm1, %v616_v13, 0.0 }
 0x265   : > { %v577_v20 = vpop.xlane.xlu0 %576  ;;  %631 = vadd.xlane.f32.xlu0 %v630_v19 }
 0x266   : > { %v598_v21 = vmul.f32 0.03125, %v577_v20  ;;  %v617_v23 = vmul.f32 %v1117_v16, %v1117_v16 }
 0x267   : > { %v580_v1 = vpop.xlane.xlu1 %579 }
 0x268   : > { %v1122_v22 = vsub.f32 %v557_v39, %v598_v21  ;;  %v599_v24 = vmul.f32 0.03125, %v580_v1  ;;  %v633_v25 = vsel %vm321_vm1, %v617_v23, 0.0 }
 0x269   : > { %634 = vadd.xlane.f32.xlu1 %v633_v25 }
 0x26a   : > { %v1125_v26 = vsub.f32 %v558_v8, %v599_v24  ;;  %v618_v27 = vmul.f32 %v1122_v22, %v1122_v22 }
 0x26c   : > { %v636_v28 = vsel %vm321_vm1, %v618_v27, 0.0  ;;  %v619_v29 = vmul.f32 %v1125_v26, %v1125_v26 }
 0x26d   : > { %v583_v30 = vpop.xlane.xlu0 %582  ;;  %637 = vadd.xlane.f32.xlu0 %v636_v28 }
 0x26e   : > { %v600_v31 = vmul.f32 0.03125, %v583_v30  ;;  %v639_v32 = vsel %vm321_vm1, %v619_v29, 0.0 }
 0x26f   : > { %v586_v5 = vpop.xlane.xlu1 %585  ;;  %640 = vadd.xlane.f32.xlu1 %v639_v32 }
 0x270   : > { %v1133_v33 = vsub.f32 %v559_v47, %v600_v31  ;;  %v601_v34 = vmul.f32 0.03125, %v586_v5 }
 0x272   : > { %v1135_v6 = vsub.f32 %v560_v11, %v601_v34  ;;  %v620_v35 = vmul.f32 %v1133_v33, %v1133_v33 }
 0x274   : > { %v642_v36 = vsel %vm321_vm1, %v620_v35, 0.0  ;;  %v621_v37 = vmul.f32 %v1135_v6, %v1135_v6 }
 0x275   : > { %643 = vadd.xlane.f32.xlu0 %v642_v36  ;;  %v589_v38 = vpop.xlane.xlu0 %588 }
 0x276   : > { %v602_v39 = vmul.f32 0.03125, %v589_v38  ;;  %v645_v40 = vsel %vm321_vm1, %v621_v37, 0.0 }
 0x277   : > { %646 = vadd.xlane.f32.xlu1 %v645_v40  ;;  %v592_v8 = vpop.xlane.xlu1 %591 }
 0x278   : > { %v1143_v41 = vsub.f32 %v561_v55, %v602_v39  ;;  %v603_v9 = vmul.f32 0.03125, %v592_v8 }
 0x27a   : > { %v1145_v42 = vsub.f32 %v562_v14, %v603_v9  ;;  %v622_v43 = vmul.f32 %v1143_v41, %v1143_v41  ;;  %v1156_v14 = vld [vmem:[%s1228_s5] ss:$0 sm:$0xff] }
 0x27c   : > { %v648_v44 = vsel %vm321_vm1, %v622_v43, 0.0  ;;  %v623_v45 = vmul.f32 %v1145_v42, %v1145_v42 }
 0x27d   : > { %649 = vadd.xlane.f32.xlu0 %v648_v44 }
 0x27e   : > { %v651_v46 = vsel %vm321_vm1, %v623_v45, 0.0 }
 0x27f   : > { %652 = vadd.xlane.f32.xlu1 %v651_v46 }
 0x2ea   : > { %v626_v47 = vpop.xlane.xlu0 %625 }
 0x2eb   : > { %v654_v48 = vmul.f32 0.03125, %v626_v47 }
 0x2ed   : > { %v664_v11 = vadd.f32 1e-05, %v654_v48 }
 0x2ee   : > { %v629_v49 = vpop.xlane.xlu1 %628 }
 0x2ef   : > { %907 = vrsqrt.f32 %v664_v11  ;;  %v655_v12 = vmul.f32 0.03125, %v629_v49 }
 0x2f1   : > { %v665_v50 = vadd.f32 1e-05, %v655_v12 }
 0x2f2   : > { %v632_v51 = vpop.xlane.xlu0 %631 }
 0x2f3   : > { %909 = vrsqrt.f32 %v665_v50  ;;  %v656_v52 = vmul.f32 0.03125, %v632_v51 }
 0x2f5   : > { %v666_v53 = vadd.f32 1e-05, %v656_v52 }
 0x2f6   : > { %v635_v54 = vpop.xlane.xlu1 %634 }
 0x2f7   : > { %911 = vrsqrt.f32 %v666_v53  ;;  %v657_v55 = vmul.f32 0.03125, %v635_v54 }
 0x2f9   : > { %v908_v56 = vpop.eup %907  ;;  %v667_v57 = vadd.f32 1e-05, %v657_v55 }
 0x2fa   : > { %v684_v15 = vmul.f32 %v908_v56, %v1103_v59  ;;  %v638_v58 = vpop.xlane.xlu0 %637 }
 0x2fb   : > { %913 = vrsqrt.f32 %v667_v57  ;;  %v658_v61 = vmul.f32 0.03125, %v638_v58 }
 0x2fc   : > { %v701_v62 = vmul.f32 %v1156_v14, %v684_v15  ;;  %v641_v17 = vpop.xlane.xlu1 %640 }
 0x2fd   : > { %v910_v0 = vpop.eup %909  ;;  %v668_v59 = vadd.f32 1e-05, %v658_v61  ;;  %v659_v18 = vmul.f32 0.03125, %v641_v17 }
 0x2fe   : > { %v718_v2 = vadd.f32 %v1162_v60, %v701_v62  ;;  %v685_v4 = vmul.f32 %v910_v0, %v1107_v63 }
 0x2ff   : > { %915 = vrsqrt.f32 %v668_v59  ;;  %v669_v7 = vadd.f32 1e-05, %v659_v18 }
 0x300   : > { %728 = vst.msk [vmem:[%s1170_s9] sm:$0xff] %vm321_vm1, %v718_v2  ;;  %v702_v10 = vmul.f32 %v1156_v14, %v685_v4 }
 0x301   : > { %v912_v13 = vpop.eup %911  ;;  %917 = vrsqrt.f32 %v669_v7 }
 0x302   : > { %v719_v19 = vadd.f32 %v1162_v60, %v702_v10  ;;  %v686_v20 = vmul.f32 %v912_v13, %v1112_v3  ;;  %v644_v21 = vpop.xlane.xlu0 %643 }
 0x303   : > { %v660_v23 = vmul.f32 0.03125, %v644_v21 }
 0x304   : > { %729 = vst.msk [vmem:[%s1170_s9 + $0x8] sm:$0xff] %vm321_vm1, %v719_v19  ;;  %v703_v1 = vmul.f32 %v1156_v14, %v686_v20  ;;  %v647_v63 = vpop.xlane.xlu1 %646 }
 0x305   : > { %v914_v24 = vpop.eup %913  ;;  %v670_v25 = vadd.f32 1e-05, %v660_v23  ;;  %v661_v27 = vmul.f32 0.03125, %v647_v63 }
 0x306   : > { %v720_v28 = vadd.f32 %v1162_v60, %v703_v1  ;;  %v687_v29 = vmul.f32 %v914_v24, %v1117_v16 }
 0x307   : > { %919 = vrsqrt.f32 %v670_v25  ;;  %v671_v30 = vadd.f32 1e-05, %v661_v27 }
 0x308   : > { %730 = vst.msk [vmem:[%s1170_s9 + $0x10] sm:$0xff] %vm321_vm1, %v720_v28  ;;  %v704_v3 = vmul.f32 %v1156_v14, %v687_v29 }
 0x309   : > { %v916_v31 = vpop.eup %915  ;;  %921 = vrsqrt.f32 %v671_v30 }
 0x30a   : > { %v721_v32 = vadd.f32 %v1162_v60, %v704_v3  ;;  %v688_v5 = vmul.f32 %v916_v31, %v1122_v22  ;;  %v650_v34 = vpop.xlane.xlu0 %649 }
 0x30b   : > { %v918_v35 = vpop.eup %917  ;;  %v662_v36 = vmul.f32 0.03125, %v650_v34 }
 0x30c   : > { %731 = vst.msk [vmem:[%s1170_s9 + $0x18] sm:$0xff] %vm321_vm1, %v721_v32  ;;  %v705_v16 = vmul.f32 %v1156_v14, %v688_v5  ;;  %v689_v37 = vmul.f32 %v918_v35, %v1125_v26  ;;  %v653_v38 = vpop.xlane.xlu1 %652 }
 0x30d   : > { %v672_v39 = vadd.f32 1e-05, %v662_v36  ;;  %v663_v40 = vmul.f32 0.03125, %v653_v38 }
 0x30e   : > { %v722_v8 = vadd.f32 %v1162_v60, %v705_v16  ;;  %v706_v9 = vmul.f32 %v1156_v14, %v689_v37 }
 0x30f   : > { %923 = vrsqrt.f32 %v672_v39  ;;  %v673_v22 = vadd.f32 1e-05, %v663_v40 }
 0x310   : > { %732 = vst.msk [vmem:[%s1170_s9 + $0x20] sm:$0xff] %vm321_vm1, %v722_v8  ;;  %v723_v43 = vadd.f32 %v1162_v60, %v706_v9 }
 0x311   : > { %v920_v44 = vpop.eup %919  ;;  %925 = vrsqrt.f32 %v673_v22 }
 0x312   : > { %733 = vst.msk [vmem:[%s1170_s9 + $0x28] sm:$0xff] %vm321_vm1, %v723_v43  ;;  %v690_v26 = vmul.f32 %v920_v44, %v1133_v33 }
 0x313   : > { %v922_v45 = vpop.eup %921 }
 0x314   : > { %v707_v46 = vmul.f32 %v1156_v14, %v690_v26  ;;  %v691_v47 = vmul.f32 %v922_v45, %v1135_v6 }
 0x316   : > { %v724_v48 = vadd.f32 %v1162_v60, %v707_v46  ;;  %v708_v11 = vmul.f32 %v1156_v14, %v691_v47 }
 0x318   : > { %734 = vst.msk [vmem:[%s1170_s9 + $0x30] sm:$0xff] %vm321_vm1, %v724_v48  ;;  %v725_v49 = vadd.f32 %v1162_v60, %v708_v11 }
 0x319   : > { %v924_v12 = vpop.eup %923 }
 0x31a   : > { %735 = vst.msk [vmem:[%s1170_s9 + $0x38] sm:$0xff] %vm321_vm1, %v725_v49  ;;  %v692_v33 = vmul.f32 %v924_v12, %v1143_v41 }
 0x31b   : > { %v926_v50 = vpop.eup %925 }
 0x31c   : > { %v709_v51 = vmul.f32 %v1156_v14, %v692_v33  ;;  %v693_v52 = vmul.f32 %v926_v50, %v1145_v42 }
 0x31e   : > { %v726_v6 = vadd.f32 %v1162_v60, %v709_v51  ;;  %v710_v53 = vmul.f32 %v1156_v14, %v693_v52 }
 0x320   : > { %736 = vst.msk [vmem:[%s1170_s9 + $0x40] sm:$0xff] %vm321_vm1, %v726_v6  ;;  %v727_v54 = vadd.f32 %v1162_v60, %v710_v53 }
 0x322   : > { %737 = vst.msk [vmem:[%s1170_s9 + $0x48] sm:$0xff] %vm321_vm1, %v727_v54 }
 0x323 PF: > { %s17_s24 = sadd.s32 1, %s933_s24  }
 0x324   : > { %p14_p4 = scmp.ge.s32.totalorder %s17_s24, 4  }
 0x326   :  { %16 = sbr.rel (!%p14_p4) target bundleno = 1 (0x1), region = 78 }

// kernel: _encoder_forward.9
= control target key start
LH: loop header
LB: loop body
LE: loop exit
PB: predicated region body
PF: predicated region fallthrough
CT: control target
= control target key end

     0   :  { %s1515_s13 = smov 0   ;;  %s1903_s0 = inlined_call_operand.vmem [shape: f32[160,32], index: 0, kind: input, shape index: {}]   ;;  %s1904_s1 = inlined_call_operand.vmem [shape: f32[160,32], index: 1, kind: input, shape index: {}]   ;;  %s1905_s2 = inlined_call_operand.vmem [shape: f32[160,1], index: 2, kind: input, shape index: {}]   ;;  %s1906_s3 = inlined_call_operand.vmem [shape: bf16[32,32], index: 3, kind: input, shape index: {}]   ;;  %s1907_s4 = inlined_call_operand.vmem [shape: f32[1,32], index: 4, kind: input, shape index: {}]   ;;  %s1908_s5 = inlined_call_operand.vmem [shape: bf16[32,128], index: 5, kind: input, shape index: {}]   ;;  %s1909_s6 = inlined_call_operand.vmem [shape: f32[1,128], index: 6, kind: input, shape index: {}]   ;;  %s1910_s7 = inlined_call_operand.vmem [shape: f32[128,128], index: 7, kind: input, shape index: {}]   ;;  %s1911_s8 = inlined_call_operand.vmem [shape: f32[1,128], index: 8, kind: input, shape index: {}]   ;;  %s1912_s9 = inlined_call_operand.vmem [shape: f32[160,32], index: 9, kind: output, shape index: {0}]   ;;  %s1913_s10 = inlined_call_operand.vmem [shape: f32[160,128], index: 10, kind: output, shape index: {1}]  }
   0x1 LB: > { %s1182_s14 = sadd.s32 4294967295, %s1455_s13   ;;  %p1186_p0 = scmp.ge.s32.totalorder %s1455_s13, 1  ;;  %s1455_s13 = sphi %s1515_s13, %s21_s13  }
   0x2   : > { %p338_p1 = scmp.lt.s32.totalorder %s1455_s13, 3 }
   0x4   : > { %p339_p2 = pnand %p1186_p0, %p338_p1 }
   0x5   : > { %v1405_v0 = vld [vmem:[%s1906_s3] sm:$0xff] (!%p339_p2)   ;;  %v1457_v1 = vmov (!%p339_p2), 0.0   ;;  %v1406_v2 = vld [vmem:[%s1906_s3 + $0x8] sm:$0xff] (!%p339_p2)   ;;  %vm1458_vm0 = vmmov (!%p339_p2), 0   ;;  %s391_s19 = smul.u32 (!%p339_p2), 10, %s1182_s14  ;;  %vm480_vm1 = vcmask (!%p339_p2), 261120   ;;  %v779_v53 = vlaneseq (!%p339_p2) }
   0x6   : > { %342 = sbr.rel (%p339_p2) target bundleno = 669 (0x29d), region = 56  ;;  %1388 = vmatprep.subr.bf16.mxu1 (!%p339_p2), %v1457_v1  ;;  %1261 = vmatprep.subr.bf16.mxu0 (!%p339_p2), %v1457_v1  ;;  %v1407_v3 = vld [vmem:[%s1908_s5] sm:$0xff] (!%p339_p2)   ;;  %v1408_v13 = vld [vmem:[%s1908_s5 + $0x8] sm:$0xff] (!%p339_p2)   ;;  %v1459_v41 = vmov (!%p339_p2), 0   ;;  %v882_v45 = vld [vmem:[%s1910_s7 + $0x10] sm:$0xff] (!%p339_p2) }
   0x7   : > { %1390 = vmatpush3.bf16.msra.mxu1 (!%p339_p2), %v1405_v0  ;;  %1281 = vmatprep.mubr.msk.bf16.mxu1 (!%p339_p2), %vm1458_vm0, %v1457_v1  ;;  %p392_p3 = scmp.lt.s32.totalorder (!%p339_p2), %s391_s19, 19  ;;  %v880_v43 = vld [vmem:[%s1910_s7] sm:$0xff] (!%p339_p2)  ;;  %v881_v44 = vld [vmem:[%s1910_s7 + $0x8] sm:$0xff] (!%p339_p2)  ;;  %v883_v47 = vld [vmem:[%s1910_s7 + $0x18] sm:$0xff] (!%p339_p2)  ;;  %v780_v55 = vshrl.u32 (!%p339_p2), %v779_v53, 7 }
   0x8   : > { %1389 = vmatprep.subr.bf16.mxu1 (!%p339_p2), %v1457_v1  ;;  %1262 = vmatpush3.bf16.msra.mxu0 (!%p339_p2), %v1405_v0  ;;  %v1356_v46 = vpack.c.bf16 (!%p339_p2), %v881_v44, %v880_v43  ;;  %v1360_v48 = vpack.c.bf16 (!%p339_p2), %v883_v47, %v882_v45  ;;  %v884_v49 = vld [vmem:[%s1910_s7 + $0x20] sm:$0xff] (!%p339_p2)  ;;  %v885_v50 = vld [vmem:[%s1910_s7 + $0x28] sm:$0xff] (!%p339_p2) }
   0x9   : > { %1263 = vmatprep.subr.bf16.mxu0 (!%p339_p2), %v1457_v1  ;;  %1265 = vmatprep.mubr.msk.bf16.mxu0 (!%p339_p2), %vm1458_vm0, %v1457_v1  ;;  %v1364_v51 = vpack.c.bf16 (!%p339_p2), %v885_v50, %v884_v49  ;;  %v1634_v54 = vld [vmem:[%s1911_s8] sm:$0x1] (!%p339_p2)  ;;  %v1641_v61 = vsub.s32 (!%p339_p2), 0, %v780_v55  ;;  %v893_v47 = vld [vmem:[%s1910_s7 + $0x68] sm:$0xff] (!%p339_p2) }
   0xa   : > { %1404 = vset.pattern.permute.xlu1 (!%p339_p2), %v1459_v41  ;;  %1403 = vset.pattern.permute.xlu0 (!%p339_p2), %v1459_v41  ;;  %v1208_v56 = vadd.f32 (!%p339_p2), -1.0, %v1634_v54  ;;  %v1646_v63 = vld [vmem:[%s1909_s6] ss:$0 sm:$0xff] (!%p339_p2) }
   0xb   : > { %1391 = vmatpush3.bf16.msra.mxu1 (!%p339_p2), %v1406_v2 }
   0xc   : > { %1285 = vmatprep.subr.bf16.mxu1 (!%p339_p2), %v1457_v1  ;;  %1264 = vmatpush3.bf16.msra.mxu0 (!%p339_p2), %v1406_v2  ;;  %v777_v62 = vmul.f32 (!%p339_p2), 1e+30, %v1208_v56 }
   0xd   : > { %s1915_s19 = smov (!%p392_p3, %s391_s19), 19  ;;  %1357 = vmatprep.subr.bf16.mxu0 %v1356_v46 }
   0xe   : > { %s1538_s20 = sshll.u32 %s1915_s19, 3  ;;  %v1649_v0 = vrot.slane %v777_v62, %v1641_v61 }
   0xf   : > { %s1544_s23 = scalar_lea.vmem %s1903_s0, %s1538_s20  ;;  %s1553_s28 = scalar_lea.vmem %s1904_s1, %s1538_s20 }
  0x10   : > { %v430_v4 = vld [vmem:[%s1544_s23 + $0x40] sm:$0xff]  ;;  %v431_v5 = vld [vmem:[%s1544_s23 + $0x48] sm:$0xff]  ;;  %v424_v15 = vld [vmem:[%s1544_s23 + $0x10] sm:$0xff]  ;;  %s407_s14 = scalar_lea.vmem %s1905_s2, %s1538_s20  ;;  %s1793_s19 = scalar_lea.vmem %s1912_s9, %s1538_s20 }
  0x11   : > { %v422_v6 = vld [vmem:[%s1544_s23] sm:$0xff]  ;;  %v456_v7 = vpack.c.bf16 %v431_v5, %v430_v4  ;;  %v423_v8 = vld [vmem:[%s1544_s23 + $0x8] sm:$0xff]  ;;  %v425_v16 = vld [vmem:[%s1544_s23 + $0x18] sm:$0xff] }
  0x12   : > { %v432_v9 = vld [vmem:[%s1553_s28] sm:$0xff]  ;;  %v433_v10 = vld [vmem:[%s1553_s28 + $0x8] sm:$0xff]  ;;  %v434_v17 = vld [vmem:[%s1553_s28 + $0x10] sm:$0xff]  ;;  %v452_v42 = vpack.c.bf16 %v423_v8, %v422_v6  ;;  %v453_v52 = vpack.c.bf16 %v425_v16, %v424_v15 }
  0x13   : > { %1282 = vmatmul.mubr.msk.bf16.vlgmr.msra.gmra.mrb[0].mxu1 %vm480_vm1, %v456_v7  ;;  %v442_v11 = vadd.f32 %v432_v9, %v422_v6  ;;  %v443_v12 = vadd.f32 %v433_v10, %v423_v8  ;;  %v435_v18 = vld [vmem:[%s1553_s28 + $0x18] sm:$0xff]  ;;  %v444_v19 = vadd.f32 %v434_v17, %v424_v15  ;;  %v1576_v22 = vld [vmem:[%s1544_s23 + $0x20] sm:$0xff]  ;;  %v1579_v23 = vld [vmem:[%s1544_s23 + $0x28] sm:$0xff] }
  0x14   : > { %1286 = vmatpush3.bf16.msra.mxu1 %v1407_v3  ;;  %1289 = vmatprep.mubr.msk.bf16.mxu1 %vm1458_vm0, %v1457_v1  ;;  %v445_v20 = vadd.f32 %v435_v18, %v425_v16  ;;  %v436_v24 = vld [vmem:[%s1553_s28 + $0x20] sm:$0xff]  ;;  %v437_v25 = vld [vmem:[%s1553_s28 + $0x28] sm:$0xff]  ;;  %v1589_v29 = vld [vmem:[%s1544_s23 + $0x30] sm:$0xff] }
  0x15   : > { %1287 = vmatprep.subr.bf16.mxu1 %v1457_v1  ;;  %v659_v14 = vpack.c.bf16 %v443_v12, %v442_v11  ;;  %v446_v26 = vadd.f32 %v436_v24, %v1576_v22  ;;  %v447_v27 = vadd.f32 %v437_v25, %v1579_v23  ;;  %v1592_v30 = vld [vmem:[%s1544_s23 + $0x38] sm:$0xff]  ;;  %v438_v31 = vld [vmem:[%s1553_s28 + $0x30] sm:$0xff]  ;;  %v440_v36 = vld [vmem:[%s1553_s28 + $0x40] sm:$0xff]  ;;  %1266 = vmatmul.mubr.msk.bf16.vlgmr.msra.gmra.mrb[0].mxu0 %vm480_vm1, %v452_v42  ;;  %s1857_s23 = scalar_lea.vmem %s1913_s10, %s1538_s20 }
  0x16   : > { %v660_v21 = vpack.c.bf16 %v445_v20, %v444_v19  ;;  %v439_v32 = vld [vmem:[%s1553_s28 + $0x38] sm:$0xff]  ;;  %v448_v33 = vadd.f32 %v438_v31, %v1589_v29  ;;  %v441_v37 = vld [vmem:[%s1553_s28 + $0x48] sm:$0xff]  ;;  %v450_v38 = vadd.f32 %v440_v36, %v430_v4  ;;  %1269 = vmatprep.mubr.msk.bf16.mxu0 %vm1458_vm0, %v1457_v1  ;;  %1359 = vmatpush3.bf16.msra.mxu0 %v1356_v46  ;;  %v892_v46 = vld [vmem:[%s1910_s7 + $0x60] sm:$0xff] }
  0x17   : > { %v661_v28 = vpack.c.bf16 %v447_v27, %v446_v26  ;;  %v449_v34 = vadd.f32 %v439_v32, %v1592_v30  ;;  %v451_v39 = vadd.f32 %v441_v37, %v431_v5  ;;  %1361 = vmatprep.subr.bf16.mxu0 %v1360_v48  ;;  %v886_v27 = vld [vmem:[%s1910_s7 + $0x30] sm:$0xff]  ;;  %v454_v36 = vpack.c.bf16 %v1579_v23, %v1576_v22  ;;  %v891_v23 = vld [vmem:[%s1910_s7 + $0x58] sm:$0xff]  ;;  %v570_v62 = vld [vmem:[%s407_s14 + $0x8] sm:$0xff] }
  0x18   : > { %1288 = vmatpush3.bf16.msra.mxu1 %v1408_v13  ;;  %v890_v22 = vld [vmem:[%s1910_s7 + $0x50] sm:$0xff]  ;;  %v1380_v49 = vpack.c.bf16 %v893_v47, %v892_v46 }
  0x19   : > { %v662_v35 = vpack.c.bf16 %v449_v34, %v448_v33  ;;  %v663_v40 = vpack.c.bf16 %v451_v39, %v450_v38  ;;  %v888_v33 = vld [vmem:[%s1910_s7 + $0x40] sm:$0xff]  ;;  %v889_v34 = vld [vmem:[%s1910_s7 + $0x48] sm:$0xff]  ;;  %v1376_v44 = vpack.c.bf16 %v891_v23, %v890_v22  ;;  %v1749_v23 = vrot.slane %v1634_v54, %v1641_v61 }
  0x1a   : > { %1363 = vmatpush3.bf16.msra.mxu0 %v1360_v48  ;;  %v1372_v37 = vpack.c.bf16 %v889_v34, %v888_v33 }
  0x1b   : > { %1290 = vmatmul.mubr.msk.bf16.vlgmr.msra.gmra.mrb[4].mxu1 %vm480_vm1, %v659_v14  ;;  %1365 = vmatprep.subr.bf16.mxu0 %v1364_v51 }
  0x1c   : > { %1293 = vmatprep.mubr.msk.bf16.mxu1 %vm1458_vm0, %v1457_v1 }
  0x1d   : > { %1270 = vmatmul.mubr.msk.bf16.gmra.mrb[4].mxu0 %vm480_vm1, %v453_v52 }
  0x1e   : > { %1273 = vmatprep.mubr.msk.bf16.mxu0 %vm1458_vm0, %v1457_v1  ;;  %1367 = vmatpush3.bf16.msra.mxu0 %v1364_v51 }
  0x23   : > { %1294 = vmatmul.mubr.msk.bf16.gmra.mrb[8].mxu1 %vm480_vm1, %v660_v21 }
  0x24   : > { %1297 = vmatprep.mubr.msk.bf16.mxu1 %vm1458_vm0, %v1457_v1 }
  0x25   : > { %1274 = vmatmul.mubr.msk.bf16.gmra.mrb[8].mxu0 %vm480_vm1, %v454_v36 }
  0x26   : > { %1277 = vmatprep.mubr.msk.bf16.mxu0 %vm1458_vm0, %v1457_v1 }
  0x2b   : > { %1298 = vmatmul.mubr.msk.bf16.gmra.mrb[12].mxu1 %vm480_vm1, %v661_v28  ;;  %v887_v28 = vld [vmem:[%s1910_s7 + $0x38] sm:$0xff] }
  0x2c   : > { %1301 = vmatprep.mubr.msk.bf16.mxu1 %vm1458_vm0, %v1457_v1  ;;  %v1368_v31 = vpack.c.bf16 %v887_v28, %v886_v27 }
  0x2e   : > { %1369 = vmatprep.subr.bf16.mxu0 %v1368_v31 }
  0x2f   : > { %1371 = vmatpush3.bf16.msra.mxu0 %v1368_v31 }
  0x30   : > { %1373 = vmatprep.subr.bf16.mxu0 %v1372_v37 }
  0x33   : > { %1302 = vmatmul.mubr.msk.bf16.gmra.mrb[16].mxu1 %vm480_vm1, %v662_v35  ;;  %1375 = vmatpush3.bf16.msra.mxu0 %v1372_v37 }
  0x34   : > { %1305 = vmatprep.mubr.msk.bf16.mxu1 %vm1458_vm0, %v1457_v1  ;;  %1377 = vmatprep.subr.bf16.mxu0 %v1376_v44  ;;  %v455_v1 = vpack.c.bf16 %v1592_v30, %v1589_v29  ;;  %v894_v29 = vld [vmem:[%s1910_s7 + $0x70] sm:$0xff]  ;;  %v895_v30 = vld [vmem:[%s1910_s7 + $0x78] sm:$0xff] }
  0x36   : > { %1278 = vmatmul.mubr.msk.bf16.gmra.mrb[12].mxu0 %vm480_vm1, %v455_v1 }
  0x37   : > { %1379 = vmatpush3.bf16.msra.mxu0 %v1376_v44 }
  0x38   : > { %1381 = vmatprep.subr.bf16.mxu0 %v1380_v49 }
  0x3b   : > { %1306 = vmatmul.mubr.msk.bf16.gmra.mrb[20].mxu1 %vm480_vm1, %v663_v40  ;;  %1383 = vmatpush3.bf16.msra.mxu0 %v1380_v49 }
  0xe6   : > { %v1637_v57 = vpop.f32.mrb[0].mxu1 }
  0xe7   : > { %v1283_v58 = vpop.f32.mrb[1].mxu1 }
  0xe8   : > { %v1639_v59 = vpop.f32.mrb[2].mxu1  ;;  %v1384_v58 = vpack.c.bf16 %v895_v30, %v894_v29 }
  0xe9   : > { %v1284_v60 = vpop.f32.mrb[3].mxu1 }
  0xea   : > { %1385 = vmatprep.subr.bf16.mxu0 %v1384_v58 }
  0xeb   : > { %1387 = vmatpush3.bf16.msra.mxu0 %v1384_v58 }
  0xee   : > { %v736_v2 = vpop.f32.mrb[4].mxu1 }
  0xef   : > { %v1652_v3 = vadd.f32 %v1646_v63, %v736_v2  ;;  %v1291_v4 = vpop.f32.mrb[5].mxu1  ;;  %v569_v2 = vld [vmem:[%s407_s14] sm:$0xff] }
  0xf0   : > { %v739_v5 = vpop.f32.mrb[6].mxu1  ;;  %v571_v4 = vld [vmem:[%s407_s14 + $0x10] sm:$0xff] }
  0xf1   : > { %v1655_v6 = vadd.f32 %v1646_v63, %v739_v5  ;;  %v1292_v7 = vpop.f32.mrb[7].mxu1  ;;  %v784_v8 = vadd.f32 %v1649_v0, %v1652_v3  ;;  %v579_v5 = vsub.f32 1.0, %v569_v2 }
  0xf2   : > { %v581_v7 = vsub.f32 1.0, %v571_v4 }
  0xf3   : > { %794 = vmax.xlane.f32.xlu0 %v784_v8  ;;  %v785_v9 = vadd.f32 %v1649_v0, %v1655_v6  ;;  %v578_v8 = vld [vmem:[%s407_s14 + $0x48] sm:$0xff] }
  0xf6   : > { %v744_v10 = vpop.f32.mrb[8].mxu1 }
  0xf7   : > { %v1662_v11 = vadd.f32 %v1646_v63, %v744_v10  ;;  %796 = vmax.xlane.f32.xlu0 %v785_v9  ;;  %v1295_v12 = vpop.f32.mrb[9].mxu1  ;;  %v572_v9 = vld [vmem:[%s407_s14 + $0x18] sm:$0xff]  ;;  %v588_v10 = vsub.f32 1.0, %v578_v8 }
  0xf8   : > { %v747_v13 = vpop.f32.mrb[10].mxu1  ;;  %v573_v12 = vld [vmem:[%s407_s14 + $0x20] sm:$0xff] }
  0xf9   : > { %v1665_v14 = vadd.f32 %v1646_v63, %v747_v13  ;;  %v1296_v15 = vpop.f32.mrb[11].mxu1  ;;  %v786_v16 = vadd.f32 %v1649_v0, %v1662_v11  ;;  %v583_v13 = vsub.f32 1.0, %v573_v12 }
  0xfa   : > { %v574_v15 = vld [vmem:[%s407_s14 + $0x28] sm:$0xff] }
  0xfb   : > { %798 = vmax.xlane.f32.xlu1 %v786_v16  ;;  %v787_v17 = vadd.f32 %v1649_v0, %v1665_v14  ;;  %v584_v16 = vsub.f32 1.0, %v574_v15 }
  0xfe   : > { %v752_v18 = vpop.f32.mrb[12].mxu1 }
  0xff   : > { %v1672_v19 = vadd.f32 %v1646_v63, %v752_v18  ;;  %800 = vmax.xlane.f32.xlu1 %v787_v17  ;;  %v1299_v20 = vpop.f32.mrb[13].mxu1  ;;  %v575_v17 = vld [vmem:[%s407_s14 + $0x30] sm:$0xff] }
 0x100   : > { %v755_v21 = vpop.f32.mrb[14].mxu1  ;;  %v585_v18 = vsub.f32 1.0, %v575_v17  ;;  %v576_v20 = vld [vmem:[%s407_s14 + $0x38] sm:$0xff] }
 0x101   : > { %v1675_v24 = vadd.f32 %v1646_v63, %v755_v21  ;;  %v1300_v25 = vpop.f32.mrb[15].mxu1  ;;  %v788_v26 = vadd.f32 %v1649_v0, %v1672_v19  ;;  %v586_v21 = vsub.f32 1.0, %v576_v20 }
 0x102   : > { %v577_v25 = vld [vmem:[%s407_s14 + $0x40] sm:$0xff] }
 0x103   : > { %802 = vmax.xlane.f32.xlu0 %v788_v26  ;;  %v789_v32 = vadd.f32 %v1649_v0, %v1675_v24  ;;  %v587_v26 = vsub.f32 1.0, %v577_v25 }
 0x105   : > { %804 = vmax.xlane.f32.xlu1 %v789_v32 }
 0x106   : > { %v760_v35 = vpop.f32.mrb[16].mxu1 }
 0x107   : > { %v1696_v38 = vadd.f32 %v1646_v63, %v760_v35  ;;  %v1303_v39 = vpop.f32.mrb[17].mxu1 }
 0x108   : > { %v763_v40 = vpop.f32.mrb[18].mxu1 }
 0x109   : > { %v1700_v41 = vadd.f32 %v1646_v63, %v763_v40  ;;  %v1304_v42 = vpop.f32.mrb[19].mxu1  ;;  %v790_v43 = vadd.f32 %v1649_v0, %v1696_v38 }
 0x10b   : > { %806 = vmax.xlane.f32.xlu0 %v790_v43  ;;  %v791_v45 = vadd.f32 %v1649_v0, %v1700_v41 }
 0x10d   : > { %808 = vmax.xlane.f32.xlu1 %v791_v45 }
 0x10e   : > { %v768_v48 = vpop.f32.mrb[20].mxu1 }
 0x10f   : > { %v1723_v50 = vadd.f32 %v1646_v63, %v768_v48  ;;  %v1307_v51 = vpop.f32.mrb[21].mxu1 }
 0x110   : > { %v771_v52 = vpop.f32.mrb[22].mxu1 }
 0x111   : > { %v1727_v53 = vadd.f32 %v1646_v63, %v771_v52  ;;  %v1308_v55 = vpop.f32.mrb[23].mxu1  ;;  %v792_v56 = vadd.f32 %v1649_v0, %v1723_v50  ;;  %v580_v63 = vsub.f32 1.0, %v570_v62 }
 0x113   : > { %810 = vmax.xlane.f32.xlu0 %v792_v56  ;;  %v793_v60 = vadd.f32 %v1649_v0, %v1727_v53  ;;  %v582_v0 = vsub.f32 1.0, %v572_v9 }
 0x115   : > { %812 = vmax.xlane.f32.xlu1 %v793_v60  ;;  %v530_v60 = vpop.f32.mrb[0].mxu0 }
 0x126   : > { %596 = vperm.xlu1 %1404, %v580_v63   ;;  %v1267_v63 = vpop.f32.mrb[1].mxu0 }
 0x129   : > { %591 = vperm.xlu0 %1403, %v579_v5   ;;  %v533_v5 = vpop.f32.mrb[2].mxu0 }
 0x12a   : > { %601 = vperm.xlu1 %1404, %v581_v7   ;;  %v1268_v9 = vpop.f32.mrb[3].mxu0 }
 0x12d   : > { %636 = vperm.xlu0 %1403, %v588_v10  }
 0x12e   : > { %606 = vperm.xlu1 %1404, %v582_v0  }
 0x132   : > { %611 = vperm.xlu1 %1404, %v583_v13  }
 0x136   : > { %616 = vperm.xlu1 %1404, %v584_v16  }
 0x13a   : > { %621 = vperm.xlu1 %1404, %v585_v18   ;;  %v538_v18 = vpop.f32.mrb[4].mxu0 }
 0x13e   : > { %626 = vperm.xlu1 %1404, %v586_v21   ;;  %v1271_v21 = vpop.f32.mrb[5].mxu0 }
 0x142   : > { %631 = vperm.xlu1 %1404, %v587_v26  }
 0x180   : > { %v795_v27 = vpop.xlane.xlu0 %794 }
 0x181   : > { %v814_v28 = vsub.f32 %v1652_v3, %v795_v27  ;;  %v541_v27 = vpop.f32.mrb[6].mxu0 }
 0x183   : > { %v1209_v31 = vclamps-f32 %v814_v28, 80.0  ;;  %v1775_v28 = vld [vmem:[%s1907_s4] ss:$0 sm:$0xff] }
 0x184   : > { %v797_v32 = vpop.xlane.xlu0 %796 }
 0x185   : > { %v844_v33 = vmul.f32 1.442695, %v1209_v31  ;;  %v815_v34 = vsub.f32 %v1655_v6, %v797_v32 }
 0x187   : > { %1409 = vpow2.f32 %v844_v33  ;;  %v1210_v35 = vclamps-f32 %v815_v34, 80.0  ;;  %v1272_v33 = vpop.f32.mrb[7].mxu0 }
 0x188   : > { %v799_v36 = vpop.xlane.xlu1 %798 }
 0x189   : > { %v846_v37 = vmul.f32 1.442695, %v1210_v35  ;;  %v816_v39 = vsub.f32 %v1662_v11, %v799_v36 }
 0x18b   : > { %1411 = vpow2.f32 %v846_v37  ;;  %v1211_v40 = vclamps-f32 %v816_v39, 80.0  ;;  %v534_v37 = vadd.f32 %v1775_v28, %v533_v5 }
 0x18c   : > { %v801_v42 = vpop.xlane.xlu1 %800 }
 0x18d   : > { %v848_v43 = vmul.f32 1.442695, %v1211_v40  ;;  %v817_v22 = vsub.f32 %v1665_v14, %v801_v42 }
 0x18f   : > { %1413 = vpow2.f32 %v848_v43  ;;  %v1212_v44 = vclamps-f32 %v817_v22, 80.0  ;;  %v531_v43 = vadd.f32 %v1775_v28, %v530_v60 }
 0x190   : > { %v803_v45 = vpop.xlane.xlu0 %802 }
 0x191   : > { %v1410_v46 = vpop.eup %1409  ;;  %v850_v47 = vmul.f32 1.442695, %v1212_v44  ;;  %v818_v48 = vsub.f32 %v1672_v19, %v803_v45 }
 0x192   : > { %v805_v1 = vpop.xlane.xlu1 %804  ;;  %v1753_v49 = vmul.f32 %v1410_v46, %v1749_v23  ;;  %v539_v46 = vadd.f32 %v1775_v28, %v538_v18 }
 0x193   : > { %1415 = vpow2.f32 %v850_v47  ;;  %v1213_v51 = vclamps-f32 %v818_v48, 80.0  ;;  %v819_v52 = vsub.f32 %v1675_v24, %v805_v1 }
 0x194   : > { %1341 = vmatprep.mubr.f32.mxu0 %v1753_v49 }
 0x195   : > { %v1412_v55 = vpop.eup %1411  ;;  %v852_v56 = vmul.f32 1.442695, %v1213_v51  ;;  %v1214_v29 = vclamps-f32 %v819_v52, 80.0 }
 0x196   : > { %v1758_v30 = vmul.f32 %v1412_v55, %v1749_v23 }
 0x197   : > { %1417 = vpow2.f32 %v852_v56  ;;  %v854_v58 = vmul.f32 1.442695, %v1214_v29  ;;  %v566_v56 = vadd.f32 %v1775_v28, %v1639_v59 }
 0x198   : > { %1342 = vmatmul.mubr.f32.vlgmr.msra.gmra.mrb[16].mxu0 %v1758_v30  ;;  %v807_v62 = vpop.xlane.xlu0 %806 }
 0x199   : > { %v1414_v2 = vpop.eup %1413  ;;  %1419 = vpow2.f32 %v854_v58  ;;  %v820_v4 = vsub.f32 %v1696_v38, %v807_v62  ;;  %v542_v58 = vadd.f32 %v1775_v28, %v541_v27 }
 0x19a   : > { %v809_v7 = vpop.xlane.xlu1 %808  ;;  %v1763_v8 = vmul.f32 %v1414_v2, %v1749_v23 }
 0x19b   : > { %v1215_v10 = vclamps-f32 %v820_v4, 80.0  ;;  %v821_v0 = vsub.f32 %v1700_v41, %v809_v7 }
 0x19c   : > { %1344 = vmatprep.mubr.f32.mxu0 %v1763_v8 }
 0x19d   : > { %v1416_v12 = vpop.eup %1415  ;;  %v856_v13 = vmul.f32 1.442695, %v1215_v10  ;;  %v1216_v15 = vclamps-f32 %v821_v0, 80.0 }
 0x19e   : > { %v1768_v16 = vmul.f32 %v1416_v12, %v1749_v23 }
 0x19f   : > { %1421 = vpow2.f32 %v856_v13  ;;  %v858_v17 = vmul.f32 1.442695, %v1216_v15  ;;  %v563_v15 = vadd.f32 %v1775_v28, %v1637_v57 }
 0x1a0   : > { %1345 = vmatmul.mubr.f32.gmra.mrb[18].mxu0 %v1768_v16  ;;  %v811_v20 = vpop.xlane.xlu0 %810 }
 0x1a1   : > { %v1418_v25 = vpop.eup %1417  ;;  %1423 = vpow2.f32 %v858_v17  ;;  %v822_v26 = vsub.f32 %v1723_v50, %v811_v20  ;;  %v546_v20 = vpop.f32.mrb[8].mxu0 }
 0x1a2   : > { %v813_v31 = vpop.xlane.xlu1 %812  ;;  %v1778_v32 = vmul.f32 %v1418_v25, %v1749_v23  ;;  %v547_v21 = vadd.f32 %v1775_v28, %v546_v20 }
 0x1a3   : > { %v1420_v34 = vpop.eup %1419  ;;  %v1217_v35 = vclamps-f32 %v822_v26, 80.0  ;;  %v823_v36 = vsub.f32 %v1727_v53, %v813_v31 }
 0x1a4   : > { %1347 = vmatprep.mubr.f32.mxu0 %v1778_v32  ;;  %v1784_v39 = vmul.f32 %v1420_v34, %v1749_v23 }
 0x1a5   : > { %v860_v40 = vmul.f32 1.442695, %v1217_v35  ;;  %v1218_v42 = vclamps-f32 %v823_v36, 80.0 }
 0x1a6   : > { %1348 = vmatmul.mubr.f32.gmra.mrb[20].mxu0 %v1784_v39  ;;  %v597_v22 = vpop.permute.xlu1 %596 }
 0x1a7   : > { %1425 = vpow2.f32 %v860_v40  ;;  %v862_v44 = vmul.f32 1.442695, %v1218_v42  ;;  %v640_v45 = vmul.f32 %v597_v22, %v534_v37  ;;  %v896_v22 = vsub.f32 1.0, %v1634_v54 }
 0x1a8   : > { %v592_v47 = vpop.permute.xlu0 %591 }
 0x1a9   : > { %v1422_v48 = vpop.eup %1421  ;;  %1427 = vpow2.f32 %v862_v44  ;;  %v639_v1 = vmul.f32 %v592_v47, %v531_v43  ;;  %650 = vst.msk [vmem:[%s1793_s19 + $0x8] sm:$0xff] %vm480_vm1, %v640_v45  ;;  %v1842_v44 = vrot.slane %v896_v22, %v1641_v61 }
 0x1aa   : > { %v602_v51 = vpop.permute.xlu1 %601  ;;  %v1798_v52 = vmul.f32 %v1422_v48, %v1749_v23 }
 0x1ab   : > { %v1424_v55 = vpop.eup %1423  ;;  %649 = vst.msk [vmem:[%s1793_s19] sm:$0xff] %vm480_vm1, %v639_v1  ;;  %v641_v29 = vmul.f32 %v602_v51, %v539_v46  ;;  %v1047_v22 = vmul.f32 %v1842_v44, %v1727_v53 }
 0x1ac   : > { %1350 = vmatprep.mubr.f32.mxu0 %v1798_v52  ;;  %v637_v60 = vpop.permute.xlu0 %636  ;;  %v1807_v62 = vmul.f32 %v1424_v55, %v1749_v23 }
 0x1ad   : > { %v648_v63 = vmul.f32 %v637_v60, %v566_v56  ;;  %651 = vst.msk [vmem:[%s1793_s19 + $0x10] sm:$0xff] %vm480_vm1, %v641_v29  ;;  %v1039_v56 = vmul.f32 %v1842_v44, %v1655_v6  ;;  %v1038_v60 = vmul.f32 %v1842_v44, %v1652_v3 }
 0x1ae   : > { %1351 = vmatmul.mubr.f32.gmra.mrb[22].mxu0 %v1807_v62  ;;  %v607_v2 = vpop.permute.xlu1 %606 }
 0x1af   : > { %658 = vst.msk [vmem:[%s1793_s19 + $0x48] sm:$0xff] %vm480_vm1, %v648_v63  ;;  %v642_v59 = vmul.f32 %v607_v2, %v542_v58 }
 0x1b1   : > { %v1426_v4 = vpop.eup %1425  ;;  %652 = vst.msk [vmem:[%s1793_s19 + $0x18] sm:$0xff] %vm480_vm1, %v642_v59 }
 0x1b2   : > { %v612_v5 = vpop.permute.xlu1 %611  ;;  %v1817_v7 = vmul.f32 %v1426_v4, %v1749_v23 }
 0x1b3   : > { %v1428_v9 = vpop.eup %1427  ;;  %v643_v26 = vmul.f32 %v612_v5, %v547_v21 }
 0x1b4   : > { %1353 = vmatprep.mubr.f32.mxu0 %v1817_v7  ;;  %v1821_v10 = vmul.f32 %v1428_v9, %v1749_v23  ;;  %v1275_v23 = vpop.f32.mrb[9].mxu0  ;;  %v1041_v9 = vmul.f32 %v1842_v44, %v1665_v14 }
 0x1b5   : > { %v549_v25 = vpop.f32.mrb[10].mxu0  ;;  %653 = vst.msk [vmem:[%s1793_s19 + $0x20] sm:$0xff] %vm480_vm1, %v643_v26  ;;  %v1042_v23 = vmul.f32 %v1842_v44, %v1672_v19  ;;  %v1045_v19 = vmul.f32 %v1842_v44, %v1700_v41 }
 0x1b6   : > { %1354 = vmatmul.mubr.f32.gmra.mrb[24].mxu0 %v1821_v10  ;;  %v617_v0 = vpop.permute.xlu1 %616  ;;  %v550_v27 = vadd.f32 %v1775_v28, %v549_v25  ;;  %v1276_v31 = vpop.f32.mrb[11].mxu0 }
 0x1b7   : > { %v554_v57 = vpop.f32.mrb[12].mxu0 }
 0x1b8   : > { %v644_v33 = vmul.f32 %v617_v0, %v550_v27  ;;  %v555_v34 = vadd.f32 %v1775_v28, %v554_v57  ;;  %v1279_v35 = vpop.f32.mrb[13].mxu0 }
 0x1b9   : > { %v557_v36 = vpop.f32.mrb[14].mxu0  ;;  %v1044_v35 = vmul.f32 %v1842_v44, %v1696_v38 }
 0x1ba   : > { %v622_v12 = vpop.permute.xlu1 %621  ;;  %654 = vst.msk [vmem:[%s1793_s19 + $0x28] sm:$0xff] %vm480_vm1, %v644_v33  ;;  %v558_v40 = vadd.f32 %v1775_v28, %v557_v36  ;;  %v1280_v42 = vpop.f32.mrb[15].mxu0 }
 0x1bb   : > { %v645_v37 = vmul.f32 %v622_v12, %v555_v34  ;;  %v1040_v12 = vmul.f32 %v1842_v44, %v1662_v11  ;;  %v1043_v11 = vmul.f32 %v1842_v44, %v1675_v24 }
 0x1bd   : > { %655 = vst.msk [vmem:[%s1793_s19 + $0x30] sm:$0xff] %vm480_vm1, %v645_v37 }
 0x1be   : > { %v627_v13 = vpop.permute.xlu1 %626 }
 0x1bf   : > { %v646_v43 = vmul.f32 %v627_v13, %v558_v40 }
 0x1c1   : > { %656 = vst.msk [vmem:[%s1793_s19 + $0x38] sm:$0xff] %vm480_vm1, %v646_v43 }
 0x1c2   : > { %v632_v17 = vpop.permute.xlu1 %631 }
 0x1c3   : > { %v647_v18 = vmul.f32 %v632_v17, %v563_v15 }
 0x1c5   : > { %657 = vst.msk [vmem:[%s1793_s19 + $0x40] sm:$0xff] %vm480_vm1, %v647_v18 }
 0x26b   : > { %v1343_v45 = vpop.f32.mrb[16].mxu0 }
 0x26c   : > { %v975_v46 = vadd.f32 %v1343_v45, %v1842_v44  ;;  %v969_v47 = vpop.f32.mrb[17].mxu0 }
 0x26d   : > { %v970_v48 = vadd.f32 %v969_v47, %v1842_v44 }
 0x26e   : > { %1429 = vrcp.f32 %v975_v46 }
 0x26f   : > { %1431 = vrcp.f32 %v970_v48 }
 0x273   : > { %v1346_v28 = vpop.f32.mrb[18].mxu0 }
 0x274   : > { %v985_v1 = vadd.f32 %v1346_v28, %v1842_v44  ;;  %v979_v51 = vpop.f32.mrb[19].mxu0 }
 0x275   : > { %v980_v55 = vadd.f32 %v979_v51, %v1842_v44 }
 0x276   : > { %1433 = vrcp.f32 %v985_v1 }
 0x277   : > { %1435 = vrcp.f32 %v980_v55 }
 0x278   : > { %v1430_v54 = vpop.eup %1429 }
 0x279   : > { %v1432_v61 = vpop.eup %1431  ;;  %v1021_v29 = vmul.f32 %v1430_v54, %v1758_v30  ;;  %v1349_v58 = vpop.f32.mrb[20].mxu0 }
 0x27a   : > { %v1019_v63 = vmul.f32 %v1432_v61, %v1753_v49  ;;  %v995_v2 = vadd.f32 %v1349_v58, %v1842_v44  ;;  %v989_v59 = vpop.f32.mrb[21].mxu0 }
 0x27b   : > { %v1049_v4 = vadd.f32 %v1039_v56, %v1021_v29  ;;  %v990_v6 = vadd.f32 %v989_v59, %v1842_v44 }
 0x27c   : > { %v1048_v30 = vadd.f32 %v1038_v60, %v1019_v63  ;;  %1437 = vrcp.f32 %v995_v2 }
 0x27d   : > { %1059 = vst [vmem:[%s1857_s23 + $0x8] sm:$0xff] %v1049_v4  ;;  %1439 = vrcp.f32 %v990_v6 }
 0x27e   : > { %1058 = vst [vmem:[%s1857_s23] sm:$0xff] %v1048_v30 }
 0x280   : > { %v1434_v3 = vpop.eup %1433 }
 0x281   : > { %v1436_v5 = vpop.eup %1435  ;;  %v1025_v49 = vmul.f32 %v1434_v3, %v1768_v16  ;;  %v1352_v0 = vpop.f32.mrb[22].mxu0 }
 0x282   : > { %v1023_v13 = vmul.f32 %v1436_v5, %v1763_v8  ;;  %v1005_v15 = vadd.f32 %v1352_v0, %v1842_v44  ;;  %v999_v17 = vpop.f32.mrb[23].mxu0 }
 0x283   : > { %v1051_v18 = vadd.f32 %v1041_v9, %v1025_v49  ;;  %v1000_v20 = vadd.f32 %v999_v17, %v1842_v44 }
 0x284   : > { %v1050_v21 = vadd.f32 %v1040_v12, %v1023_v13  ;;  %1441 = vrcp.f32 %v1005_v15 }
 0x285   : > { %1061 = vst [vmem:[%s1857_s23 + $0x18] sm:$0xff] %v1051_v18  ;;  %1443 = vrcp.f32 %v1000_v20 }
 0x286   : > { %v1438_v14 = vpop.eup %1437  ;;  %1060 = vst [vmem:[%s1857_s23 + $0x10] sm:$0xff] %v1050_v21 }
 0x287   : > { %v1440_v16 = vpop.eup %1439  ;;  %v1029_v8 = vmul.f32 %v1438_v14, %v1784_v39 }
 0x288   : > { %v1027_v25 = vmul.f32 %v1440_v16, %v1778_v32 }
 0x289   : > { %v1053_v26 = vadd.f32 %v1043_v11, %v1029_v8  ;;  %v1355_v27 = vpop.f32.mrb[24].mxu0 }
 0x28a   : > { %v1052_v31 = vadd.f32 %v1042_v23, %v1027_v25  ;;  %v1015_v33 = vadd.f32 %v1355_v27, %v1842_v44  ;;  %v1009_v57 = vpop.f32.mrb[25].mxu0 }
 0x28b   : > { %1063 = vst [vmem:[%s1857_s23 + $0x28] sm:$0xff] %v1053_v26  ;;  %v1010_v34 = vadd.f32 %v1009_v57, %v1842_v44 }
 0x28c   : > { %1062 = vst [vmem:[%s1857_s23 + $0x20] sm:$0xff] %v1052_v31  ;;  %1445 = vrcp.f32 %v1015_v33 }
 0x28d   : > { %1447 = vrcp.f32 %v1010_v34 }
 0x28e   : > { %v1442_v24 = vpop.eup %1441 }
 0x28f   : > { %v1444_v39 = vpop.eup %1443  ;;  %v1033_v32 = vmul.f32 %v1442_v24, %v1807_v62  ;;  %v1046_v62 = vmul.f32 %v1842_v44, %v1723_v50 }
 0x290   : > { %v1031_v36 = vmul.f32 %v1444_v39, %v1798_v52 }
 0x291   : > { %v1055_v37 = vadd.f32 %v1045_v19, %v1033_v32 }
 0x292   : > { %v1054_v40 = vadd.f32 %v1044_v35, %v1031_v36 }
 0x293   : > { %1065 = vst [vmem:[%s1857_s23 + $0x38] sm:$0xff] %v1055_v37 }
 0x294   : > { %1064 = vst [vmem:[%s1857_s23 + $0x30] sm:$0xff] %v1054_v40 }
 0x296   : > { %v1446_v42 = vpop.eup %1445 }
 0x297   : > { %v1448_v43 = vpop.eup %1447  ;;  %v1037_v41 = vmul.f32 %v1446_v42, %v1821_v10 }
 0x298   : > { %v1035_v45 = vmul.f32 %v1448_v43, %v1817_v7 }
 0x299   : > { %v1057_v46 = vadd.f32 %v1047_v22, %v1037_v41 }
 0x29a   : > { %v1056_v38 = vadd.f32 %v1046_v62, %v1035_v45 }
 0x29b   : > { %1067 = vst [vmem:[%s1857_s23 + $0x48] sm:$0xff] %v1057_v46 }
 0x29c   : > { %1066 = vst [vmem:[%s1857_s23 + $0x40] sm:$0xff] %v1056_v38 }
 0x29d PF: > { %s21_s13 = sadd.s32 1, %s1455_s13  }
 0x29e   : > { %p18_p4 = scmp.ge.s32.totalorder %s21_s13, 4  }
 0x2a0   :  { %20 = sbr.rel (!%p18_p4) target bundleno = 1 (0x1), region = 104 }

// kernel: _encoder_forward.11
= control target key start
LH: loop header
LB: loop body
LE: loop exit
PB: predicated region body
PF: predicated region fallthrough
CT: control target
= control target key end

     0   :  { %s1227_s30 = smov 0   ;;  %s1589_s0 = inlined_call_operand.vmem [shape: f32[160,32], index: 0, kind: input, shape index: {}]   ;;  %s1590_s1 = inlined_call_operand.vmem [shape: bf16[32,64], index: 1, kind: input, shape index: {}]   ;;  %s1591_s2 = inlined_call_operand.vmem [shape: f32[1,64], index: 2, kind: input, shape index: {}]   ;;  %s1592_s3 = inlined_call_operand.vmem [shape: bf16[64,32], index: 3, kind: input, shape index: {}]   ;;  %s1593_s4 = inlined_call_operand.vmem [shape: f32[1,32], index: 4, kind: input, shape index: {}]   ;;  %s1594_s5 = inlined_call_operand.vmem [shape: f32[1,32], index: 5, kind: input, shape index: {}]   ;;  %s1595_s6 = inlined_call_operand.vmem [shape: f32[1,32], index: 6, kind: input, shape index: {}]   ;;  %s1596_s7 = inlined_call_operand.vmem [shape: f32[1,32], index: 7, kind: input, shape index: {}]   ;;  %s1597_s8 = inlined_call_operand.vmem [shape: f32[1,32], index: 8, kind: input, shape index: {}]   ;;  %s1598_s9 = inlined_call_operand.vmem [shape: f32[160,32], index: 9, kind: output, shape index: {}]  }
   0x1 LB: > { %s1012_s10 = sadd.s32 4294967295, %s1173_s30   ;;  %p1016_p0 = scmp.ge.s32.totalorder %s1173_s30, 1  ;;  %s1173_s30 = sphi %s1227_s30, %s19_s30  }
   0x2   : > { %p288_p1 = scmp.lt.s32.totalorder %s1173_s30, 3 }
   0x4   : > { %p289_p2 = pnand %p1016_p0, %p288_p1 }
   0x5   : > { %v1121_v0 = vld [vmem:[%s1590_s1] sm:$0xff] (!%p289_p2)   ;;  %v1175_v1 = vmov (!%p289_p2), 0.0   ;;  %v1122_v2 = vld [vmem:[%s1590_s1 + $0x8] sm:$0xff] (!%p289_p2)   ;;  %vm1176_vm0 = vmmov (!%p289_p2), 0   ;;  %s324_s15 = smul.u32 (!%p289_p2), 10, %s1012_s10  ;;  %vm375_vm1 = vcmask (!%p289_p2), 261120  }
   0x6   : > { %292 = sbr.rel (%p289_p2) target bundleno = 1116 (0x45c), region = 56  ;;  %1059 = vmatprep.subr.bf16.mxu0 (!%p289_p2), %v1175_v1  ;;  %1083 = vmatprep.subr.bf16.mxu1 (!%p289_p2), %v1175_v1  ;;  %v1123_v3 = vld [vmem:[%s1592_s3] sm:$0xff] (!%p289_p2)   ;;  %v1124_v4 = vld [vmem:[%s1592_s3 + $0x8] sm:$0xff] (!%p289_p2)   ;;  %v1125_v20 = vld [vmem:[%s1592_s3 + $0x10] sm:$0xff] (!%p289_p2)   ;;  %vm518_vm2 = vcmask (!%p289_p2), 523264  }
   0x7   : > { %1060 = vmatpush3.bf16.msra.mxu0 (!%p289_p2), %v1121_v0  ;;  %1063 = vmatprep.mubr.msk.bf16.mxu0 (!%p289_p2), %vm1176_vm0, %v1175_v1  ;;  %p325_p3 = scmp.lt.s32.totalorder (!%p289_p2), %s324_s15, 19  ;;  %v1126_v21 = vld [vmem:[%s1592_s3 + $0x18] sm:$0xff] (!%p289_p2)   ;;  %v1019_v22 = vld [vmem:[%s1591_s2] ss:$0 sm:$0xff] (!%p289_p2) }
   0x8   : > { %1061 = vmatprep.subr.bf16.mxu0 (!%p289_p2), %v1175_v1  ;;  %1091 = vmatprep.mubr.msk.bf16.mxu1 (!%p289_p2), %vm1176_vm0, %v1175_v1 }
   0x9   : > { %1084 = vmatpush3.bf16.msra.mxu1 (!%p289_p2), %v1123_v3 }
   0xa   : > { %1085 = vmatprep.subr.bf16.mxu1 (!%p289_p2), %v1175_v1 }
   0xb   : > { %1062 = vmatpush3.bf16.msra.mxu0 (!%p289_p2), %v1122_v2 }
   0xd   : > { %s1600_s15 = smov (!%p325_p3, %s324_s15), 19  ;;  %1086 = vmatpush3.bf16.msra.mxu1 %v1124_v4 }
   0xe   : > { %s1017_s20 = sshll.u32 %s1600_s15, 3  ;;  %1087 = vmatprep.subr.bf16.mxu1 %v1175_v1 }
   0xf   : > { %s328_s23 = scalar_lea.vmem %s1589_s0, %s1017_s20  ;;  %s1536_s24 = scalar_lea.vmem %s1598_s9, %s1017_s20 }
  0x10   : > { %v1263_v5 = vld [vmem:[%s328_s23] sm:$0xff]  ;;  %v1265_v6 = vld [vmem:[%s328_s23 + $0x8] sm:$0xff]  ;;  %v1273_v8 = vld [vmem:[%s328_s23 + $0x10] sm:$0xff] }
  0x11   : > { %v347_v7 = vpack.c.bf16 %v1265_v6, %v1263_v5  ;;  %v1275_v9 = vld [vmem:[%s328_s23 + $0x18] sm:$0xff]  ;;  %v1282_v11 = vld [vmem:[%s328_s23 + $0x20] sm:$0xff]  ;;  %v1284_v12 = vld [vmem:[%s328_s23 + $0x28] sm:$0xff]  ;;  %1088 = vmatpush3.bf16.msra.mxu1 %v1125_v20 }
  0x12   : > { %v348_v10 = vpack.c.bf16 %v1275_v9, %v1273_v8  ;;  %v349_v13 = vpack.c.bf16 %v1284_v12, %v1282_v11  ;;  %v1291_v14 = vld [vmem:[%s328_s23 + $0x30] sm:$0xff]  ;;  %v1293_v15 = vld [vmem:[%s328_s23 + $0x38] sm:$0xff]  ;;  %v1300_v17 = vld [vmem:[%s328_s23 + $0x40] sm:$0xff]  ;;  %1089 = vmatprep.subr.bf16.mxu1 %v1175_v1 }
  0x13   : > { %1064 = vmatmul.mubr.msk.bf16.vlgmr.msra.gmra.mrb[0].mxu0 %vm375_vm1, %v347_v7  ;;  %v350_v16 = vpack.c.bf16 %v1293_v15, %v1291_v14  ;;  %v1302_v18 = vld [vmem:[%s328_s23 + $0x48] sm:$0xff]  ;;  %v1027_v7 = vld [vmem:[%s1593_s4] ss:$0 sm:$0xff] }
  0x14   : > { %1067 = vmatprep.mubr.msk.bf16.mxu0 %vm1176_vm0, %v1175_v1  ;;  %v351_v19 = vpack.c.bf16 %v1302_v18, %v1300_v17 }
  0x15   : > { %1090 = vmatpush3.bf16.msra.mxu1 %v1126_v21 }
  0x1b   : > { %1068 = vmatmul.mubr.msk.bf16.gmra.mrb[4].mxu0 %vm375_vm1, %v348_v10 }
  0x1c   : > { %1071 = vmatprep.mubr.msk.bf16.mxu0 %vm1176_vm0, %v1175_v1 }
  0x23   : > { %1072 = vmatmul.mubr.msk.bf16.gmra.mrb[8].mxu0 %vm375_vm1, %v349_v13 }
  0x24   : > { %1075 = vmatprep.mubr.msk.bf16.mxu0 %vm1176_vm0, %v1175_v1 }
  0x2b   : > { %1076 = vmatmul.mubr.msk.bf16.gmra.mrb[12].mxu0 %vm375_vm1, %v350_v16 }
  0x2c   : > { %1079 = vmatprep.mubr.msk.bf16.mxu0 %vm1176_vm0, %v1175_v1 }
  0x33   : > { %1080 = vmatmul.mubr.msk.bf16.gmra.mrb[16].mxu0 %vm375_vm1, %v351_v19 }
  0xe6   : > { %v425_v23 = vpop.f32.mrb[0].mxu0 }
  0xe7   : > { %v426_v24 = vadd.f32 %v1019_v22, %v425_v23  ;;  %v1065_v25 = vpop.f32.mrb[1].mxu0 }
  0xe8   : > { %v428_v26 = vpop.f32.mrb[2].mxu0 }
  0xe9   : > { %v429_v27 = vadd.f32 %v1019_v22, %v428_v26  ;;  %v1066_v28 = vpop.f32.mrb[3].mxu0  ;;  %v464_v29 = vmax.f32 %v426_v24, 0.0 }
  0xeb   : > { %v465_v30 = vmax.f32 %v429_v27, 0.0 }
  0xed   : > { %v474_v31 = vpack.c.bf16 %v465_v30, %v464_v29 }
  0xee   : > { %v433_v32 = vpop.f32.mrb[4].mxu0 }
  0xef   : > { %v434_v33 = vadd.f32 %v1019_v22, %v433_v32  ;;  %v1069_v34 = vpop.f32.mrb[5].mxu0  ;;  %1092 = vmatmul.mubr.msk.bf16.vlgmr.msra.gmra.mrb[0].mxu1 %vm518_vm2, %v474_v31 }
  0xf0   : > { %v436_v35 = vpop.f32.mrb[6].mxu0  ;;  %1095 = vmatprep.mubr.msk.bf16.mxu1 %vm1176_vm0, %v1175_v1 }
  0xf1   : > { %v437_v36 = vadd.f32 %v1019_v22, %v436_v35  ;;  %v1070_v37 = vpop.f32.mrb[7].mxu0  ;;  %v466_v38 = vmax.f32 %v434_v33, 0.0 }
  0xf3   : > { %v467_v39 = vmax.f32 %v437_v36, 0.0 }
  0xf5   : > { %v475_v40 = vpack.c.bf16 %v467_v39, %v466_v38 }
  0xf6   : > { %v441_v41 = vpop.f32.mrb[8].mxu0 }
  0xf7   : > { %v442_v42 = vadd.f32 %v1019_v22, %v441_v41  ;;  %v1073_v43 = vpop.f32.mrb[9].mxu0  ;;  %1096 = vmatmul.mubr.msk.bf16.gmra.mrb[4].mxu1 %vm518_vm2, %v475_v40 }
  0xf8   : > { %v444_v44 = vpop.f32.mrb[10].mxu0  ;;  %1099 = vmatprep.mubr.msk.bf16.mxu1 %vm1176_vm0, %v1175_v1 }
  0xf9   : > { %v445_v45 = vadd.f32 %v1019_v22, %v444_v44  ;;  %v1074_v46 = vpop.f32.mrb[11].mxu0  ;;  %v468_v47 = vmax.f32 %v442_v42, 0.0 }
  0xfb   : > { %v469_v48 = vmax.f32 %v445_v45, 0.0 }
  0xfd   : > { %v476_v49 = vpack.c.bf16 %v469_v48, %v468_v47 }
  0xfe   : > { %v449_v50 = vpop.f32.mrb[12].mxu0 }
  0xff   : > { %v450_v51 = vadd.f32 %v1019_v22, %v449_v50  ;;  %v1077_v52 = vpop.f32.mrb[13].mxu0  ;;  %1100 = vmatmul.mubr.msk.bf16.gmra.mrb[8].mxu1 %vm518_vm2, %v476_v49 }
 0x100   : > { %v452_v53 = vpop.f32.mrb[14].mxu0  ;;  %1103 = vmatprep.mubr.msk.bf16.mxu1 %vm1176_vm0, %v1175_v1 }
 0x101   : > { %v453_v54 = vadd.f32 %v1019_v22, %v452_v53  ;;  %v1078_v55 = vpop.f32.mrb[15].mxu0  ;;  %v470_v56 = vmax.f32 %v450_v51, 0.0 }
 0x103   : > { %v471_v57 = vmax.f32 %v453_v54, 0.0 }
 0x105   : > { %v477_v58 = vpack.c.bf16 %v471_v57, %v470_v56 }
 0x106   : > { %v457_v59 = vpop.f32.mrb[16].mxu0 }
 0x107   : > { %v458_v60 = vadd.f32 %v1019_v22, %v457_v59  ;;  %v1081_v61 = vpop.f32.mrb[17].mxu0  ;;  %1104 = vmatmul.mubr.msk.bf16.gmra.mrb[12].mxu1 %vm518_vm2, %v477_v58 }
 0x108   : > { %v460_v62 = vpop.f32.mrb[18].mxu0  ;;  %1107 = vmatprep.mubr.msk.bf16.mxu1 %vm1176_vm0, %v1175_v1 }
 0x109   : > { %v461_v63 = vadd.f32 %v1019_v22, %v460_v62  ;;  %v1082_v0 = vpop.f32.mrb[19].mxu0  ;;  %v472_v2 = vmax.f32 %v458_v60, 0.0 }
 0x10b   : > { %v473_v3 = vmax.f32 %v461_v63, 0.0 }
 0x10d   : > { %v478_v4 = vpack.c.bf16 %v473_v3, %v472_v2 }
 0x10f   : > { %1108 = vmatmul.mubr.msk.bf16.gmra.mrb[16].mxu1 %vm518_vm2, %v478_v4 }
 0x1c2   : > { %v568_v10 = vpop.f32.mrb[0].mxu1 }
 0x1c3   : > { %v569_v13 = vadd.f32 %v1027_v7, %v568_v10  ;;  %v1093_v16 = vpop.f32.mrb[1].mxu1 }
 0x1c4   : > { %v571_v19 = vpop.f32.mrb[2].mxu1 }
 0x1c5   : > { %v572_v20 = vadd.f32 %v1027_v7, %v571_v19  ;;  %v1094_v21 = vpop.f32.mrb[3].mxu1  ;;  %v607_v23 = vadd.f32 %v569_v13, %v1263_v5 }
 0x1c7   : > { %v617_v1 = vsel %vm375_vm1, %v607_v23, 0.0  ;;  %v608_v22 = vadd.f32 %v572_v20, %v1265_v6 }
 0x1c8   : > { %618 = vadd.xlane.f32.xlu0 %v617_v1 }
 0x1c9   : > { %v620_v27 = vsel %vm375_vm1, %v608_v22, 0.0 }
 0x1ca   : > { %v576_v24 = vpop.f32.mrb[4].mxu1 }
 0x1cb   : > { %v577_v25 = vadd.f32 %v1027_v7, %v576_v24  ;;  %v1097_v26 = vpop.f32.mrb[5].mxu1 }
 0x1cc   : > { %621 = vadd.xlane.f32.xlu0 %v620_v27  ;;  %v579_v28 = vpop.f32.mrb[6].mxu1 }
 0x1cd   : > { %v580_v29 = vadd.f32 %v1027_v7, %v579_v28  ;;  %v1098_v30 = vpop.f32.mrb[7].mxu1  ;;  %v609_v31 = vadd.f32 %v577_v25, %v1273_v8 }
 0x1cf   : > { %v623_v32 = vsel %vm375_vm1, %v609_v31, 0.0  ;;  %v610_v5 = vadd.f32 %v580_v29, %v1275_v9 }
 0x1d0   : > { %624 = vadd.xlane.f32.xlu1 %v623_v32 }
 0x1d1   : > { %v626_v35 = vsel %vm375_vm1, %v610_v5, 0.0 }
 0x1d2   : > { %v584_v33 = vpop.f32.mrb[8].mxu1 }
 0x1d3   : > { %v585_v34 = vadd.f32 %v1027_v7, %v584_v33  ;;  %v1101_v6 = vpop.f32.mrb[9].mxu1 }
 0x1d4   : > { %627 = vadd.xlane.f32.xlu1 %v626_v35  ;;  %v587_v36 = vpop.f32.mrb[10].mxu1 }
 0x1d5   : > { %v588_v37 = vadd.f32 %v1027_v7, %v587_v36  ;;  %v1102_v38 = vpop.f32.mrb[11].mxu1  ;;  %v611_v39 = vadd.f32 %v585_v34, %v1282_v11 }
 0x1d7   : > { %v629_v40 = vsel %vm375_vm1, %v611_v39, 0.0  ;;  %v612_v8 = vadd.f32 %v588_v37, %v1284_v12 }
 0x1d8   : > { %630 = vadd.xlane.f32.xlu0 %v629_v40 }
 0x1d9   : > { %v632_v41 = vsel %vm375_vm1, %v612_v8, 0.0 }
 0x1da   : > { %633 = vadd.xlane.f32.xlu1 %v632_v41  ;;  %v592_v9 = vpop.f32.mrb[12].mxu1 }
 0x1db   : > { %v593_v42 = vadd.f32 %v1027_v7, %v592_v9  ;;  %v1105_v43 = vpop.f32.mrb[13].mxu1 }
 0x1dc   : > { %v595_v44 = vpop.f32.mrb[14].mxu1 }
 0x1dd   : > { %v596_v45 = vadd.f32 %v1027_v7, %v595_v44  ;;  %v1106_v46 = vpop.f32.mrb[15].mxu1  ;;  %v613_v47 = vadd.f32 %v593_v42, %v1291_v14 }
 0x1df   : > { %v635_v48 = vsel %vm375_vm1, %v613_v47, 0.0  ;;  %v614_v11 = vadd.f32 %v596_v45, %v1293_v15 }
 0x1e0   : > { %636 = vadd.xlane.f32.xlu0 %v635_v48 }
 0x1e1   : > { %v638_v49 = vsel %vm375_vm1, %v614_v11, 0.0 }
 0x1e2   : > { %639 = vadd.xlane.f32.xlu1 %v638_v49  ;;  %v600_v12 = vpop.f32.mrb[16].mxu1 }
 0x1e3   : > { %v601_v50 = vadd.f32 %v1027_v7, %v600_v12  ;;  %v1109_v51 = vpop.f32.mrb[17].mxu1 }
 0x1e4   : > { %v603_v52 = vpop.f32.mrb[18].mxu1 }
 0x1e5   : > { %v604_v53 = vadd.f32 %v1027_v7, %v603_v52  ;;  %v1110_v54 = vpop.f32.mrb[19].mxu1  ;;  %v615_v55 = vadd.f32 %v601_v50, %v1300_v17 }
 0x1e7   : > { %v641_v56 = vsel %vm375_vm1, %v615_v55, 0.0  ;;  %v616_v14 = vadd.f32 %v604_v53, %v1302_v18 }
 0x1e8   : > { %642 = vadd.xlane.f32.xlu0 %v641_v56 }
 0x1e9   : > { %v644_v57 = vsel %vm375_vm1, %v616_v14, 0.0 }
 0x1ea   : > { %645 = vadd.xlane.f32.xlu1 %v644_v57  ;;  %v1406_v57 = vld [vmem:[%s1594_s5] ss:$0 sm:$0xff] }
 0x255   : > { %v619_v15 = vpop.xlane.xlu0 %618 }
 0x256   : > { %v648_v58 = vmul.f32 0.03125, %v619_v15 }
 0x258   : > { %v1353_v59 = vsub.f32 %v607_v23, %v648_v58 }
 0x259   : > { %v622_v60 = vpop.xlane.xlu0 %621 }
 0x25a   : > { %v649_v61 = vmul.f32 0.03125, %v622_v60  ;;  %v668_v62 = vmul.f32 %v1353_v59, %v1353_v59 }
 0x25c   : > { %v1357_v63 = vsub.f32 %v608_v22, %v649_v61  ;;  %v678_v17 = vsel %vm375_vm1, %v668_v62, 0.0  ;;  %v1412_v61 = vld [vmem:[%s1595_s6] ss:$0 sm:$0xff] }
 0x25d   : > { %v625_v0 = vpop.xlane.xlu1 %624  ;;  %679 = vadd.xlane.f32.xlu0 %v678_v17 }
 0x25e   : > { %v650_v18 = vmul.f32 0.03125, %v625_v0  ;;  %v669_v2 = vmul.f32 %v1357_v63, %v1357_v63 }
 0x260   : > { %v1362_v3 = vsub.f32 %v609_v31, %v650_v18  ;;  %v681_v4 = vsel %vm375_vm1, %v669_v2, 0.0 }
 0x261   : > { %v628_v7 = vpop.xlane.xlu1 %627  ;;  %682 = vadd.xlane.f32.xlu1 %v681_v4 }
 0x262   : > { %v651_v10 = vmul.f32 0.03125, %v628_v7  ;;  %v670_v13 = vmul.f32 %v1362_v3, %v1362_v3 }
 0x264   : > { %v1367_v16 = vsub.f32 %v610_v5, %v651_v10  ;;  %v684_v19 = vsel %vm375_vm1, %v670_v13, 0.0 }
 0x265   : > { %v631_v20 = vpop.xlane.xlu0 %630  ;;  %685 = vadd.xlane.f32.xlu0 %v684_v19 }
 0x266   : > { %v652_v21 = vmul.f32 0.03125, %v631_v20  ;;  %v671_v23 = vmul.f32 %v1367_v16, %v1367_v16 }
 0x267   : > { %v634_v1 = vpop.xlane.xlu1 %633 }
 0x268   : > { %v1372_v22 = vsub.f32 %v611_v39, %v652_v21  ;;  %v653_v24 = vmul.f32 0.03125, %v634_v1  ;;  %v687_v25 = vsel %vm375_vm1, %v671_v23, 0.0 }
 0x269   : > { %688 = vadd.xlane.f32.xlu1 %v687_v25 }
 0x26a   : > { %v1375_v26 = vsub.f32 %v612_v8, %v653_v24  ;;  %v672_v27 = vmul.f32 %v1372_v22, %v1372_v22 }
 0x26c   : > { %v690_v28 = vsel %vm375_vm1, %v672_v27, 0.0  ;;  %v673_v29 = vmul.f32 %v1375_v26, %v1375_v26 }
 0x26d   : > { %v637_v30 = vpop.xlane.xlu0 %636  ;;  %691 = vadd.xlane.f32.xlu0 %v690_v28 }
 0x26e   : > { %v654_v31 = vmul.f32 0.03125, %v637_v30  ;;  %v693_v32 = vsel %vm375_vm1, %v673_v29, 0.0 }
 0x26f   : > { %v640_v5 = vpop.xlane.xlu1 %639  ;;  %694 = vadd.xlane.f32.xlu1 %v693_v32 }
 0x270   : > { %v1383_v33 = vsub.f32 %v613_v47, %v654_v31  ;;  %v655_v34 = vmul.f32 0.03125, %v640_v5 }
 0x272   : > { %v1385_v6 = vsub.f32 %v614_v11, %v655_v34  ;;  %v674_v35 = vmul.f32 %v1383_v33, %v1383_v33 }
 0x274   : > { %v696_v36 = vsel %vm375_vm1, %v674_v35, 0.0  ;;  %v675_v37 = vmul.f32 %v1385_v6, %v1385_v6 }
 0x275   : > { %697 = vadd.xlane.f32.xlu0 %v696_v36  ;;  %v643_v38 = vpop.xlane.xlu0 %642 }
 0x276   : > { %v656_v39 = vmul.f32 0.03125, %v643_v38  ;;  %v699_v40 = vsel %vm375_vm1, %v675_v37, 0.0 }
 0x277   : > { %700 = vadd.xlane.f32.xlu1 %v699_v40  ;;  %v646_v8 = vpop.xlane.xlu1 %645 }
 0x278   : > { %v1393_v41 = vsub.f32 %v615_v55, %v656_v39  ;;  %v657_v9 = vmul.f32 0.03125, %v646_v8 }
 0x27a   : > { %v1395_v42 = vsub.f32 %v616_v14, %v657_v9  ;;  %v676_v43 = vmul.f32 %v1393_v41, %v1393_v41 }
 0x27c   : > { %v702_v44 = vsel %vm375_vm1, %v676_v43, 0.0  ;;  %v677_v45 = vmul.f32 %v1395_v42, %v1395_v42 }
 0x27d   : > { %703 = vadd.xlane.f32.xlu0 %v702_v44 }
 0x27e   : > { %v705_v46 = vsel %vm375_vm1, %v677_v45, 0.0 }
 0x27f   : > { %706 = vadd.xlane.f32.xlu1 %v705_v46 }
 0x2ea   : > { %v680_v47 = vpop.xlane.xlu0 %679 }
 0x2eb   : > { %v708_v48 = vmul.f32 0.03125, %v680_v47 }
 0x2ed   : > { %v718_v11 = vadd.f32 1e-05, %v708_v48 }
 0x2ee   : > { %v683_v49 = vpop.xlane.xlu1 %682 }
 0x2ef   : > { %1127 = vrsqrt.f32 %v718_v11  ;;  %v709_v12 = vmul.f32 0.03125, %v683_v49 }
 0x2f1   : > { %v719_v50 = vadd.f32 1e-05, %v709_v12 }
 0x2f2   : > { %v686_v51 = vpop.xlane.xlu0 %685 }
 0x2f3   : > { %1129 = vrsqrt.f32 %v719_v50  ;;  %v710_v52 = vmul.f32 0.03125, %v686_v51 }
 0x2f5   : > { %v720_v53 = vadd.f32 1e-05, %v710_v52 }
 0x2f6   : > { %v689_v54 = vpop.xlane.xlu1 %688 }
 0x2f7   : > { %1131 = vrsqrt.f32 %v720_v53  ;;  %v711_v55 = vmul.f32 0.03125, %v689_v54 }
 0x2f9   : > { %v1128_v56 = vpop.eup %1127  ;;  %v721_v14 = vadd.f32 1e-05, %v711_v55 }
 0x2fa   : > { %v692_v15 = vpop.xlane.xlu0 %691  ;;  %v738_v58 = vmul.f32 %v1128_v56, %v1353_v59 }
 0x2fb   : > { %1133 = vrsqrt.f32 %v721_v14  ;;  %v712_v60 = vmul.f32 0.03125, %v692_v15 }
 0x2fc   : > { %v695_v62 = vpop.xlane.xlu1 %694  ;;  %v755_v17 = vmul.f32 %v1406_v57, %v738_v58 }
 0x2fd   : > { %v1130_v0 = vpop.eup %1129  ;;  %v722_v18 = vadd.f32 1e-05, %v712_v60  ;;  %v713_v2 = vmul.f32 0.03125, %v695_v62 }
 0x2fe   : > { %v1416_v4 = vadd.f32 %v1412_v61, %v755_v17  ;;  %v739_v7 = vmul.f32 %v1130_v0, %v1357_v63 }
 0x2ff   : > { %1135 = vrsqrt.f32 %v722_v18  ;;  %v723_v59 = vadd.f32 1e-05, %v713_v2 }
 0x300   : > { %v782_v10 = vsel %vm375_vm1, %v1416_v4, 0.0  ;;  %v756_v13 = vmul.f32 %v1406_v57, %v739_v7 }
 0x301   : > { %v1132_v19 = vpop.eup %1131  ;;  %1137 = vrsqrt.f32 %v723_v59  ;;  %783 = vadd.xlane.f32.xlu0 %v782_v10 }
 0x302   : > { %v698_v20 = vpop.xlane.xlu0 %697  ;;  %v1423_v21 = vadd.f32 %v1412_v61, %v756_v13  ;;  %v740_v23 = vmul.f32 %v1132_v19, %v1362_v3 }
 0x303   : > { %v714_v1 = vmul.f32 0.03125, %v698_v20 }
 0x304   : > { %v701_v24 = vpop.xlane.xlu1 %700  ;;  %v785_v63 = vsel %vm375_vm1, %v1423_v21, 0.0  ;;  %v757_v25 = vmul.f32 %v1406_v57, %v740_v23 }
 0x305   : > { %v1134_v27 = vpop.eup %1133  ;;  %v724_v28 = vadd.f32 1e-05, %v714_v1  ;;  %v715_v29 = vmul.f32 0.03125, %v701_v24  ;;  %786 = vadd.xlane.f32.xlu1 %v785_v63 }
 0x306   : > { %v1430_v30 = vadd.f32 %v1412_v61, %v757_v25  ;;  %v741_v31 = vmul.f32 %v1134_v27, %v1367_v16 }
 0x307   : > { %1139 = vrsqrt.f32 %v724_v28  ;;  %v725_v32 = vadd.f32 1e-05, %v715_v29 }
 0x308   : > { %v788_v3 = vsel %vm375_vm1, %v1430_v30, 0.0  ;;  %v758_v5 = vmul.f32 %v1406_v57, %v741_v31 }
 0x309   : > { %v1136_v34 = vpop.eup %1135  ;;  %1141 = vrsqrt.f32 %v725_v32  ;;  %789 = vadd.xlane.f32.xlu0 %v788_v3 }
 0x30a   : > { %v704_v35 = vpop.xlane.xlu0 %703  ;;  %v1437_v36 = vadd.f32 %v1412_v61, %v758_v5  ;;  %v742_v37 = vmul.f32 %v1136_v34, %v1372_v22 }
 0x30b   : > { %v1138_v38 = vpop.eup %1137  ;;  %v716_v39 = vmul.f32 0.03125, %v704_v35 }
 0x30c   : > { %v707_v40 = vpop.xlane.xlu1 %706  ;;  %v791_v16 = vsel %vm375_vm1, %v1437_v36, 0.0  ;;  %v759_v8 = vmul.f32 %v1406_v57, %v742_v37  ;;  %v743_v9 = vmul.f32 %v1138_v38, %v1375_v26 }
 0x30d   : > { %v726_v43 = vadd.f32 1e-05, %v716_v39  ;;  %v717_v44 = vmul.f32 0.03125, %v707_v40  ;;  %792 = vadd.xlane.f32.xlu1 %v791_v16 }
 0x30e   : > { %v776_v45 = vadd.f32 %v1412_v61, %v759_v8  ;;  %v760_v46 = vmul.f32 %v1406_v57, %v743_v9 }
 0x30f   : > { %1143 = vrsqrt.f32 %v726_v43  ;;  %v727_v47 = vadd.f32 1e-05, %v717_v44 }
 0x310   : > { %v794_v22 = vsel %vm375_vm1, %v776_v45, 0.0  ;;  %v777_v48 = vadd.f32 %v1412_v61, %v760_v46 }
 0x311   : > { %v1140_v11 = vpop.eup %1139  ;;  %1145 = vrsqrt.f32 %v727_v47  ;;  %795 = vadd.xlane.f32.xlu0 %v794_v22 }
 0x312   : > { %v797_v49 = vsel %vm375_vm1, %v777_v48, 0.0  ;;  %v744_v26 = vmul.f32 %v1140_v11, %v1383_v33 }
 0x313   : > { %v1142_v12 = vpop.eup %1141  ;;  %798 = vadd.xlane.f32.xlu1 %v797_v49 }
 0x314   : > { %v761_v50 = vmul.f32 %v1406_v57, %v744_v26  ;;  %v745_v51 = vmul.f32 %v1142_v12, %v1385_v6 }
 0x316   : > { %v778_v52 = vadd.f32 %v1412_v61, %v761_v50  ;;  %v762_v53 = vmul.f32 %v1406_v57, %v745_v51 }
 0x318   : > { %v800_v54 = vsel %vm375_vm1, %v778_v52, 0.0  ;;  %v779_v55 = vadd.f32 %v1412_v61, %v762_v53 }
 0x319   : > { %v1144_v56 = vpop.eup %1143  ;;  %801 = vadd.xlane.f32.xlu0 %v800_v54 }
 0x31a   : > { %v803_v14 = vsel %vm375_vm1, %v779_v55, 0.0  ;;  %v746_v33 = vmul.f32 %v1144_v56, %v1393_v41 }
 0x31b   : > { %v1146_v15 = vpop.eup %1145  ;;  %804 = vadd.xlane.f32.xlu1 %v803_v14 }
 0x31c   : > { %v763_v58 = vmul.f32 %v1406_v57, %v746_v33  ;;  %v747_v6 = vmul.f32 %v1146_v15, %v1395_v42 }
 0x31e   : > { %v780_v60 = vadd.f32 %v1412_v61, %v763_v58  ;;  %v764_v62 = vmul.f32 %v1406_v57, %v747_v6 }
 0x320   : > { %v806_v17 = vsel %vm375_vm1, %v780_v60, 0.0  ;;  %v781_v0 = vadd.f32 %v1412_v61, %v764_v62 }
 0x321   : > { %807 = vadd.xlane.f32.xlu0 %v806_v17 }
 0x322   : > { %v809_v18 = vsel %vm375_vm1, %v781_v0, 0.0 }
 0x323   : > { %810 = vadd.xlane.f32.xlu1 %v809_v18 }
 0x38e   : > { %v784_v2 = vpop.xlane.xlu0 %783 }
 0x38f   : > { %v812_v41 = vmul.f32 0.03125, %v784_v2 }
 0x391   : > { %v1466_v7 = vsub.f32 %v1416_v4, %v812_v41 }
 0x392   : > { %v787_v59 = vpop.xlane.xlu1 %786 }
 0x393   : > { %v813_v10 = vmul.f32 0.03125, %v787_v59  ;;  %v832_v42 = vmul.f32 %v1466_v7, %v1466_v7  ;;  %v1528_v59 = vld [vmem:[%s1597_s8] ss:$0 sm:$0xff] }
 0x395   : > { %v1471_v57 = vsub.f32 %v1423_v21, %v813_v10  ;;  %v842_v13 = vsel %vm375_vm1, %v832_v42, 0.0 }
 0x396   : > { %843 = vadd.xlane.f32.xlu0 %v842_v13  ;;  %v790_v61 = vpop.xlane.xlu0 %789 }
 0x397   : > { %v814_v19 = vmul.f32 0.03125, %v790_v61  ;;  %v833_v20 = vmul.f32 %v1471_v57, %v1471_v57 }
 0x399   : > { %v1477_v23 = vsub.f32 %v1430_v30, %v814_v19  ;;  %v845_v4 = vsel %vm375_vm1, %v833_v20, 0.0 }
 0x39a   : > { %846 = vadd.xlane.f32.xlu1 %v845_v4  ;;  %v793_v1 = vpop.xlane.xlu1 %792 }
 0x39b   : > { %v815_v24 = vmul.f32 0.03125, %v793_v1  ;;  %v834_v21 = vmul.f32 %v1477_v23, %v1477_v23 }
 0x39d   : > { %v1483_v63 = vsub.f32 %v1437_v36, %v815_v24  ;;  %v848_v25 = vsel %vm375_vm1, %v834_v21, 0.0 }
 0x39e   : > { %849 = vadd.xlane.f32.xlu0 %v848_v25  ;;  %v796_v27 = vpop.xlane.xlu0 %795 }
 0x39f   : > { %v816_v28 = vmul.f32 0.03125, %v796_v27  ;;  %v835_v29 = vmul.f32 %v1483_v63, %v1483_v63 }
 0x3a0   : > { %v799_v30 = vpop.xlane.xlu1 %798 }
 0x3a1   : > { %v1488_v31 = vsub.f32 %v776_v45, %v816_v28  ;;  %v817_v32 = vmul.f32 0.03125, %v799_v30  ;;  %v851_v3 = vsel %vm375_vm1, %v835_v29, 0.0 }
 0x3a2   : > { %852 = vadd.xlane.f32.xlu1 %v851_v3 }
 0x3a3   : > { %v1491_v5 = vsub.f32 %v777_v48, %v817_v32  ;;  %v836_v34 = vmul.f32 %v1488_v31, %v1488_v31 }
 0x3a5   : > { %v854_v35 = vsel %vm375_vm1, %v836_v34, 0.0  ;;  %v837_v36 = vmul.f32 %v1491_v5, %v1491_v5 }
 0x3a6   : > { %855 = vadd.xlane.f32.xlu0 %v854_v35  ;;  %v802_v37 = vpop.xlane.xlu0 %801 }
 0x3a7   : > { %v818_v38 = vmul.f32 0.03125, %v802_v37  ;;  %v857_v39 = vsel %vm375_vm1, %v837_v36, 0.0 }
 0x3a8   : > { %858 = vadd.xlane.f32.xlu1 %v857_v39  ;;  %v805_v40 = vpop.xlane.xlu1 %804 }
 0x3a9   : > { %v1499_v16 = vsub.f32 %v778_v52, %v818_v38  ;;  %v819_v8 = vmul.f32 0.03125, %v805_v40 }
 0x3ab   : > { %v1501_v9 = vsub.f32 %v779_v55, %v819_v8  ;;  %v838_v43 = vmul.f32 %v1499_v16, %v1499_v16 }
 0x3ad   : > { %v860_v44 = vsel %vm375_vm1, %v838_v43, 0.0  ;;  %v839_v45 = vmul.f32 %v1501_v9, %v1501_v9 }
 0x3ae   : > { %861 = vadd.xlane.f32.xlu0 %v860_v44  ;;  %v808_v46 = vpop.xlane.xlu0 %807 }
 0x3af   : > { %v820_v47 = vmul.f32 0.03125, %v808_v46  ;;  %v863_v22 = vsel %vm375_vm1, %v839_v45, 0.0 }
 0x3b0   : > { %864 = vadd.xlane.f32.xlu1 %v863_v22  ;;  %v811_v48 = vpop.xlane.xlu1 %810 }
 0x3b1   : > { %v1509_v11 = vsub.f32 %v780_v60, %v820_v47  ;;  %v821_v49 = vmul.f32 0.03125, %v811_v48 }
 0x3b3   : > { %v1511_v26 = vsub.f32 %v781_v0, %v821_v49  ;;  %v840_v12 = vmul.f32 %v1509_v11, %v1509_v11  ;;  %v1522_v0 = vld [vmem:[%s1596_s7] ss:$0 sm:$0xff] }
 0x3b5   : > { %v866_v50 = vsel %vm375_vm1, %v840_v12, 0.0  ;;  %v841_v51 = vmul.f32 %v1511_v26, %v1511_v26 }
 0x3b6   : > { %867 = vadd.xlane.f32.xlu0 %v866_v50 }
 0x3b7   : > { %v869_v52 = vsel %vm375_vm1, %v841_v51, 0.0 }
 0x3b8   : > { %870 = vadd.xlane.f32.xlu1 %v869_v52 }
 0x423   : > { %v844_v53 = vpop.xlane.xlu0 %843 }
 0x424   : > { %v872_v54 = vmul.f32 0.03125, %v844_v53 }
 0x426   : > { %v882_v55 = vadd.f32 1e-05, %v872_v54 }
 0x427   : > { %v847_v56 = vpop.xlane.xlu1 %846 }
 0x428   : > { %1147 = vrsqrt.f32 %v882_v55  ;;  %v873_v14 = vmul.f32 0.03125, %v847_v56 }
 0x42a   : > { %v883_v33 = vadd.f32 1e-05, %v873_v14 }
 0x42b   : > { %v850_v15 = vpop.xlane.xlu0 %849 }
 0x42c   : > { %1149 = vrsqrt.f32 %v883_v33  ;;  %v874_v58 = vmul.f32 0.03125, %v850_v15 }
 0x42e   : > { %v884_v6 = vadd.f32 1e-05, %v874_v58 }
 0x42f   : > { %v853_v60 = vpop.xlane.xlu1 %852 }
 0x430   : > { %1151 = vrsqrt.f32 %v884_v6  ;;  %v875_v62 = vmul.f32 0.03125, %v853_v60 }
 0x432   : > { %v1148_v17 = vpop.eup %1147  ;;  %v885_v18 = vadd.f32 1e-05, %v875_v62 }
 0x433   : > { %v902_v2 = vmul.f32 %v1148_v17, %v1466_v7  ;;  %v856_v41 = vpop.xlane.xlu0 %855 }
 0x434   : > { %1153 = vrsqrt.f32 %v885_v18  ;;  %v876_v10 = vmul.f32 0.03125, %v856_v41 }
 0x435   : > { %v919_v42 = vmul.f32 %v1522_v0, %v902_v2  ;;  %v859_v13 = vpop.xlane.xlu1 %858 }
 0x436   : > { %v1150_v61 = vpop.eup %1149  ;;  %v886_v7 = vadd.f32 1e-05, %v876_v10  ;;  %v877_v19 = vmul.f32 0.03125, %v859_v13 }
 0x437   : > { %v936_v20 = vadd.f32 %v1528_v59, %v919_v42  ;;  %v903_v4 = vmul.f32 %v1150_v61, %v1471_v57 }
 0x438   : > { %1155 = vrsqrt.f32 %v886_v7  ;;  %v887_v1 = vadd.f32 1e-05, %v877_v19 }
 0x439   : > { %946 = vst.msk [vmem:[%s1536_s24] sm:$0xff] %vm375_vm1, %v936_v20  ;;  %v920_v24 = vmul.f32 %v1522_v0, %v903_v4 }
 0x43a   : > { %v1152_v21 = vpop.eup %1151  ;;  %1157 = vrsqrt.f32 %v887_v1 }
 0x43b   : > { %v937_v25 = vadd.f32 %v1528_v59, %v920_v24  ;;  %v904_v27 = vmul.f32 %v1152_v21, %v1477_v23  ;;  %v862_v28 = vpop.xlane.xlu0 %861 }
 0x43c   : > { %v878_v29 = vmul.f32 0.03125, %v862_v28 }
 0x43d   : > { %947 = vst.msk [vmem:[%s1536_s24 + $0x8] sm:$0xff] %vm375_vm1, %v937_v25  ;;  %v921_v30 = vmul.f32 %v1522_v0, %v904_v27  ;;  %v865_v57 = vpop.xlane.xlu1 %864 }
 0x43e   : > { %v1154_v32 = vpop.eup %1153  ;;  %v888_v3 = vadd.f32 1e-05, %v878_v29  ;;  %v879_v34 = vmul.f32 0.03125, %v865_v57 }
 0x43f   : > { %v938_v35 = vadd.f32 %v1528_v59, %v921_v30  ;;  %v905_v36 = vmul.f32 %v1154_v32, %v1483_v63 }
 0x440   : > { %1159 = vrsqrt.f32 %v888_v3  ;;  %v889_v37 = vadd.f32 1e-05, %v879_v34 }
 0x441   : > { %948 = vst.msk [vmem:[%s1536_s24 + $0x10] sm:$0xff] %vm375_vm1, %v938_v35  ;;  %v922_v23 = vmul.f32 %v1522_v0, %v905_v36 }
 0x442   : > { %v1156_v38 = vpop.eup %1155  ;;  %1161 = vrsqrt.f32 %v889_v37 }
 0x443   : > { %v939_v39 = vadd.f32 %v1528_v59, %v922_v23  ;;  %v906_v40 = vmul.f32 %v1156_v38, %v1488_v31  ;;  %v868_v8 = vpop.xlane.xlu0 %867 }
 0x444   : > { %v1158_v43 = vpop.eup %1157  ;;  %v880_v44 = vmul.f32 0.03125, %v868_v8 }
 0x445   : > { %949 = vst.msk [vmem:[%s1536_s24 + $0x18] sm:$0xff] %vm375_vm1, %v939_v39  ;;  %v923_v63 = vmul.f32 %v1522_v0, %v906_v40  ;;  %v907_v45 = vmul.f32 %v1158_v43, %v1491_v5  ;;  %v871_v46 = vpop.xlane.xlu1 %870 }
 0x446   : > { %v890_v47 = vadd.f32 1e-05, %v880_v44  ;;  %v881_v22 = vmul.f32 0.03125, %v871_v46 }
 0x447   : > { %v940_v48 = vadd.f32 %v1528_v59, %v923_v63  ;;  %v924_v49 = vmul.f32 %v1522_v0, %v907_v45 }
 0x448   : > { %1163 = vrsqrt.f32 %v890_v47  ;;  %v891_v31 = vadd.f32 1e-05, %v881_v22 }
 0x449   : > { %950 = vst.msk [vmem:[%s1536_s24 + $0x20] sm:$0xff] %vm375_vm1, %v940_v48  ;;  %v941_v12 = vadd.f32 %v1528_v59, %v924_v49 }
 0x44a   : > { %v1160_v50 = vpop.eup %1159  ;;  %1165 = vrsqrt.f32 %v891_v31 }
 0x44b   : > { %951 = vst.msk [vmem:[%s1536_s24 + $0x28] sm:$0xff] %vm375_vm1, %v941_v12  ;;  %v908_v5 = vmul.f32 %v1160_v50, %v1499_v16 }
 0x44c   : > { %v1162_v51 = vpop.eup %1161 }
 0x44d   : > { %v925_v52 = vmul.f32 %v1522_v0, %v908_v5  ;;  %v909_v53 = vmul.f32 %v1162_v51, %v1501_v9 }
 0x44f   : > { %v942_v54 = vadd.f32 %v1528_v59, %v925_v52  ;;  %v926_v55 = vmul.f32 %v1522_v0, %v909_v53 }
 0x451   : > { %952 = vst.msk [vmem:[%s1536_s24 + $0x30] sm:$0xff] %vm375_vm1, %v942_v54  ;;  %v943_v56 = vadd.f32 %v1528_v59, %v926_v55 }
 0x452   : > { %v1164_v14 = vpop.eup %1163 }
 0x453   : > { %953 = vst.msk [vmem:[%s1536_s24 + $0x38] sm:$0xff] %vm375_vm1, %v943_v56  ;;  %v910_v16 = vmul.f32 %v1164_v14, %v1509_v11 }
 0x454   : > { %v1166_v33 = vpop.eup %1165 }
 0x455   : > { %v927_v15 = vmul.f32 %v1522_v0, %v910_v16  ;;  %v911_v58 = vmul.f32 %v1166_v33, %v1511_v26 }
 0x457   : > { %v944_v9 = vadd.f32 %v1528_v59, %v927_v15  ;;  %v928_v6 = vmul.f32 %v1522_v0, %v911_v58 }
 0x459   : > { %954 = vst.msk [vmem:[%s1536_s24 + $0x40] sm:$0xff] %vm375_vm1, %v944_v9  ;;  %v945_v60 = vadd.f32 %v1528_v59, %v928_v6 }
 0x45b   : > { %955 = vst.msk [vmem:[%s1536_s24 + $0x48] sm:$0xff] %vm375_vm1, %v945_v60 }
 0x45c PF: > { %s19_s30 = sadd.s32 1, %s1173_s30  }
 0x45d   : > { %p16_p4 = scmp.ge.s32.totalorder %s19_s30, 4  }
 0x45f   :  { %18 = sbr.rel (!%p16_p4) target bundleno = 1 (0x1), region = 86 }

</bundles_post_ra>
